<compile_context>
chip_gen: v5e
topology: v5e:2x2
jax: 0.10.0
libtpu: 0.0.40
codegen_flags: <defaults>
</compile_context>

<pallas_src>
import functools

import jax
import jax.numpy as jnp
from jax.experimental import pallas as pl
from jax.experimental.pallas import tpu as pltpu


def _round_up(x, m):
    return (x + m - 1) // m * m


# ----------------------------------------------------------------------------
# Fused kernel: entire encoder + decoder for one batch tile.
#   x_ref:  (TB, flat) f32
#   wN_ref: (K, N)     bf16 (full weight, resident in VMEM)
#   bN_ref: (1, N)     f32
#   recon_ref:  (TB, flat)    f32
#   latent_ref: (TB, lat_pad) f32   (lane-dense, padded latent)
# ----------------------------------------------------------------------------
def _fused_autoencoder_kernel(x_ref,
                              w0_ref, b0_ref, w1_ref, b1_ref, w2_ref, b2_ref,
                              w3_ref, b3_ref, w4_ref, b4_ref, w5_ref, b5_ref,
                              recon_ref, latent_ref):
    def layer(h_bf16, w_ref, b_ref, relu):
        # bf16 x bf16 on the MXU, f32 accumulation; f32 epilogue on the VPU.
        acc = jnp.dot(h_bf16, w_ref[...], preferred_element_type=jnp.float32)
        acc = acc + b_ref[...]              # (1, N) broadcast over rows
        if relu:
            acc = jnp.maximum(acc, 0.0)
        return acc

    x = x_ref[...].astype(jnp.bfloat16)

    # Encoder
    h = layer(x, w0_ref, b0_ref, True)
    h = layer(h.astype(jnp.bfloat16), w1_ref, b1_ref, True)
    lat = layer(h.astype(jnp.bfloat16), w2_ref, b2_ref, False)   # (TB, lat_pad)
    latent_ref[...] = lat.astype(latent_ref.dtype)

    # Decoder
    h = layer(lat.astype(jnp.bfloat16), w3_ref, b3_ref, True)
    h = layer(h.astype(jnp.bfloat16), w4_ref, b4_ref, True)
    out = layer(h.astype(jnp.bfloat16), w5_ref, b5_ref, False)
    recon_ref[...] = out.astype(recon_ref.dtype)


# ----------------------------------------------------------------------------
# Wrapper around the single fused pallas_call.
# ----------------------------------------------------------------------------
def autoencoder_apply(packed_params, x_flat, *, lat_pad, batch_tile=256):
    """x_flat: (B, flat) f32 -> (recon_flat (B, flat), latent_padded (B, lat_pad))."""
    B, flat = x_flat.shape

    # Pad batch to a multiple of 8 (sublane) and pick a batch tile.
    b_pad = _round_up(max(B, 1), 8)
    tb = min(batch_tile, b_pad)
    b_pad = _round_up(b_pad, tb)
    grid = (b_pad // tb,)
    if b_pad != B:
        x_flat = jnp.pad(x_flat, ((0, b_pad - B), (0, 0)))

    flat_args = [x_flat]
    in_specs = [pl.BlockSpec((tb, flat), lambda i: (i, 0))]
    flops = 0
    param_bytes = 0
    for (w, b) in packed_params:
        in_specs.append(pl.BlockSpec(w.shape, lambda i: (0, 0)))   # resident weight
        in_specs.append(pl.BlockSpec(b.shape, lambda i: (0, 0)))   # resident bias
        flat_args += [w, b]
        flops += 2 * b_pad * w.shape[0] * w.shape[1]
        param_bytes += w.size * w.dtype.itemsize + b.size * b.dtype.itemsize

    bytes_accessed = (param_bytes
                      + x_flat.size * 4            # input read
                      + b_pad * flat * 4           # reconstruction write
                      + b_pad * lat_pad * 4)       # latent write

    recon_pad, latent_padded = pl.pallas_call(
        _fused_autoencoder_kernel,
        out_shape=(jax.ShapeDtypeStruct((b_pad, flat), jnp.float32),
                   jax.ShapeDtypeStruct((b_pad, lat_pad), jnp.float32)),
        grid=grid,
        in_specs=in_specs,
        out_specs=(pl.BlockSpec((tb, flat), lambda i: (i, 0)),
                   pl.BlockSpec((tb, lat_pad), lambda i: (i, 0))),
        compiler_params=pltpu.CompilerParams(
            dimension_semantics=("parallel",)),   # shard batch tiles over TCs (v7x)
        cost_estimate=pl.CostEstimate(
            flops=flops, transcendentals=0, bytes_accessed=bytes_accessed),
    )(*flat_args)

    return recon_pad[:B], latent_padded[:B]


# ----------------------------------------------------------------------------
# Autoencoder parameters (matches torch module layer sizes).
# Weights are stored as (in_features, out_features) bf16; biases as (1, N) f32.
# NOTE: loading a real PyTorch checkpoint requires transposing its (out, in)
# weights before packing.
# ----------------------------------------------------------------------------
def init_autoencoder_params(key, input_dim, latent_dim):
    c, h, w = input_dim
    flat = c * h * w
    lat_pad = max(_round_up(latent_dim, 128), 128)   # lane-dense latent width
    sizes = [
        (flat, 512),        # encoder L0
        (512, 256),         # encoder L1
        (256, latent_dim),  # encoder L2 (latent)
        (latent_dim, 256),  # decoder L0
        (256, 512),         # decoder L1
        (512, flat),        # decoder L2
    ]
    params = []
    for li, (fan_in, fan_out) in enumerate(sizes):
        key, kw, kb = jax.random.split(key, 3)
        bound = 1.0 / jnp.sqrt(fan_in)   # PyTorch nn.Linear default range
        W = jax.random.uniform(kw, (fan_in, fan_out), jnp.float32, -bound, bound)
        bvec = jax.random.uniform(kb, (fan_out,), jnp.float32, -bound, bound)
        if li == 2:   # pad latent output columns with exact zeros (no-op pad)
            W = jnp.pad(W, ((0, 0), (0, lat_pad - fan_out)))
            bvec = jnp.pad(bvec, (0, lat_pad - fan_out))
        if li == 3:   # pad latent input rows with exact zeros (no-op pad)
            W = jnp.pad(W, ((0, lat_pad - fan_in), (0, 0)))
        params.append((W.astype(jnp.bfloat16), bvec.reshape(1, -1)))
    return params, lat_pad


def autoencoder_forward(packed_params, sample, *, input_dim, latent_dim, lat_pad):
    """sample: (B, C, H, W) f32 -> (reconstruct (B,C,H,W), latent (B, latent_dim))."""
    c, h, w = input_dim
    B = sample.shape[0]
    x = sample.reshape(B, c * h * w)                 # nn.Flatten(1)
    recon_flat, latent_padded = autoencoder_apply(packed_params, x, lat_pad=lat_pad)
    latent = latent_padded[:, :latent_dim]
    reconstruct = recon_flat.reshape(B, c, h, w)     # nn.Unflatten(1, (C,H,W))
    return reconstruct, latent


# ----------------------------------------------------------------------------
# Pure-JAX reference (same bf16 weights / f32 accumulation) for a sanity check.
# ----------------------------------------------------------------------------
def _reference_forward(packed_params, sample, *, input_dim, latent_dim):
    c, h, w = input_dim
    B = sample.shape[0]
    x = sample.reshape(B, c * h * w)

    def layer(hh, wt, bb, relu):
        acc = jnp.dot(hh.astype(jnp.bfloat16), wt,
                      preferred_element_type=jnp.float32) + bb
        return jnp.maximum(acc, 0.0) if relu else acc

    hh = layer(x, *packed_params[0], True)
    hh = layer(hh, *packed_params[1], True)
    lat = layer(hh, *packed_params[2], False)
    hh = layer(lat, *packed_params[3], True)
    hh = layer(hh, *packed_params[4], True)
    out = layer(hh, *packed_params[5], False)
    return out.reshape(B, c, h, w), lat[:, :latent_dim]


if __name__ == "__main__":
    input_dim = (4, 16, 16)   # (C, H, W) -> flat = 1024
    latent_dim = 32
    batch = 2

    key = jax.random.PRNGKey(0)
    key, k_in = jax.random.split(key)
    sample = jax.random.normal(k_in, (batch, *input_dim), jnp.float32)

    params, lat_pad = init_autoencoder_params(key, input_dim, latent_dim)

    fwd = jax.jit(functools.partial(
        autoencoder_forward, input_dim=input_dim,
        latent_dim=latent_dim, lat_pad=lat_pad))
    reconstruct, latent = fwd(params, sample)
    jax.block_until_ready((reconstruct, latent))

    assert reconstruct.shape == (batch, *input_dim)
    assert latent.shape == (batch, latent_dim)
    assert bool(jnp.all(jnp.isfinite(reconstruct)))
    assert bool(jnp.all(jnp.isfinite(latent)))

    # Numerical sanity check against a pure-JAX reference using the same
    # bf16 weights and f32 accumulation.
    ref_recon, ref_latent = _reference_forward(
        params, sample, input_dim=input_dim, latent_dim=latent_dim)
    assert jnp.allclose(reconstruct, ref_recon, atol=1e-3, rtol=1e-2)
    assert jnp.allclose(latent, ref_latent, atol=1e-3, rtol=1e-2)

    print("KERNEL_OK")
</pallas_src>

<mosaic_0001>
module attributes {stable_mosaic.version = 11 : i64} {
  func.func @_fused_autoencoder_kernel(%arg0: i32, %arg1: memref<8x1024xf32, #tpu.memory_space<vmem>>, %arg2: memref<1024x512xbf16, #tpu.memory_space<vmem>>, %arg3: memref<1x512xf32, #tpu.memory_space<vmem>>, %arg4: memref<512x256xbf16, #tpu.memory_space<vmem>>, %arg5: memref<1x256xf32, #tpu.memory_space<vmem>>, %arg6: memref<256x128xbf16, #tpu.memory_space<vmem>>, %arg7: memref<1x128xf32, #tpu.memory_space<vmem>>, %arg8: memref<128x256xbf16, #tpu.memory_space<vmem>>, %arg9: memref<1x256xf32, #tpu.memory_space<vmem>>, %arg10: memref<256x512xbf16, #tpu.memory_space<vmem>>, %arg11: memref<1x512xf32, #tpu.memory_space<vmem>>, %arg12: memref<512x1024xbf16, #tpu.memory_space<vmem>>, %arg13: memref<1x1024xf32, #tpu.memory_space<vmem>>, %arg14: memref<8x1024xf32, #tpu.memory_space<vmem>>, %arg15: memref<8x128xf32, #tpu.memory_space<vmem>>) attributes {dimension_semantics = [#tpu.dimension_semantics<parallel>], iteration_bounds = array<i64: 1>, scalar_prefetch = 0 : i64, scratch_operands = 0 : i64, tpu.core_type = #tpu.core_type<tc>, window_params = [{transform_indices = @transform_0, window_bounds = array<i64: 8, 1024>}, {pipeline_mode = #tpu.pipeline_mode<synchronous>, transform_indices = @transform_1, window_bounds = array<i64: 1024, 512>}, {pipeline_mode = #tpu.pipeline_mode<synchronous>, transform_indices = @transform_2, window_bounds = array<i64: 1, 512>}, {pipeline_mode = #tpu.pipeline_mode<synchronous>, transform_indices = @transform_3, window_bounds = array<i64: 512, 256>}, {pipeline_mode = #tpu.pipeline_mode<synchronous>, transform_indices = @transform_4, window_bounds = array<i64: 1, 256>}, {pipeline_mode = #tpu.pipeline_mode<synchronous>, transform_indices = @transform_5, window_bounds = array<i64: 256, 128>}, {pipeline_mode = #tpu.pipeline_mode<synchronous>, transform_indices = @transform_6, window_bounds = array<i64: 1, 128>}, {pipeline_mode = #tpu.pipeline_mode<synchronous>, transform_indices = @transform_7, window_bounds = array<i64: 128, 256>}, {pipeline_mode = #tpu.pipeline_mode<synchronous>, transform_indices = @transform_8, window_bounds = array<i64: 1, 256>}, {pipeline_mode = #tpu.pipeline_mode<synchronous>, transform_indices = @transform_9, window_bounds = array<i64: 256, 512>}, {pipeline_mode = #tpu.pipeline_mode<synchronous>, transform_indices = @transform_10, window_bounds = array<i64: 1, 512>}, {pipeline_mode = #tpu.pipeline_mode<synchronous>, transform_indices = @transform_11, window_bounds = array<i64: 512, 1024>}, {pipeline_mode = #tpu.pipeline_mode<synchronous>, transform_indices = @transform_12, window_bounds = array<i64: 1, 1024>}, {transform_indices = @transform_13, window_bounds = array<i64: 8, 1024>}, {transform_indices = @transform_14, window_bounds = array<i64: 8, 128>}]} {
    %c0 = arith.constant 0 : index
    %c0_0 = arith.constant 0 : index
    %0 = vector.load %arg1[%c0, %c0_0] : memref<8x1024xf32, #tpu.memory_space<vmem>>, vector<8x1024xf32>
    %1 = arith.truncf %0 : vector<8x1024xf32> to vector<8x1024xbf16>
    %c0_1 = arith.constant 0 : index
    %c0_2 = arith.constant 0 : index
    %2 = vector.load %arg2[%c0_1, %c0_2] : memref<1024x512xbf16, #tpu.memory_space<vmem>>, vector<1024x512xbf16>
    %cst = arith.constant dense<0.000000e+00> : vector<8x512xf32>
    %3 = tpu.matmul %1, %2, %cst {dimension_numbers = #tpu.dot_dimension_numbers<[1], [0], [0], [1], [0, 0, 1, 1], [], []>} : vector<8x1024xbf16>, vector<1024x512xbf16>, vector<8x512xf32> -> vector<8x512xf32>
    %c0_3 = arith.constant 0 : index
    %c0_4 = arith.constant 0 : index
    %4 = vector.load %arg3[%c0_3, %c0_4] : memref<1x512xf32, #tpu.memory_space<vmem>>, vector<1x512xf32>
    %5 = vector.broadcast %4 : vector<1x512xf32> to vector<8x512xf32>
    %6 = arith.addf %3, %5 : vector<8x512xf32>
    %cst_5 = arith.constant 0.000000e+00 : f32
    %7 = vector.broadcast %cst_5 : f32 to vector<8x512xf32>
    %8 = arith.maximumf %6, %7 : vector<8x512xf32>
    %9 = arith.truncf %8 : vector<8x512xf32> to vector<8x512xbf16>
    %c0_6 = arith.constant 0 : index
    %c0_7 = arith.constant 0 : index
    %10 = vector.load %arg4[%c0_6, %c0_7] : memref<512x256xbf16, #tpu.memory_space<vmem>>, vector<512x256xbf16>
    %cst_8 = arith.constant dense<0.000000e+00> : vector<8x256xf32>
    %11 = tpu.matmul %9, %10, %cst_8 {dimension_numbers = #tpu.dot_dimension_numbers<[1], [0], [0], [1], [0, 0, 1, 1], [], []>} : vector<8x512xbf16>, vector<512x256xbf16>, vector<8x256xf32> -> vector<8x256xf32>
    %c0_9 = arith.constant 0 : index
    %c0_10 = arith.constant 0 : index
    %12 = vector.load %arg5[%c0_9, %c0_10] : memref<1x256xf32, #tpu.memory_space<vmem>>, vector<1x256xf32>
    %13 = vector.broadcast %12 : vector<1x256xf32> to vector<8x256xf32>
    %14 = arith.addf %11, %13 : vector<8x256xf32>
    %cst_11 = arith.constant 0.000000e+00 : f32
    %15 = vector.broadcast %cst_11 : f32 to vector<8x256xf32>
    %16 = arith.maximumf %14, %15 : vector<8x256xf32>
    %17 = arith.truncf %16 : vector<8x256xf32> to vector<8x256xbf16>
    %c0_12 = arith.constant 0 : index
    %c0_13 = arith.constant 0 : index
    %18 = vector.load %arg6[%c0_12, %c0_13] : memref<256x128xbf16, #tpu.memory_space<vmem>>, vector<256x128xbf16>
    %cst_14 = arith.constant dense<0.000000e+00> : vector<8x128xf32>
    %19 = tpu.matmul %17, %18, %cst_14 {dimension_numbers = #tpu.dot_dimension_numbers<[1], [0], [0], [1], [0, 0, 1, 1], [], []>} : vector<8x256xbf16>, vector<256x128xbf16>, vector<8x128xf32> -> vector<8x128xf32>
    %c0_15 = arith.constant 0 : index
    %c0_16 = arith.constant 0 : index
    %20 = vector.load %arg7[%c0_15, %c0_16] : memref<1x128xf32, #tpu.memory_space<vmem>>, vector<1x128xf32>
    %21 = vector.broadcast %20 : vector<1x128xf32> to vector<8x128xf32>
    %22 = arith.addf %19, %21 : vector<8x128xf32>
    %c0_17 = arith.constant 0 : index
    %c0_18 = arith.constant 0 : index
    %23 = vector.load %arg15[%c0_17, %c0_18] : memref<8x128xf32, #tpu.memory_space<vmem>>, vector<8x128xf32>
    tpu.vector_store %arg15[%c0_17, %c0_18], %22 {strides = array<i32>} : memref<8x128xf32, #tpu.memory_space<vmem>>, vector<8x128xf32>,
    %24 = arith.truncf %22 : vector<8x128xf32> to vector<8x128xbf16>
    %c0_19 = arith.constant 0 : index
    %c0_20 = arith.constant 0 : index
    %25 = vector.load %arg8[%c0_19, %c0_20] : memref<128x256xbf16, #tpu.memory_space<vmem>>, vector<128x256xbf16>
    %cst_21 = arith.constant dense<0.000000e+00> : vector<8x256xf32>
    %26 = tpu.matmul %24, %25, %cst_21 {dimension_numbers = #tpu.dot_dimension_numbers<[1], [0], [0], [1], [0, 0, 1, 1], [], []>} : vector<8x128xbf16>, vector<128x256xbf16>, vector<8x256xf32> -> vector<8x256xf32>
    %c0_22 = arith.constant 0 : index
    %c0_23 = arith.constant 0 : index
    %27 = vector.load %arg9[%c0_22, %c0_23] : memref<1x256xf32, #tpu.memory_space<vmem>>, vector<1x256xf32>
    %28 = vector.broadcast %27 : vector<1x256xf32> to vector<8x256xf32>
    %29 = arith.addf %26, %28 : vector<8x256xf32>
    %cst_24 = arith.constant 0.000000e+00 : f32
    %30 = vector.broadcast %cst_24 : f32 to vector<8x256xf32>
    %31 = arith.maximumf %29, %30 : vector<8x256xf32>
    %32 = arith.truncf %31 : vector<8x256xf32> to vector<8x256xbf16>
    %c0_25 = arith.constant 0 : index
    %c0_26 = arith.constant 0 : index
    %33 = vector.load %arg10[%c0_25, %c0_26] : memref<256x512xbf16, #tpu.memory_space<vmem>>, vector<256x512xbf16>
    %cst_27 = arith.constant dense<0.000000e+00> : vector<8x512xf32>
    %34 = tpu.matmul %32, %33, %cst_27 {dimension_numbers = #tpu.dot_dimension_numbers<[1], [0], [0], [1], [0, 0, 1, 1], [], []>} : vector<8x256xbf16>, vector<256x512xbf16>, vector<8x512xf32> -> vector<8x512xf32>
    %c0_28 = arith.constant 0 : index
    %c0_29 = arith.constant 0 : index
    %35 = vector.load %arg11[%c0_28, %c0_29] : memref<1x512xf32, #tpu.memory_space<vmem>>, vector<1x512xf32>
    %36 = vector.broadcast %35 : vector<1x512xf32> to vector<8x512xf32>
    %37 = arith.addf %34, %36 : vector<8x512xf32>
    %cst_30 = arith.constant 0.000000e+00 : f32
    %38 = vector.broadcast %cst_30 : f32 to vector<8x512xf32>
    %39 = arith.maximumf %37, %38 : vector<8x512xf32>
    %40 = arith.truncf %39 : vector<8x512xf32> to vector<8x512xbf16>
    %c0_31 = arith.constant 0 : index
    %c0_32 = arith.constant 0 : index
    %41 = vector.load %arg12[%c0_31, %c0_32] : memref<512x1024xbf16, #tpu.memory_space<vmem>>, vector<512x1024xbf16>
    %cst_33 = arith.constant dense<0.000000e+00> : vector<8x1024xf32>
    %42 = tpu.matmul %40, %41, %cst_33 {dimension_numbers = #tpu.dot_dimension_numbers<[1], [0], [0], [1], [0, 0, 1, 1], [], []>} : vector<8x512xbf16>, vector<512x1024xbf16>, vector<8x1024xf32> -> vector<8x1024xf32>
    %c0_34 = arith.constant 0 : index
    %c0_35 = arith.constant 0 : index
    %43 = vector.load %arg13[%c0_34, %c0_35] : memref<1x1024xf32, #tpu.memory_space<vmem>>, vector<1x1024xf32>
    %44 = vector.broadcast %43 : vector<1x1024xf32> to vector<8x1024xf32>
    %45 = arith.addf %42, %44 : vector<8x1024xf32>
    %c0_36 = arith.constant 0 : index
    %c0_37 = arith.constant 0 : index
    %46 = vector.load %arg14[%c0_36, %c0_37] : memref<8x1024xf32, #tpu.memory_space<vmem>>, vector<8x1024xf32>
    tpu.vector_store %arg14[%c0_36, %c0_37], %45 {strides = array<i32>} : memref<8x1024xf32, #tpu.memory_space<vmem>>, vector<8x1024xf32>,
    return
  }
  func.func @transform_0(%arg0: i32) -> (i32, i32) {
    %c0_i32 = arith.constant 0 : i32
    %c0_i32_0 = arith.constant 0 : i32
    return %arg0, %c0_i32 : i32, i32
  }
  func.func @transform_1(%arg0: i32) -> (i32, i32) {
    %c0_i32 = arith.constant 0 : i32
    %c0_i32_0 = arith.constant 0 : i32
    %c0_i32_1 = arith.constant 0 : i32
    return %c0_i32, %c0_i32_0 : i32, i32
  }
  func.func @transform_2(%arg0: i32) -> (i32, i32) {
    %c0_i32 = arith.constant 0 : i32
    %c0_i32_0 = arith.constant 0 : i32
    %c0_i32_1 = arith.constant 0 : i32
    return %c0_i32, %c0_i32_0 : i32, i32
  }
  func.func @transform_3(%arg0: i32) -> (i32, i32) {
    %c0_i32 = arith.constant 0 : i32
    %c0_i32_0 = arith.constant 0 : i32
    %c0_i32_1 = arith.constant 0 : i32
    return %c0_i32, %c0_i32_0 : i32, i32
  }
  func.func @transform_4(%arg0: i32) -> (i32, i32) {
    %c0_i32 = arith.constant 0 : i32
    %c0_i32_0 = arith.constant 0 : i32
    %c0_i32_1 = arith.constant 0 : i32
    return %c0_i32, %c0_i32_0 : i32, i32
  }
  func.func @transform_5(%arg0: i32) -> (i32, i32) {
    %c0_i32 = arith.constant 0 : i32
    %c0_i32_0 = arith.constant 0 : i32
    %c0_i32_1 = arith.constant 0 : i32
    return %c0_i32, %c0_i32_0 : i32, i32
  }
  func.func @transform_6(%arg0: i32) -> (i32, i32) {
    %c0_i32 = arith.constant 0 : i32
    %c0_i32_0 = arith.constant 0 : i32
    %c0_i32_1 = arith.constant 0 : i32
    return %c0_i32, %c0_i32_0 : i32, i32
  }
  func.func @transform_7(%arg0: i32) -> (i32, i32) {
    %c0_i32 = arith.constant 0 : i32
    %c0_i32_0 = arith.constant 0 : i32
    %c0_i32_1 = arith.constant 0 : i32
    return %c0_i32, %c0_i32_0 : i32, i32
  }
  func.func @transform_8(%arg0: i32) -> (i32, i32) {
    %c0_i32 = arith.constant 0 : i32
    %c0_i32_0 = arith.constant 0 : i32
    %c0_i32_1 = arith.constant 0 : i32
    return %c0_i32, %c0_i32_0 : i32, i32
  }
  func.func @transform_9(%arg0: i32) -> (i32, i32) {
    %c0_i32 = arith.constant 0 : i32
    %c0_i32_0 = arith.constant 0 : i32
    %c0_i32_1 = arith.constant 0 : i32
    return %c0_i32, %c0_i32_0 : i32, i32
  }
  func.func @transform_10(%arg0: i32) -> (i32, i32) {
    %c0_i32 = arith.constant 0 : i32
    %c0_i32_0 = arith.constant 0 : i32
    %c0_i32_1 = arith.constant 0 : i32
    return %c0_i32, %c0_i32_0 : i32, i32
  }
  func.func @transform_11(%arg0: i32) -> (i32, i32) {
    %c0_i32 = arith.constant 0 : i32
    %c0_i32_0 = arith.constant 0 : i32
    %c0_i32_1 = arith.constant 0 : i32
    return %c0_i32, %c0_i32_0 : i32, i32
  }
  func.func @transform_12(%arg0: i32) -> (i32, i32) {
    %c0_i32 = arith.constant 0 : i32
    %c0_i32_0 = arith.constant 0 : i32
    %c0_i32_1 = arith.constant 0 : i32
    return %c0_i32, %c0_i32_0 : i32, i32
  }
  func.func @transform_13(%arg0: i32) -> (i32, i32) {
    %c0_i32 = arith.constant 0 : i32
    %c0_i32_0 = arith.constant 0 : i32
    return %arg0, %c0_i32 : i32, i32
  }
  func.func @transform_14(%arg0: i32) -> (i32, i32) {
    %c0_i32 = arith.constant 0 : i32
    %c0_i32_0 = arith.constant 0 : i32
    return %arg0, %c0_i32 : i32, i32
  }
}

</mosaic_0001>

<bundles_post_ra>
// kernel: autoencoder_forward.1
= control target key start
LH: loop header
LB: loop body
LE: loop exit
PB: predicated region body
PF: predicated region fallthrough
CT: control target
= control target key end

     0   :  { %20 = vsyncpa [#allocation3], 0  ;;  %s9295_s0 = inlined_call_operand.vmem [shape: f32[8,1024], index: 0, kind: input, shape index: {}]   ;;  %s9296_s1 = inlined_call_operand.hbm [shape: bf16[1024,512], index: 1, kind: input, shape index: {}]   ;;  %s9297_s2 = inlined_call_operand.vmem [shape: f32[1,512], index: 2, kind: input, shape index: {}]   ;;  %s9298_s3 = inlined_call_operand.hbm [shape: bf16[512,256], index: 3, kind: input, shape index: {}]   ;;  %s9299_s4 = inlined_call_operand.vmem [shape: f32[1,256], index: 4, kind: input, shape index: {}]   ;;  %s9300_s5 = inlined_call_operand.vmem [shape: bf16[256,128], index: 5, kind: input, shape index: {}]   ;;  %s9301_s6 = inlined_call_operand.vmem [shape: f32[1,128], index: 6, kind: input, shape index: {}]   ;;  %s9302_s7 = inlined_call_operand.hbm [shape: bf16[128,256], index: 7, kind: input, shape index: {}]   ;;  %s9303_s8 = inlined_call_operand.vmem [shape: f32[1,256], index: 8, kind: input, shape index: {}]   ;;  %s9304_s9 = inlined_call_operand.hbm [shape: bf16[256,512], index: 9, kind: input, shape index: {}]   ;;  %s9305_s10 = inlined_call_operand.vmem [shape: f32[1,512], index: 10, kind: input, shape index: {}]   ;;  %s9306_s11 = inlined_call_operand.hbm [shape: bf16[512,1024], index: 11, kind: input, shape index: {}]   ;;  %s9307_s12 = inlined_call_operand.vmem [shape: f32[1,1024], index: 12, kind: input, shape index: {}]   ;;  %s9308_s13 = inlined_call_operand.vmem [shape: f32[8,1024], index: 13, kind: output, shape index: {0}]   ;;  %s9309_s14 = inlined_call_operand.vmem [shape: f32[8,128], index: 14, kind: output, shape index: {1}]  }
   0x1   :  { %21 = vsyncpa [#allocation5], 0  ;;  %s44_s15 = sshll.u32 %s9298_s3, 4  ;;  %s45_s15 = int_to_ptr.hbm [resolvable:$true] %s44_s15 }
   0x2   :  { %22 = vsyncpa [#allocation8], 0  ;;  %s8894_s16 = smov [#allocation4]   ;;  %s8895_s18 = smov 128  }
   0x3   :  { %s46_s17 = sshll.u32 %s8894_s16, 4  ;;  %s8896_s19 = smov 8   ;;  %s47_s17 = int_to_ptr.vmem [resolvable:$true] %s46_s17 }
   0x4   :  { %52 = dma.hbm_to_vmem [thread:$0]  %s45_s15, 8192, %s47_s17, [#allocation5], %s8895_s18, %s8895_s18, %s8896_s19  }
   0x5   :  { %s78_s22 = sshll.u32 %s9304_s9, 4  ;;  %s8897_s23 = smov [#allocation7]   ;;  %s79_s22 = int_to_ptr.hbm [resolvable:$true] %s78_s22 }
   0x6   :  { %s80_s24 = sshll.u32 %s8897_s23, 4  ;;  %s29_s27 = sshll.u32 %s9296_s1, 4  ;;  %s81_s24 = int_to_ptr.vmem [resolvable:$true] %s80_s24  ;;  %s30_s27 = int_to_ptr.hbm [resolvable:$true] %s29_s27 }
   0x7   :  { %s8898_s3 = smov 256   ;;  %s8899_s28 = smov 16  }
   0x8   :  { %86 = dma.hbm_to_vmem [thread:$0]  %s79_s22, 8192, %s81_s24, [#allocation8], %s8898_s3, %s8898_s3, %s8899_s28  }
   0x9   :  { %s63_s15 = sshll.u32 %s9302_s7, 4  ;;  %s8900_s16 = smov [#allocation2]   ;;  %s64_s15 = int_to_ptr.hbm [resolvable:$true] %s63_s15 }
   0xa   :  { %s31_s17 = sshll.u32 %s8900_s16, 4  ;;  %s8901_s9 = smov [#allocation6]   ;;  %s32_s17 = int_to_ptr.vmem [resolvable:$true] %s31_s17 }
   0xb   :  { %37 = dma.hbm_to_vmem [thread:$0]  %s30_s27, 32768, %s32_s17, [#allocation3], %s8898_s3, %s8898_s3, %s8899_s28  }
   0xc   :  { %s65_s20 = sshll.u32 %s8901_s9, 4  ;;  %s93_s1 = sshll.u32 %s9306_s11, 4  ;;  %s66_s20 = int_to_ptr.vmem [resolvable:$true] %s65_s20  ;;  %s94_s1 = int_to_ptr.hbm [resolvable:$true] %s93_s1 }
   0xd   :  { %71 = dma.hbm_to_vmem [thread:$0]  %s64_s15, 2048, %s66_s20, [#allocation5], %s8895_s18, %s8895_s18, %s8896_s19  }
   0xe   :  { %s8902_s25 = smov [#allocation9]   ;;  %s8903_s24 = smov 512  }
   0xf   :  { %s95_s22 = sshll.u32 %s8902_s25, 4  ;;  %s8904_s26 = smov 32   ;;  %s96_s22 = int_to_ptr.vmem [resolvable:$true] %s95_s22 }
  0x10   :  { %101 = dma.hbm_to_vmem [thread:$0]  %s94_s1, 32768, %s96_s22, [#allocation8], %s8903_s24, %s8903_s24, %s8904_s26  }
  0x11   :  { %8888 = dma.done.wait [#allocation3], 32768  }
  0x12   :  { %8889 = vsyncadd [#allocation3], 4294934528 }
  0x13   :  { %8890 = dma.done.wait [#allocation5], 10240  }
  0x14   :  { %8891 = vsyncadd [#allocation5], 4294957056 }
  0x15   :  { %8892 = dma.done.wait [#allocation8], 40960  }
  0x16   :  { %8893 = vsyncadd [#allocation8], 4294926336  ;;  %v5509_v0 = vld [vmem:[#allocation2 + $0xe0] sm:$0xf]  ;;  %v8113_v1 = vld [vmem:[#allocation2 + $0xec] sm:$0xf0] }
  0x17   :  { %v5637_v2 = vld [vmem:[#allocation2 + $0x1e0] sm:$0xf]  ;;  %v5510_v3 = vor.u32 %v8113_v1, %v5509_v0  ;;  %v8145_v4 = vld [vmem:[#allocation2 + $0x1ec] sm:$0xf0] }
  0x18   :  { %v5765_v5 = vld [vmem:[#allocation2 + $0x2e0] sm:$0xf]  ;;  %v8177_v6 = vld [vmem:[#allocation2 + $0x2ec] sm:$0xf0]  ;;  %v5638_v7 = vor.u32 %v8145_v4, %v5637_v2 }
  0x19   :  { %v5766_v8 = vor.u32 %v8177_v6, %v5765_v5  ;;  %v5893_v9 = vld [vmem:[#allocation2 + $0x3e0] sm:$0xf]  ;;  %v8209_v10 = vld [vmem:[#allocation2 + $0x3ec] sm:$0xf0]  ;;  %1686 = vmatpush.bf16.msra.mxu0 %v5510_v3 }
  0x1a   :  { %v5493_v11 = vld [vmem:[#allocation2 + $0xc0] sm:$0xf]  ;;  %v5894_v12 = vor.u32 %v8209_v10, %v5893_v9  ;;  %v8109_v13 = vld [vmem:[#allocation2 + $0xcc] sm:$0xf0]  ;;  %1699 = vmatpush.bf16.msra.mxu1 %v5638_v7 }
  0x1b   :  { %v5621_v14 = vld [vmem:[#allocation2 + $0x1c0] sm:$0xf]  ;;  %v8141_v15 = vld [vmem:[#allocation2 + $0x1cc] sm:$0xf0]  ;;  %1712 = vmatpush.bf16.msra.mxu2 %v5766_v8  ;;  %v5494_v16 = vor.u32 %v8109_v13, %v5493_v11 }
  0x1c   :  { %v5622_v17 = vor.u32 %v8141_v15, %v5621_v14  ;;  %v5749_v18 = vld [vmem:[#allocation2 + $0x2c0] sm:$0xf]  ;;  %v8173_v19 = vld [vmem:[#allocation2 + $0x2cc] sm:$0xf0]  ;;  %1725 = vmatpush.bf16.msra.mxu3 %v5894_v12 }
  0x1d   :  { %v5877_v20 = vld [vmem:[#allocation2 + $0x3c0] sm:$0xf]  ;;  %v5750_v21 = vor.u32 %v8173_v19, %v5749_v18  ;;  %v8205_v22 = vld [vmem:[#allocation2 + $0x3cc] sm:$0xf0]  ;;  %1687 = vmatpush.bf16.msra.mxu0 %v5494_v16 }
  0x1e   :  { %v5477_v23 = vld [vmem:[#allocation2 + $0xa0] sm:$0xf]  ;;  %v8105_v24 = vld [vmem:[#allocation2 + $0xac] sm:$0xf0]  ;;  %v5878_v25 = vor.u32 %v8205_v22, %v5877_v20  ;;  %1700 = vmatpush.bf16.msra.mxu1 %v5622_v17 }
  0x1f   :  { %v5605_v26 = vld [vmem:[#allocation2 + $0x1a0] sm:$0xf]  ;;  %v8137_v27 = vld [vmem:[#allocation2 + $0x1ac] sm:$0xf0]  ;;  %v5478_v29 = vor.u32 %v8105_v24, %v5477_v23  ;;  %1713 = vmatpush.bf16.msra.mxu2 %v5750_v21 }
  0x20   :  { %v5733_v28 = vld [vmem:[#allocation2 + $0x2a0] sm:$0xf]  ;;  %v8169_v30 = vld [vmem:[#allocation2 + $0x2ac] sm:$0xf0]  ;;  %v5606_v33 = vor.u32 %v8137_v27, %v5605_v26  ;;  %1726 = vmatpush.bf16.msra.mxu3 %v5878_v25 }
  0x21   :  { %v5861_v31 = vld [vmem:[#allocation2 + $0x3a0] sm:$0xf]  ;;  %v8201_v32 = vld [vmem:[#allocation2 + $0x3ac] sm:$0xf0]  ;;  %v5734_v34 = vor.u32 %v8169_v30, %v5733_v28  ;;  %1688 = vmatpush.bf16.msra.mxu0 %v5478_v29 }
  0x22   :  { %v5461_v35 = vld [vmem:[#allocation2 + $0x80] sm:$0xf]  ;;  %v8101_v36 = vld [vmem:[#allocation2 + $0x8c] sm:$0xf0]  ;;  %v5862_v38 = vor.u32 %v8201_v32, %v5861_v31  ;;  %1701 = vmatpush.bf16.msra.mxu1 %v5606_v33 }
  0x23   :  { %v5589_v37 = vld [vmem:[#allocation2 + $0x180] sm:$0xf]  ;;  %v8133_v39 = vld [vmem:[#allocation2 + $0x18c] sm:$0xf0]  ;;  %v5462_v44 = vor.u32 %v8101_v36, %v5461_v35  ;;  %1714 = vmatpush.bf16.msra.mxu2 %v5734_v34 }
  0x24   :  { %v5717_v40 = vld [vmem:[#allocation2 + $0x280] sm:$0xf]  ;;  %v8165_v41 = vld [vmem:[#allocation2 + $0x28c] sm:$0xf0]  ;;  %v5590_v45 = vor.u32 %v8133_v39, %v5589_v37  ;;  %1727 = vmatpush.bf16.msra.mxu3 %v5862_v38 }
  0x25   :  { %v5845_v42 = vld [vmem:[#allocation2 + $0x380] sm:$0xf]  ;;  %v8197_v43 = vld [vmem:[#allocation2 + $0x38c] sm:$0xf0]  ;;  %v5718_v46 = vor.u32 %v8165_v41, %v5717_v40  ;;  %1689 = vmatpush.bf16.msra.mxu0 %v5462_v44 }
  0x26   :  { %v5445_v47 = vld [vmem:[#allocation2 + $0x60] sm:$0xf]  ;;  %v8097_v48 = vld [vmem:[#allocation2 + $0x6c] sm:$0xf0]  ;;  %v5846_v50 = vor.u32 %v8197_v43, %v5845_v42  ;;  %1702 = vmatpush.bf16.msra.mxu1 %v5590_v45 }
  0x27   :  { %v5573_v49 = vld [vmem:[#allocation2 + $0x160] sm:$0xf]  ;;  %v8129_v51 = vld [vmem:[#allocation2 + $0x16c] sm:$0xf0]  ;;  %v5446_v56 = vor.u32 %v8097_v48, %v5445_v47  ;;  %1715 = vmatpush.bf16.msra.mxu2 %v5718_v46 }
  0x28   :  { %v5701_v52 = vld [vmem:[#allocation2 + $0x260] sm:$0xf]  ;;  %v8161_v53 = vld [vmem:[#allocation2 + $0x26c] sm:$0xf0]  ;;  %v5574_v57 = vor.u32 %v8129_v51, %v5573_v49  ;;  %1728 = vmatpush.bf16.msra.mxu3 %v5846_v50 }
  0x29   :  { %v5829_v54 = vld [vmem:[#allocation2 + $0x360] sm:$0xf]  ;;  %v8193_v55 = vld [vmem:[#allocation2 + $0x36c] sm:$0xf0]  ;;  %v5702_v58 = vor.u32 %v8161_v53, %v5701_v52  ;;  %1690 = vmatpush.bf16.msra.mxu0 %v5446_v56 }
  0x2a   :  { %v5429_v59 = vld [vmem:[#allocation2 + $0x40] sm:$0xf]  ;;  %v8093_v60 = vld [vmem:[#allocation2 + $0x4c] sm:$0xf0]  ;;  %v5830_v62 = vor.u32 %v8193_v55, %v5829_v54  ;;  %1703 = vmatpush.bf16.msra.mxu1 %v5574_v57 }
  0x2b   :  { %v5557_v61 = vld [vmem:[#allocation2 + $0x140] sm:$0xf]  ;;  %v8125_v63 = vld [vmem:[#allocation2 + $0x14c] sm:$0xf0]  ;;  %v5430_v4 = vor.u32 %v8093_v60, %v5429_v59  ;;  %1716 = vmatpush.bf16.msra.mxu2 %v5702_v58 }
  0x2c   :  { %v5685_v0 = vld [vmem:[#allocation2 + $0x240] sm:$0xf]  ;;  %v8157_v1 = vld [vmem:[#allocation2 + $0x24c] sm:$0xf0]  ;;  %v5558_v5 = vor.u32 %v8125_v63, %v5557_v61  ;;  %1729 = vmatpush.bf16.msra.mxu3 %v5830_v62 }
  0x2d   :  { %v5813_v2 = vld [vmem:[#allocation2 + $0x340] sm:$0xf]  ;;  %v8189_v3 = vld [vmem:[#allocation2 + $0x34c] sm:$0xf0]  ;;  %v5686_v6 = vor.u32 %v8157_v1, %v5685_v0  ;;  %1691 = vmatpush.bf16.msra.mxu0 %v5430_v4 }
  0x2e   :  { %v5413_v7 = vld [vmem:[#allocation2 + $0x20] sm:$0xf]  ;;  %v8089_v8 = vld [vmem:[#allocation2 + $0x2c] sm:$0xf0]  ;;  %v5814_v10 = vor.u32 %v8189_v3, %v5813_v2  ;;  %1704 = vmatpush.bf16.msra.mxu1 %v5558_v5 }
  0x2f   :  { %v5541_v9 = vld [vmem:[#allocation2 + $0x120] sm:$0xf]  ;;  %v8121_v11 = vld [vmem:[#allocation2 + $0x12c] sm:$0xf0]  ;;  %v5414_v16 = vor.u32 %v8089_v8, %v5413_v7  ;;  %1717 = vmatpush.bf16.msra.mxu2 %v5686_v6 }
  0x30   :  { %v5669_v12 = vld [vmem:[#allocation2 + $0x220] sm:$0xf]  ;;  %v8153_v13 = vld [vmem:[#allocation2 + $0x22c] sm:$0xf0]  ;;  %v5542_v19 = vor.u32 %v8121_v11, %v5541_v9  ;;  %1730 = vmatpush.bf16.msra.mxu3 %v5814_v10  ;;  %v127_v10 = vld [vmem:[%s9295_s0 + $0x18] sm:$0xff] }
  0x31   :  { %v5797_v14 = vld [vmem:[#allocation2 + $0x320] sm:$0xf]  ;;  %v8185_v15 = vld [vmem:[#allocation2 + $0x32c] sm:$0xf0]  ;;  %v5670_v20 = vor.u32 %v8153_v13, %v5669_v12  ;;  %1692 = vmatpush.bf16.msra.mxu0 %v5414_v16 }
  0x32   :  { %v5397_v17 = vld [vmem:[#allocation2] sm:$0xf]  ;;  %v8085_v18 = vld [vmem:[#allocation2 + $0xc] sm:$0xf0]  ;;  %v5798_v24 = vor.u32 %v8185_v15, %v5797_v14  ;;  %1705 = vmatpush.bf16.msra.mxu1 %v5542_v19  ;;  %v9008_v15 = vpack.c.bf16 %v127_v10, %v127_v10  ;;  %v125_v19 = vld [vmem:[%s9295_s0 + $0x8] sm:$0xff] }
  0x33   :  { %v5525_v21 = vld [vmem:[#allocation2 + $0x100] sm:$0xf]  ;;  %v8117_v22 = vld [vmem:[#allocation2 + $0x10c] sm:$0xf0]  ;;  %v5398_v31 = vor.u32 %v8085_v18, %v5397_v17  ;;  %1718 = vmatpush.bf16.msra.mxu2 %v5670_v20  ;;  %v5639_v10 = vld [vmem:[#allocation2 + $0x1f0] sm:$0xf0] }
  0x34   :  { %v5653_v23 = vld [vmem:[#allocation2 + $0x200] sm:$0xf]  ;;  %v8149_v25 = vld [vmem:[#allocation2 + $0x20c] sm:$0xf0]  ;;  %v5526_v35 = vor.u32 %v8117_v22, %v5525_v21  ;;  %1731 = vmatpush.bf16.msra.mxu3 %v5798_v24 }
  0x35   :  { %v5781_v26 = vld [vmem:[#allocation2 + $0x300] sm:$0xf]  ;;  %v8181_v27 = vld [vmem:[#allocation2 + $0x30c] sm:$0xf0]  ;;  %v5654_v36 = vor.u32 %v8149_v25, %v5653_v23  ;;  %1693 = vmatpush.bf16.msra.mxu0 %v5398_v31  ;;  %v9016_v25 = vpack.c.bf16 %v125_v19, %v125_v19 }
  0x36   :  { %v6021_v28 = vld [vmem:[#allocation2 + $0x4e0] sm:$0xf]  ;;  %v8241_v29 = vld [vmem:[#allocation2 + $0x4ec] sm:$0xf0]  ;;  %v5782_v39 = vor.u32 %v8181_v27, %v5781_v26  ;;  %1706 = vmatpush.bf16.msra.mxu1 %v5526_v35 }
  0x37   :  { %v6149_v30 = vld [vmem:[#allocation2 + $0x5e0] sm:$0xf]  ;;  %v8273_v32 = vld [vmem:[#allocation2 + $0x5ec] sm:$0xf0]  ;;  %v6022_v40 = vor.u32 %v8241_v29, %v6021_v28  ;;  %1719 = vmatpush.bf16.msra.mxu2 %v5654_v36 }
  0x38   :  { %v6277_v33 = vld [vmem:[#allocation2 + $0x6e0] sm:$0xf]  ;;  %v8305_v34 = vld [vmem:[#allocation2 + $0x6ec] sm:$0xf0]  ;;  %v6150_v41 = vor.u32 %v8273_v32, %v6149_v30  ;;  %1732 = vmatpush.bf16.msra.mxu3 %v5782_v39 }
  0x39   :  { %v6405_v37 = vld [vmem:[#allocation2 + $0x7e0] sm:$0xf]  ;;  %v8337_v38 = vld [vmem:[#allocation2 + $0x7ec] sm:$0xf0]  ;;  %v6278_v42 = vor.u32 %v8305_v34, %v6277_v33  ;;  %1738 = vmatpush.bf16.msrb.mxu0 %v6022_v40  ;;  %1707 = vmatmul.bf16.vlgmr.msra.gmra.mxu1 %v9016_v25 }
  0x3a   :  { %v6005_v43 = vld [vmem:[#allocation2 + $0x4c0] sm:$0xf]  ;;  %v8237_v44 = vld [vmem:[#allocation2 + $0x4cc] sm:$0xf0]  ;;  %v6406_v46 = vor.u32 %v8337_v38, %v6405_v37  ;;  %1751 = vmatpush.bf16.msrb.mxu1 %v6150_v41 }
  0x3b   :  { %v6133_v45 = vld [vmem:[#allocation2 + $0x5c0] sm:$0xf]  ;;  %v8269_v47 = vld [vmem:[#allocation2 + $0x5cc] sm:$0xf0]  ;;  %v6006_v52 = vor.u32 %v8237_v44, %v6005_v43  ;;  %1764 = vmatpush.bf16.msrb.mxu2 %v6278_v42  ;;  %1733 = vmatmul.bf16.vlgmr.msra.gmra.mxu3 %v9008_v15 }
  0x3c   :  { %v6261_v48 = vld [vmem:[#allocation2 + $0x6c0] sm:$0xf]  ;;  %v8301_v49 = vld [vmem:[#allocation2 + $0x6cc] sm:$0xf0]  ;;  %v6134_v54 = vor.u32 %v8269_v47, %v6133_v45  ;;  %1777 = vmatpush.bf16.msrb.mxu3 %v6406_v46 }
  0x3d   :  { %v6389_v50 = vld [vmem:[#allocation2 + $0x7c0] sm:$0xf]  ;;  %v8333_v51 = vld [vmem:[#allocation2 + $0x7cc] sm:$0xf0]  ;;  %v6262_v55 = vor.u32 %v8301_v49, %v6261_v48  ;;  %1739 = vmatpush.bf16.msrb.mxu0 %v6006_v52 }
  0x3e   :  { %v5989_v53 = vld [vmem:[#allocation2 + $0x4a0] sm:$0xf]  ;;  %v8233_v56 = vld [vmem:[#allocation2 + $0x4ac] sm:$0xf0]  ;;  %v6390_v59 = vor.u32 %v8333_v51, %v6389_v50  ;;  %1752 = vmatpush.bf16.msrb.mxu1 %v6134_v54 }
  0x3f   :  { %v6117_v57 = vld [vmem:[#allocation2 + $0x5a0] sm:$0xf]  ;;  %v8265_v58 = vld [vmem:[#allocation2 + $0x5ac] sm:$0xf0]  ;;  %v5990_v0 = vor.u32 %v8233_v56, %v5989_v53  ;;  %1765 = vmatpush.bf16.msrb.mxu2 %v6262_v55 }
  0x40   :  { %v6245_v60 = vld [vmem:[#allocation2 + $0x6a0] sm:$0xf]  ;;  %v8297_v61 = vld [vmem:[#allocation2 + $0x6ac] sm:$0xf0]  ;;  %v6118_v1 = vor.u32 %v8265_v58, %v6117_v57  ;;  %1778 = vmatpush.bf16.msrb.mxu3 %v6390_v59 }
  0x41   :  { %v6373_v62 = vld [vmem:[#allocation2 + $0x7a0] sm:$0xf]  ;;  %v8329_v63 = vld [vmem:[#allocation2 + $0x7ac] sm:$0xf0]  ;;  %v6246_v5 = vor.u32 %v8297_v61, %v6245_v60  ;;  %1740 = vmatpush.bf16.msrb.mxu0 %v5990_v0 }
  0x42   :  { %v5973_v2 = vld [vmem:[#allocation2 + $0x480] sm:$0xf]  ;;  %v126_v3 = vld [vmem:[%s9295_s0 + $0x10] sm:$0xff]  ;;  %v6374_v11 = vor.u32 %v8329_v63, %v6373_v62  ;;  %1753 = vmatpush.bf16.msrb.mxu1 %v6118_v1 }
  0x43   :  { %v124_v4 = vld [vmem:[%s9295_s0] sm:$0xff]  ;;  %v8229_v6 = vld [vmem:[#allocation2 + $0x48c] sm:$0xf0]  ;;  %v9001_v8 = vpack.c.bf16 %v126_v3, %v126_v3  ;;  %1766 = vmatpush.bf16.msrb.mxu2 %v6246_v5  ;;  %v5511_v5 = vld [vmem:[#allocation2 + $0xf0] sm:$0xf0] }
  0x44   :  { %v6101_v7 = vld [vmem:[#allocation2 + $0x580] sm:$0xf]  ;;  %v9003_v9 = vpack.c.bf16 %v124_v4, %v124_v4  ;;  %v8261_v12 = vld [vmem:[#allocation2 + $0x58c] sm:$0xf0]  ;;  %v5974_v18 = vor.u32 %v8229_v6, %v5973_v2  ;;  %1779 = vmatpush.bf16.msrb.mxu3 %v6374_v11  ;;  %v8111_v4 = vld [vmem:[#allocation2 + $0xe4] sm:$0xf] }
  0x45   :  { %v6229_v13 = vld [vmem:[#allocation2 + $0x680] sm:$0xf]  ;;  %v8293_v14 = vld [vmem:[#allocation2 + $0x68c] sm:$0xf0]  ;;  %1720 = vmatmul.bf16.vlgmr.msra.gmra.mxu2 %v9001_v8  ;;  %v6102_v20 = vor.u32 %v8261_v12, %v6101_v7  ;;  %v8143_v6 = vld [vmem:[#allocation2 + $0x1e4] sm:$0xf] }
  0x46   :  { %v6357_v16 = vld [vmem:[#allocation2 + $0x780] sm:$0xf]  ;;  %v8325_v17 = vld [vmem:[#allocation2 + $0x78c] sm:$0xf0]  ;;  %1694 = vmatmul.bf16.vlgmr.msra.gmra.mxu0 %v9003_v9  ;;  %v6230_v21 = vor.u32 %v8293_v14, %v6229_v13  ;;  %v8175_v11 = vld [vmem:[#allocation2 + $0x2e4] sm:$0xf] }
  0x47   :  { %v5957_v22 = vld [vmem:[#allocation2 + $0x460] sm:$0xf]  ;;  %v8225_v23 = vld [vmem:[#allocation2 + $0x46c] sm:$0xf0]  ;;  %v6358_v26 = vor.u32 %v8325_v17, %v6357_v16  ;;  %1741 = vmatpush.bf16.msrb.mxu0 %v5974_v18  ;;  %1754 = vmatpush.bf16.msrb.mxu1 %v6102_v20  ;;  %v5767_v12 = vld [vmem:[#allocation2 + $0x2f0] sm:$0xf0]  ;;  %v5514_v20 = vor.u32 %v8111_v4, %v5511_v5 }
  0x48   :  { %v6085_v24 = vld [vmem:[#allocation2 + $0x560] sm:$0xf]  ;;  %v8257_v27 = vld [vmem:[#allocation2 + $0x56c] sm:$0xf0]  ;;  %v5958_v32 = vor.u32 %v8225_v23, %v5957_v22  ;;  %1767 = vmatpush.bf16.msrb.mxu2 %v6230_v21  ;;  %v8207_v16 = vld [vmem:[#allocation2 + $0x3e4] sm:$0xf] }
  0x49   :  { %v6213_v28 = vld [vmem:[#allocation2 + $0x660] sm:$0xf]  ;;  %v8289_v29 = vld [vmem:[#allocation2 + $0x66c] sm:$0xf0]  ;;  %v6086_v33 = vor.u32 %v8257_v27, %v6085_v24  ;;  %1780 = vmatpush.bf16.msrb.mxu3 %v6358_v26  ;;  %v5895_v17 = vld [vmem:[#allocation2 + $0x3f0] sm:$0xf0]  ;;  %v5642_v24 = vor.u32 %v8143_v6, %v5639_v10  ;;  %v5770_v26 = vor.u32 %v8175_v11, %v5767_v12 }
  0x4a   :  { %v6341_v30 = vld [vmem:[#allocation2 + $0x760] sm:$0xf]  ;;  %v8321_v31 = vld [vmem:[#allocation2 + $0x76c] sm:$0xf0]  ;;  %v6214_v34 = vor.u32 %v8289_v29, %v6213_v28  ;;  %v8107_v21 = vld [vmem:[#allocation2 + $0xc4] sm:$0xf] }
  0x4b   :  { %v5941_v35 = vld [vmem:[#allocation2 + $0x440] sm:$0xf]  ;;  %v8221_v36 = vld [vmem:[#allocation2 + $0x44c] sm:$0xf0]  ;;  %v6342_v38 = vor.u32 %v8321_v31, %v6341_v30  ;;  %1742 = vmatpush.bf16.msrb.mxu0 %v5958_v32  ;;  %1755 = vmatpush.bf16.msrb.mxu1 %v6086_v33  ;;  %v131_v23 = vld [vmem:[%s9295_s0 + $0x38] sm:$0xff]  ;;  %v5898_v30 = vor.u32 %v8207_v16, %v5895_v17 }
  0x4c   :  { %v6069_v37 = vld [vmem:[#allocation2 + $0x540] sm:$0xf]  ;;  %v8253_v39 = vld [vmem:[#allocation2 + $0x54c] sm:$0xf0]  ;;  %v5942_v44 = vor.u32 %v8221_v36, %v5941_v35  ;;  %1768 = vmatpush.bf16.msrb.mxu2 %v6214_v34  ;;  %v5495_v27 = vld [vmem:[#allocation2 + $0xd0] sm:$0xf0] }
  0x4d   :  { %v6197_v40 = vld [vmem:[#allocation2 + $0x640] sm:$0xf]  ;;  %v8285_v41 = vld [vmem:[#allocation2 + $0x64c] sm:$0xf0]  ;;  %v6070_v45 = vor.u32 %v8253_v39, %v6069_v37  ;;  %1781 = vmatpush.bf16.msrb.mxu3 %v6342_v38  ;;  %v8139_v28 = vld [vmem:[#allocation2 + $0x1c4] sm:$0xf]  ;;  %v9035_v38 = vpack.c.bf16 %v131_v23, %v131_v23  ;;  %v5498_v39 = vor.u32 %v8107_v21, %v5495_v27 }
  0x4e   :  { %v6325_v42 = vld [vmem:[#allocation2 + $0x740] sm:$0xf]  ;;  %v8317_v43 = vld [vmem:[#allocation2 + $0x74c] sm:$0xf0]  ;;  %v6198_v46 = vor.u32 %v8285_v41, %v6197_v40  ;;  %v129_v29 = vld [vmem:[%s9295_s0 + $0x28] sm:$0xff] }
  0x4f   :  { %v5925_v47 = vld [vmem:[#allocation2 + $0x420] sm:$0xf]  ;;  %v8217_v48 = vld [vmem:[#allocation2 + $0x42c] sm:$0xf0]  ;;  %v6326_v50 = vor.u32 %v8317_v43, %v6325_v42  ;;  %1743 = vmatpush.bf16.msrb.mxu0 %v5942_v44  ;;  %1756 = vmatpush.bf16.msrb.mxu1 %v6070_v45  ;;  %v5623_v31 = vld [vmem:[#allocation2 + $0x1d0] sm:$0xf0]  ;;  %v9037_v40 = vpack.c.bf16 %v129_v29, %v129_v29 }
  0x50   :  { %v6053_v49 = vld [vmem:[#allocation2 + $0x520] sm:$0xf]  ;;  %v8249_v51 = vld [vmem:[#allocation2 + $0x52c] sm:$0xf0]  ;;  %v5926_v56 = vor.u32 %v8217_v48, %v5925_v47  ;;  %1769 = vmatpush.bf16.msrb.mxu2 %v6198_v46  ;;  %v8171_v32 = vld [vmem:[#allocation2 + $0x2c4] sm:$0xf]  ;;  %v5626_v41 = vor.u32 %v8139_v28, %v5623_v31 }
  0x51   :  { %v6181_v52 = vld [vmem:[#allocation2 + $0x620] sm:$0xf]  ;;  %v8281_v53 = vld [vmem:[#allocation2 + $0x62c] sm:$0xf0]  ;;  %v6054_v59 = vor.u32 %v8249_v51, %v6053_v49  ;;  %1782 = vmatpush.bf16.msrb.mxu3 %v6326_v50  ;;  %v5751_v33 = vld [vmem:[#allocation2 + $0x2d0] sm:$0xf0] }
  0x52   :  { %v6309_v54 = vld [vmem:[#allocation2 + $0x720] sm:$0xf]  ;;  %v8313_v55 = vld [vmem:[#allocation2 + $0x72c] sm:$0xf0]  ;;  %v6182_v60 = vor.u32 %v8281_v53, %v6181_v52  ;;  %v8203_v35 = vld [vmem:[#allocation2 + $0x3c4] sm:$0xf]  ;;  %v5754_v42 = vor.u32 %v8171_v32, %v5751_v33 }
  0x53   :  { %v5909_v57 = vld [vmem:[#allocation2 + $0x400] sm:$0xf]  ;;  %v8213_v58 = vld [vmem:[#allocation2 + $0x40c] sm:$0xf0]  ;;  %v6310_v0 = vor.u32 %v8313_v55, %v6309_v54  ;;  %1744 = vmatpush.bf16.msrb.mxu0 %v5926_v56  ;;  %1757 = vmatpush.bf16.msrb.mxu1 %v6054_v59  ;;  %v5879_v36 = vld [vmem:[#allocation2 + $0x3d0] sm:$0xf0] }
  0x54   :  { %v6037_v61 = vld [vmem:[#allocation2 + $0x500] sm:$0xf]  ;;  %v8245_v62 = vld [vmem:[#allocation2 + $0x50c] sm:$0xf0]  ;;  %v5910_v7 = vor.u32 %v8213_v58, %v5909_v57  ;;  %1770 = vmatpush.bf16.msrb.mxu2 %v6182_v60  ;;  %v8103_v43 = vld [vmem:[#allocation2 + $0xa4] sm:$0xf]  ;;  %v5882_v46 = vor.u32 %v8203_v35, %v5879_v36 }
  0x55   :  { %v6165_v63 = vld [vmem:[#allocation2 + $0x600] sm:$0xf]  ;;  %v8277_v1 = vld [vmem:[#allocation2 + $0x60c] sm:$0xf0]  ;;  %v6038_v13 = vor.u32 %v8245_v62, %v6037_v61  ;;  %1783 = vmatpush.bf16.msrb.mxu3 %v6310_v0  ;;  %v5479_v44 = vld [vmem:[#allocation2 + $0xb0] sm:$0xf0] }
  0x56   :  { %v6293_v2 = vld [vmem:[#allocation2 + $0x700] sm:$0xf]  ;;  %v8309_v3 = vld [vmem:[#allocation2 + $0x70c] sm:$0xf0]  ;;  %v6166_v14 = vor.u32 %v8277_v1, %v6165_v63  ;;  %v8135_v45 = vld [vmem:[#allocation2 + $0x1a4] sm:$0xf]  ;;  %v5482_v52 = vor.u32 %v8103_v43, %v5479_v44 }
  0x57   :  { %v130_v18 = vld [vmem:[%s9295_s0 + $0x30] sm:$0xff]  ;;  %v6294_v19 = vor.u32 %v8309_v3, %v6293_v2  ;;  %v128_v22 = vld [vmem:[%s9295_s0 + $0x20] sm:$0xff]  ;;  %1745 = vmatpush.bf16.msrb.mxu0 %v5910_v7  ;;  %1758 = vmatpush.bf16.msrb.mxu1 %v6038_v13 }
  0x58   :  { %v9031_v34 = vpack.c.bf16 %v130_v18, %v130_v18  ;;  %1771 = vmatpush.bf16.msrb.mxu2 %v6166_v14  ;;  %v9033_v37 = vpack.c.bf16 %v128_v22, %v128_v22  ;;  %v5607_v47 = vld [vmem:[#allocation2 + $0x1b0] sm:$0xf0]  ;;  %v8167_v48 = vld [vmem:[#allocation2 + $0x2a4] sm:$0xf] }
  0x59   :  { %1784 = vmatpush.bf16.msrb.mxu3 %v6294_v19  ;;  %v5735_v49 = vld [vmem:[#allocation2 + $0x2b0] sm:$0xf0]  ;;  %v8199_v50 = vld [vmem:[#allocation2 + $0x3a4] sm:$0xf]  ;;  %v5610_v53 = vor.u32 %v8135_v45, %v5607_v47 }
  0x5a   :  { %v5863_v51 = vld [vmem:[#allocation2 + $0x3b0] sm:$0xf0]  ;;  %1746 = vmatmul.bf16.vlgmr.msrb.gmra.mxu0 %v9033_v37  ;;  %1759 = vmatmul.bf16.vlgmr.msrb.gmra.mxu1 %v9037_v40  ;;  %v5738_v54 = vor.u32 %v8167_v48, %v5735_v49  ;;  %v8099_v55 = vld [vmem:[#allocation2 + $0x84] sm:$0xf] }
  0x5b   :  { %1790 = vmatpush.bf16.msra.mxu0 %v5514_v20  ;;  %1803 = vmatpush.bf16.msra.mxu1 %v5642_v24  ;;  %v5463_v56 = vld [vmem:[#allocation2 + $0x90] sm:$0xf0]  ;;  %v8131_v57 = vld [vmem:[#allocation2 + $0x184] sm:$0xf]  ;;  %v5866_v58 = vor.u32 %v8199_v50, %v5863_v51 }
  0x5c   :  { %1816 = vmatpush.bf16.msra.mxu2 %v5770_v26  ;;  %1785 = vmatmul.bf16.vlgmr.msrb.gmra.mxu3 %v9035_v38  ;;  %v5591_v59 = vld [vmem:[#allocation2 + $0x190] sm:$0xf0]  ;;  %v8163_v60 = vld [vmem:[#allocation2 + $0x284] sm:$0xf]  ;;  %v5466_v0 = vor.u32 %v8099_v55, %v5463_v56 }
  0x5d   :  { %1829 = vmatpush.bf16.msra.mxu3 %v5898_v30  ;;  %1772 = vmatmul.bf16.vlgmr.msrb.gmra.mxu2 %v9031_v34  ;;  %v5719_v61 = vld [vmem:[#allocation2 + $0x290] sm:$0xf0]  ;;  %v8195_v62 = vld [vmem:[#allocation2 + $0x384] sm:$0xf]  ;;  %v5594_v1 = vor.u32 %v8131_v57, %v5591_v59 }
  0x5e   :  { %v5847_v63 = vld [vmem:[#allocation2 + $0x390] sm:$0xf0]  ;;  %v5722_v2 = vor.u32 %v8163_v60, %v5719_v61  ;;  %v8095_v3 = vld [vmem:[#allocation2 + $0x64] sm:$0xf] }
  0x5f   :  { %1791 = vmatpush.bf16.msra.mxu0 %v5498_v39  ;;  %1804 = vmatpush.bf16.msra.mxu1 %v5626_v41  ;;  %v5447_v4 = vld [vmem:[#allocation2 + $0x70] sm:$0xf0]  ;;  %v8127_v5 = vld [vmem:[#allocation2 + $0x164] sm:$0xf]  ;;  %v5850_v6 = vor.u32 %v8195_v62, %v5847_v63 }
  0x60   :  { %1817 = vmatpush.bf16.msra.mxu2 %v5754_v42  ;;  %v5575_v7 = vld [vmem:[#allocation2 + $0x170] sm:$0xf0]  ;;  %v8159_v10 = vld [vmem:[#allocation2 + $0x264] sm:$0xf]  ;;  %v5450_v14 = vor.u32 %v8095_v3, %v5447_v4 }
  0x61   :  { %1830 = vmatpush.bf16.msra.mxu3 %v5882_v46  ;;  %v5703_v11 = vld [vmem:[#allocation2 + $0x270] sm:$0xf0]  ;;  %v8191_v12 = vld [vmem:[#allocation2 + $0x364] sm:$0xf]  ;;  %v5578_v16 = vor.u32 %v8127_v5, %v5575_v7 }
  0x62   :  { %v5831_v13 = vld [vmem:[#allocation2 + $0x370] sm:$0xf0]  ;;  %v5706_v17 = vor.u32 %v8159_v10, %v5703_v11  ;;  %v8091_v18 = vld [vmem:[#allocation2 + $0x44] sm:$0xf] }
  0x63   :  { %1792 = vmatpush.bf16.msra.mxu0 %v5482_v52  ;;  %1805 = vmatpush.bf16.msra.mxu1 %v5610_v53  ;;  %v5431_v19 = vld [vmem:[#allocation2 + $0x50] sm:$0xf0]  ;;  %v8123_v20 = vld [vmem:[#allocation2 + $0x144] sm:$0xf]  ;;  %v5834_v21 = vor.u32 %v8191_v12, %v5831_v13 }
  0x64   :  { %1818 = vmatpush.bf16.msra.mxu2 %v5738_v54  ;;  %v5559_v22 = vld [vmem:[#allocation2 + $0x150] sm:$0xf0]  ;;  %v8155_v23 = vld [vmem:[#allocation2 + $0x244] sm:$0xf]  ;;  %v5434_v28 = vor.u32 %v8091_v18, %v5431_v19 }
  0x65   :  { %1831 = vmatpush.bf16.msra.mxu3 %v5866_v58  ;;  %v5687_v24 = vld [vmem:[#allocation2 + $0x250] sm:$0xf0]  ;;  %v8187_v26 = vld [vmem:[#allocation2 + $0x344] sm:$0xf]  ;;  %v5562_v29 = vor.u32 %v8123_v20, %v5559_v22 }
  0x66   :  { %v5815_v27 = vld [vmem:[#allocation2 + $0x350] sm:$0xf0]  ;;  %v5690_v30 = vor.u32 %v8155_v23, %v5687_v24  ;;  %v8087_v31 = vld [vmem:[#allocation2 + $0x24] sm:$0xf] }
  0x67   :  { %1793 = vmatpush.bf16.msra.mxu0 %v5466_v0  ;;  %1806 = vmatpush.bf16.msra.mxu1 %v5594_v1  ;;  %v5415_v32 = vld [vmem:[#allocation2 + $0x30] sm:$0xf0]  ;;  %v8119_v33 = vld [vmem:[#allocation2 + $0x124] sm:$0xf]  ;;  %v5818_v35 = vor.u32 %v8187_v26, %v5815_v27 }
  0x68   :  { %1819 = vmatpush.bf16.msra.mxu2 %v5722_v2  ;;  %v5543_v36 = vld [vmem:[#allocation2 + $0x130] sm:$0xf0]  ;;  %v8151_v39 = vld [vmem:[#allocation2 + $0x224] sm:$0xf]  ;;  %v5418_v44 = vor.u32 %v8087_v31, %v5415_v32 }
  0x69   :  { %1832 = vmatpush.bf16.msra.mxu3 %v5850_v6  ;;  %v5671_v41 = vld [vmem:[#allocation2 + $0x230] sm:$0xf0]  ;;  %v8183_v42 = vld [vmem:[#allocation2 + $0x324] sm:$0xf]  ;;  %v5546_v47 = vor.u32 %v8119_v33, %v5543_v36 }
  0x6a   :  { %v5799_v43 = vld [vmem:[#allocation2 + $0x330] sm:$0xf0]  ;;  %v8083_v45 = vld [vmem:[#allocation2 + $0x4] sm:$0xf]  ;;  %v5674_v48 = vor.u32 %v8151_v39, %v5671_v41 }
  0x6b   :  { %1794 = vmatpush.bf16.msra.mxu0 %v5450_v14  ;;  %1807 = vmatpush.bf16.msra.mxu1 %v5578_v16  ;;  %v5399_v46 = vld [vmem:[#allocation2 + $0x10] sm:$0xf0]  ;;  %v8115_v49 = vld [vmem:[#allocation2 + $0x104] sm:$0xf]  ;;  %v5802_v52 = vor.u32 %v8183_v42, %v5799_v43 }
  0x6c   :  { %1820 = vmatpush.bf16.msra.mxu2 %v5706_v17  ;;  %v5527_v50 = vld [vmem:[#allocation2 + $0x110] sm:$0xf0]  ;;  %v8147_v51 = vld [vmem:[#allocation2 + $0x204] sm:$0xf]  ;;  %v5402_v59 = vor.u32 %v8083_v45, %v5399_v46 }
  0x6d   :  { %1833 = vmatpush.bf16.msra.mxu3 %v5834_v21  ;;  %v5655_v53 = vld [vmem:[#allocation2 + $0x210] sm:$0xf0]  ;;  %v8179_v54 = vld [vmem:[#allocation2 + $0x304] sm:$0xf]  ;;  %v5530_v63 = vor.u32 %v8115_v49, %v5527_v50 }
  0x6e   :  { %v5783_v55 = vld [vmem:[#allocation2 + $0x310] sm:$0xf0]  ;;  %v8239_v56 = vld [vmem:[#allocation2 + $0x4e4] sm:$0xf]  ;;  %v5658_v0 = vor.u32 %v8147_v51, %v5655_v53 }
  0x6f   :  { %1795 = vmatpush.bf16.msra.mxu0 %v5434_v28  ;;  %1808 = vmatpush.bf16.msra.mxu1 %v5562_v29  ;;  %v6023_v57 = vld [vmem:[#allocation2 + $0x4f0] sm:$0xf0]  ;;  %v8271_v58 = vld [vmem:[#allocation2 + $0x5e4] sm:$0xf]  ;;  %v5786_v3 = vor.u32 %v8179_v54, %v5783_v55 }
  0x70   :  { %1821 = vmatpush.bf16.msra.mxu2 %v5690_v30  ;;  %v6151_v60 = vld [vmem:[#allocation2 + $0x5f0] sm:$0xf0]  ;;  %v8303_v61 = vld [vmem:[#allocation2 + $0x6e4] sm:$0xf]  ;;  %v6026_v4 = vor.u32 %v8239_v56, %v6023_v57 }
  0x71   :  { %1834 = vmatpush.bf16.msra.mxu3 %v5818_v35  ;;  %v6279_v62 = vld [vmem:[#allocation2 + $0x6f0] sm:$0xf0]  ;;  %v8335_v1 = vld [vmem:[#allocation2 + $0x7e4] sm:$0xf]  ;;  %v6154_v5 = vor.u32 %v8271_v58, %v6151_v60 }
  0x72   :  { %v6407_v2 = vld [vmem:[#allocation2 + $0x7f0] sm:$0xf0]  ;;  %v6282_v6 = vor.u32 %v8303_v61, %v6279_v62  ;;  %v8235_v7 = vld [vmem:[#allocation2 + $0x4c4] sm:$0xf] }
  0x73   :  { %1796 = vmatpush.bf16.msra.mxu0 %v5418_v44  ;;  %1809 = vmatpush.bf16.msra.mxu1 %v5546_v47  ;;  %v6007_v10 = vld [vmem:[#allocation2 + $0x4d0] sm:$0xf0]  ;;  %v8267_v11 = vld [vmem:[#allocation2 + $0x5c4] sm:$0xf]  ;;  %v6410_v12 = vor.u32 %v8335_v1, %v6407_v2 }
  0x74   :  { %1822 = vmatpush.bf16.msra.mxu2 %v5674_v48  ;;  %v6135_v13 = vld [vmem:[#allocation2 + $0x5d0] sm:$0xf0]  ;;  %v8299_v14 = vld [vmem:[#allocation2 + $0x6c4] sm:$0xf]  ;;  %v6010_v19 = vor.u32 %v8235_v7, %v6007_v10 }
  0x75   :  { %1835 = vmatpush.bf16.msra.mxu3 %v5802_v52  ;;  %v6263_v16 = vld [vmem:[#allocation2 + $0x6d0] sm:$0xf0]  ;;  %v8331_v17 = vld [vmem:[#allocation2 + $0x7c4] sm:$0xf]  ;;  %v6138_v20 = vor.u32 %v8267_v11, %v6135_v13 }
  0x76   :  { %v6391_v18 = vld [vmem:[#allocation2 + $0x7d0] sm:$0xf0]  ;;  %v6266_v21 = vor.u32 %v8299_v14, %v6263_v16  ;;  %v8231_v22 = vld [vmem:[#allocation2 + $0x4a4] sm:$0xf] }
  0x77   :  { %1797 = vmatpush.bf16.msra.mxu0 %v5402_v59  ;;  %1810 = vmatpush.bf16.msra.mxu1 %v5530_v63  ;;  %v5991_v23 = vld [vmem:[#allocation2 + $0x4b0] sm:$0xf0]  ;;  %v8263_v24 = vld [vmem:[#allocation2 + $0x5a4] sm:$0xf]  ;;  %v6394_v26 = vor.u32 %v8331_v17, %v6391_v18 }
  0x78   :  { %1823 = vmatpush.bf16.msra.mxu2 %v5658_v0  ;;  %v6119_v27 = vld [vmem:[#allocation2 + $0x5b0] sm:$0xf0]  ;;  %v8295_v28 = vld [vmem:[#allocation2 + $0x6a4] sm:$0xf]  ;;  %v5994_v32 = vor.u32 %v8231_v22, %v5991_v23 }
  0x79   :  { %1836 = vmatpush.bf16.msra.mxu3 %v5786_v3  ;;  %v6247_v29 = vld [vmem:[#allocation2 + $0x6b0] sm:$0xf0]  ;;  %v8327_v30 = vld [vmem:[#allocation2 + $0x7a4] sm:$0xf]  ;;  %v6122_v33 = vor.u32 %v8263_v24, %v6119_v27 }
  0x7a   :  { %v6375_v31 = vld [vmem:[#allocation2 + $0x7b0] sm:$0xf0]  ;;  %1798 = vmatmul.bf16.vlgmr.msra.gmra.mxu0 %v9003_v9  ;;  %1811 = vmatmul.bf16.vlgmr.msra.gmra.mxu1 %v9016_v25  ;;  %v6250_v35 = vor.u32 %v8295_v28, %v6247_v29  ;;  %v8227_v36 = vld [vmem:[#allocation2 + $0x484] sm:$0xf] }
  0x7b   :  { %1842 = vmatpush.bf16.msrb.mxu0 %v6026_v4  ;;  %1855 = vmatpush.bf16.msrb.mxu1 %v6154_v5  ;;  %v5975_v39 = vld [vmem:[#allocation2 + $0x490] sm:$0xf0]  ;;  %v8259_v41 = vld [vmem:[#allocation2 + $0x584] sm:$0xf]  ;;  %v6378_v42 = vor.u32 %v8327_v30, %v6375_v31 }
  0x7c   :  { %1868 = vmatpush.bf16.msrb.mxu2 %v6282_v6  ;;  %1837 = vmatmul.bf16.vlgmr.msra.gmra.mxu3 %v9008_v15  ;;  %v6103_v43 = vld [vmem:[#allocation2 + $0x590] sm:$0xf0]  ;;  %v8291_v44 = vld [vmem:[#allocation2 + $0x684] sm:$0xf]  ;;  %v5978_v48 = vor.u32 %v8227_v36, %v5975_v39  ;;  %v5517_v39 = vld [vmem:[#allocation2 + $0xe8] sm:$0xf] }
  0x7d   :  { %1881 = vmatpush.bf16.msrb.mxu3 %v6410_v12  ;;  %1824 = vmatmul.bf16.vlgmr.msra.gmra.mxu2 %v9001_v8  ;;  %v6231_v45 = vld [vmem:[#allocation2 + $0x690] sm:$0xf0]  ;;  %v8323_v46 = vld [vmem:[#allocation2 + $0x784] sm:$0xf]  ;;  %v6106_v49 = vor.u32 %v8259_v41, %v6103_v43  ;;  %v8114_v41 = vld [vmem:[#allocation2 + $0xf4] sm:$0xf0] }
  0x7e   :  { %v6359_v47 = vld [vmem:[#allocation2 + $0x790] sm:$0xf0]  ;;  %v6234_v50 = vor.u32 %v8291_v44, %v6231_v45  ;;  %v8223_v51 = vld [vmem:[#allocation2 + $0x464] sm:$0xf]  ;;  %v8146_v44 = vld [vmem:[#allocation2 + $0x1f4] sm:$0xf0] }
  0x7f   :  { %1843 = vmatpush.bf16.msrb.mxu0 %v6010_v19  ;;  %1856 = vmatpush.bf16.msrb.mxu1 %v6138_v20  ;;  %v5959_v52 = vld [vmem:[#allocation2 + $0x470] sm:$0xf0]  ;;  %v8255_v53 = vld [vmem:[#allocation2 + $0x564] sm:$0xf]  ;;  %v6362_v54 = vor.u32 %v8323_v46, %v6359_v47  ;;  %v5773_v45 = vld [vmem:[#allocation2 + $0x2e8] sm:$0xf] }
  0x80   :  { %1869 = vmatpush.bf16.msrb.mxu2 %v6266_v21  ;;  %v6087_v55 = vld [vmem:[#allocation2 + $0x570] sm:$0xf0]  ;;  %v8287_v56 = vld [vmem:[#allocation2 + $0x664] sm:$0xf]  ;;  %v5962_v60 = vor.u32 %v8223_v51, %v5959_v52  ;;  %v8178_v46 = vld [vmem:[#allocation2 + $0x2f4] sm:$0xf0]  ;;  %v5518_v52 = vor.u32 %v8114_v41, %v5517_v39 }
  0x81   :  { %1882 = vmatpush.bf16.msrb.mxu3 %v6394_v26  ;;  %v6215_v57 = vld [vmem:[#allocation2 + $0x670] sm:$0xf0]  ;;  %v8319_v58 = vld [vmem:[#allocation2 + $0x764] sm:$0xf]  ;;  %v6090_v61 = vor.u32 %v8255_v53, %v6087_v55  ;;  %v5501_v55 = vld [vmem:[#allocation2 + $0xc8] sm:$0xf] }
  0x82   :  { %v6343_v59 = vld [vmem:[#allocation2 + $0x770] sm:$0xf0]  ;;  %v6218_v62 = vor.u32 %v8287_v56, %v6215_v57  ;;  %v8219_v63 = vld [vmem:[#allocation2 + $0x444] sm:$0xf]  ;;  %v8110_v56 = vld [vmem:[#allocation2 + $0xd4] sm:$0xf0] }
  0x83   :  { %1844 = vmatpush.bf16.msrb.mxu0 %v5994_v32  ;;  %1857 = vmatpush.bf16.msrb.mxu1 %v6122_v33  ;;  %v5943_v0 = vld [vmem:[#allocation2 + $0x450] sm:$0xf0]  ;;  %v8251_v1 = vld [vmem:[#allocation2 + $0x544] sm:$0xf]  ;;  %v6346_v2 = vor.u32 %v8319_v58, %v6343_v59  ;;  %v5629_v57 = vld [vmem:[#allocation2 + $0x1c8] sm:$0xf] }
  0x84   :  { %1870 = vmatpush.bf16.msrb.mxu2 %v6250_v35  ;;  %v6071_v3 = vld [vmem:[#allocation2 + $0x550] sm:$0xf0]  ;;  %v8283_v4 = vld [vmem:[#allocation2 + $0x644] sm:$0xf]  ;;  %v5946_v10 = vor.u32 %v8219_v63, %v5943_v0  ;;  %v8142_v59 = vld [vmem:[#allocation2 + $0x1d4] sm:$0xf0]  ;;  %v5502_v0 = vor.u32 %v8110_v56, %v5501_v55 }
  0x85   :  { %1883 = vmatpush.bf16.msrb.mxu3 %v6378_v42  ;;  %v6199_v5 = vld [vmem:[#allocation2 + $0x650] sm:$0xf0]  ;;  %v8315_v6 = vld [vmem:[#allocation2 + $0x744] sm:$0xf]  ;;  %v6074_v11 = vor.u32 %v8251_v1, %v6071_v3  ;;  %v5645_v42 = vld [vmem:[#allocation2 + $0x1e8] sm:$0xf]  ;;  %v5630_v1 = vor.u32 %v8142_v59, %v5629_v57 }
  0x86   :  { %v6327_v7 = vld [vmem:[#allocation2 + $0x750] sm:$0xf0]  ;;  %v6202_v12 = vor.u32 %v8283_v4, %v6199_v5  ;;  %v8215_v13 = vld [vmem:[#allocation2 + $0x424] sm:$0xf]  ;;  %v5646_v53 = vor.u32 %v8146_v44, %v5645_v42  ;;  %v8206_v63 = vld [vmem:[#allocation2 + $0x3d4] sm:$0xf0] }
  0x87   :  { %1845 = vmatpush.bf16.msrb.mxu0 %v5978_v48  ;;  %1858 = vmatpush.bf16.msrb.mxu1 %v6106_v49  ;;  %v5927_v14 = vld [vmem:[#allocation2 + $0x430] sm:$0xf0]  ;;  %v8247_v16 = vld [vmem:[#allocation2 + $0x524] sm:$0xf]  ;;  %v6330_v17 = vor.u32 %v8315_v6, %v6327_v7  ;;  %v5901_v49 = vld [vmem:[#allocation2 + $0x3e8] sm:$0xf] }
  0x88   :  { %1871 = vmatpush.bf16.msrb.mxu2 %v6234_v50  ;;  %v6055_v18 = vld [vmem:[#allocation2 + $0x530] sm:$0xf0]  ;;  %v8279_v19 = vld [vmem:[#allocation2 + $0x624] sm:$0xf]  ;;  %v5930_v23 = vor.u32 %v8215_v13, %v5927_v14  ;;  %v8210_v50 = vld [vmem:[#allocation2 + $0x3f4] sm:$0xf0] }
  0x89   :  { %1884 = vmatpush.bf16.msrb.mxu3 %v6362_v54  ;;  %v6183_v20 = vld [vmem:[#allocation2 + $0x630] sm:$0xf0]  ;;  %v8311_v21 = vld [vmem:[#allocation2 + $0x724] sm:$0xf]  ;;  %v6058_v27 = vor.u32 %v8247_v16, %v6055_v18  ;;  %v5774_v54 = vor.u32 %v8178_v46, %v5773_v45  ;;  %v5902_v58 = vor.u32 %v8210_v50, %v5901_v49  ;;  %v5485_v3 = vld [vmem:[#allocation2 + $0xa8] sm:$0xf] }
  0x8a   :  { %v6311_v22 = vld [vmem:[#allocation2 + $0x730] sm:$0xf0]  ;;  %v8211_v24 = vld [vmem:[#allocation2 + $0x404] sm:$0xf]  ;;  %v6186_v28 = vor.u32 %v8279_v19, %v6183_v20  ;;  %v8106_v4 = vld [vmem:[#allocation2 + $0xb4] sm:$0xf0] }
  0x8b   :  { %1846 = vmatpush.bf16.msrb.mxu0 %v5962_v60  ;;  %1859 = vmatpush.bf16.msrb.mxu1 %v6090_v61  ;;  %v5911_v26 = vld [vmem:[#allocation2 + $0x410] sm:$0xf0]  ;;  %v8243_v29 = vld [vmem:[#allocation2 + $0x504] sm:$0xf]  ;;  %v6314_v32 = vor.u32 %v8311_v21, %v6311_v22  ;;  %v5757_v60 = vld [vmem:[#allocation2 + $0x2c8] sm:$0xf]  ;;  %v5486_v14 = vor.u32 %v8106_v4, %v5485_v3 }
  0x8c   :  { %1872 = vmatpush.bf16.msrb.mxu2 %v6218_v62  ;;  %v6039_v30 = vld [vmem:[#allocation2 + $0x510] sm:$0xf0]  ;;  %v8275_v31 = vld [vmem:[#allocation2 + $0x604] sm:$0xf]  ;;  %v5914_v43 = vor.u32 %v8211_v24, %v5911_v26  ;;  %v8174_v61 = vld [vmem:[#allocation2 + $0x2d4] sm:$0xf0] }
  0x8d   :  { %1885 = vmatpush.bf16.msrb.mxu3 %v6346_v2  ;;  %v6167_v33 = vld [vmem:[#allocation2 + $0x610] sm:$0xf0]  ;;  %v8307_v35 = vld [vmem:[#allocation2 + $0x704] sm:$0xf]  ;;  %v6042_v47 = vor.u32 %v8243_v29, %v6039_v30  ;;  %v5885_v62 = vld [vmem:[#allocation2 + $0x3c8] sm:$0xf]  ;;  %v5758_v2 = vor.u32 %v8174_v61, %v5757_v60 }
  0x8e   :  { %v6295_v36 = vld [vmem:[#allocation2 + $0x710] sm:$0xf0]  ;;  %v6170_v48 = vor.u32 %v8275_v31, %v6167_v33  ;;  %v5613_v5 = vld [vmem:[#allocation2 + $0x1a8] sm:$0xf]  ;;  %v5886_v6 = vor.u32 %v8206_v63, %v5885_v62  ;;  %v8138_v7 = vld [vmem:[#allocation2 + $0x1b4] sm:$0xf0] }
  0x8f   :  { %1847 = vmatpush.bf16.msrb.mxu0 %v5946_v10  ;;  %1860 = vmatpush.bf16.msrb.mxu1 %v6074_v11  ;;  %v6298_v51 = vor.u32 %v8307_v35, %v6295_v36  ;;  %v5741_v10 = vld [vmem:[#allocation2 + $0x2a8] sm:$0xf]  ;;  %v8170_v11 = vld [vmem:[#allocation2 + $0x2b4] sm:$0xf0]  ;;  %v5614_v16 = vor.u32 %v8138_v7, %v5613_v5 }
  0x90   :  { %1873 = vmatpush.bf16.msrb.mxu2 %v6202_v12  ;;  %v5869_v12 = vld [vmem:[#allocation2 + $0x3a8] sm:$0xf]  ;;  %v8202_v13 = vld [vmem:[#allocation2 + $0x3b4] sm:$0xf0] }
  0x91   :  { %1886 = vmatpush.bf16.msrb.mxu3 %v6330_v17  ;;  %v5742_v17 = vor.u32 %v8170_v11, %v5741_v10  ;;  %v5469_v18 = vld [vmem:[#allocation2 + $0x88] sm:$0xf]  ;;  %v8102_v19 = vld [vmem:[#allocation2 + $0x94] sm:$0xf0]  ;;  %v5870_v21 = vor.u32 %v8202_v13, %v5869_v12 }
  0x92   :  { %v5597_v20 = vld [vmem:[#allocation2 + $0x188] sm:$0xf]  ;;  %v8134_v22 = vld [vmem:[#allocation2 + $0x194] sm:$0xf0] }
  0x93   :  { %1848 = vmatpush.bf16.msrb.mxu0 %v5930_v23  ;;  %1861 = vmatpush.bf16.msrb.mxu1 %v6058_v27  ;;  %v5725_v23 = vld [vmem:[#allocation2 + $0x288] sm:$0xf]  ;;  %v8166_v24 = vld [vmem:[#allocation2 + $0x294] sm:$0xf0]  ;;  %v5598_v29 = vor.u32 %v8134_v22, %v5597_v20 }
  0x94   :  { %1874 = vmatpush.bf16.msrb.mxu2 %v6186_v28  ;;  %v5853_v26 = vld [vmem:[#allocation2 + $0x388] sm:$0xf]  ;;  %v8198_v27 = vld [vmem:[#allocation2 + $0x394] sm:$0xf0]  ;;  %v5470_v28 = vor.u32 %v8102_v19, %v5469_v18  ;;  %v5726_v30 = vor.u32 %v8166_v24, %v5725_v23 }
  0x95   :  { %1887 = vmatpush.bf16.msrb.mxu3 %v6314_v32  ;;  %v5453_v31 = vld [vmem:[#allocation2 + $0x68] sm:$0xf]  ;;  %v8098_v32 = vld [vmem:[#allocation2 + $0x74] sm:$0xf0]  ;;  %v5854_v35 = vor.u32 %v8198_v27, %v5853_v26 }
  0x96   :  { %v5581_v33 = vld [vmem:[#allocation2 + $0x168] sm:$0xf]  ;;  %v8130_v36 = vld [vmem:[#allocation2 + $0x174] sm:$0xf0]  ;;  %v5454_v44 = vor.u32 %v8098_v32, %v5453_v31 }
  0x97   :  { %1849 = vmatpush.bf16.msrb.mxu0 %v5914_v43  ;;  %1862 = vmatpush.bf16.msrb.mxu1 %v6042_v47  ;;  %v5709_v39 = vld [vmem:[#allocation2 + $0x268] sm:$0xf]  ;;  %v8162_v41 = vld [vmem:[#allocation2 + $0x274] sm:$0xf0]  ;;  %v5582_v45 = vor.u32 %v8130_v36, %v5581_v33 }
  0x98   :  { %1875 = vmatpush.bf16.msrb.mxu2 %v6170_v48  ;;  %v5837_v42 = vld [vmem:[#allocation2 + $0x368] sm:$0xf]  ;;  %v8194_v43 = vld [vmem:[#allocation2 + $0x374] sm:$0xf0]  ;;  %v5710_v46 = vor.u32 %v8162_v41, %v5709_v39 }
  0x99   :  { %1888 = vmatpush.bf16.msrb.mxu3 %v6298_v51  ;;  %v5437_v47 = vld [vmem:[#allocation2 + $0x48] sm:$0xf]  ;;  %v8094_v48 = vld [vmem:[#allocation2 + $0x54] sm:$0xf0]  ;;  %v5838_v50 = vor.u32 %v8194_v43, %v5837_v42 }
  0x9a   :  { %1850 = vmatmul.bf16.vlgmr.msrb.gmra.mxu0 %v9033_v37  ;;  %1863 = vmatmul.bf16.vlgmr.msrb.gmra.mxu1 %v9037_v40  ;;  %v5565_v49 = vld [vmem:[#allocation2 + $0x148] sm:$0xf]  ;;  %v8126_v51 = vld [vmem:[#allocation2 + $0x154] sm:$0xf0]  ;;  %v5438_v56 = vor.u32 %v8094_v48, %v5437_v47 }
  0x9b   :  { %1894 = vmatpush.bf16.msra.mxu0 %v5518_v52  ;;  %1907 = vmatpush.bf16.msra.mxu1 %v5646_v53  ;;  %v5693_v52 = vld [vmem:[#allocation2 + $0x248] sm:$0xf]  ;;  %v8158_v53 = vld [vmem:[#allocation2 + $0x254] sm:$0xf0]  ;;  %v5566_v57 = vor.u32 %v8126_v51, %v5565_v49 }
  0x9c   :  { %1920 = vmatpush.bf16.msra.mxu2 %v5774_v54  ;;  %1889 = vmatmul.bf16.vlgmr.msrb.gmra.mxu3 %v9035_v38  ;;  %v5821_v54 = vld [vmem:[#allocation2 + $0x348] sm:$0xf]  ;;  %v8190_v55 = vld [vmem:[#allocation2 + $0x354] sm:$0xf0] }
  0x9d   :  { %1933 = vmatpush.bf16.msra.mxu3 %v5902_v58  ;;  %1876 = vmatmul.bf16.vlgmr.msrb.gmra.mxu2 %v9031_v34  ;;  %v5694_v58 = vor.u32 %v8158_v53, %v5693_v52  ;;  %v5421_v59 = vld [vmem:[#allocation2 + $0x28] sm:$0xf]  ;;  %v8090_v60 = vld [vmem:[#allocation2 + $0x34] sm:$0xf0]  ;;  %v5822_v62 = vor.u32 %v8190_v55, %v5821_v54 }
  0x9e   :  { %v5549_v61 = vld [vmem:[#allocation2 + $0x128] sm:$0xf]  ;;  %v8122_v63 = vld [vmem:[#allocation2 + $0x134] sm:$0xf0]  ;;  %v5422_v4 = vor.u32 %v8090_v60, %v5421_v59 }
  0x9f   :  { %1895 = vmatpush.bf16.msra.mxu0 %v5502_v0  ;;  %1908 = vmatpush.bf16.msra.mxu1 %v5630_v1  ;;  %v5677_v0 = vld [vmem:[#allocation2 + $0x228] sm:$0xf]  ;;  %v8154_v1 = vld [vmem:[#allocation2 + $0x234] sm:$0xf0]  ;;  %v5550_v7 = vor.u32 %v8122_v63, %v5549_v61 }
  0xa0   :  { %1921 = vmatpush.bf16.msra.mxu2 %v5758_v2  ;;  %v5805_v2 = vld [vmem:[#allocation2 + $0x328] sm:$0xf]  ;;  %v8186_v3 = vld [vmem:[#allocation2 + $0x334] sm:$0xf0]  ;;  %v5678_v10 = vor.u32 %v8154_v1, %v5677_v0 }
  0xa1   :  { %1934 = vmatpush.bf16.msra.mxu3 %v5886_v6  ;;  %v5405_v5 = vld [vmem:[#allocation2 + $0x8] sm:$0xf]  ;;  %v8086_v6 = vld [vmem:[#allocation2 + $0x14] sm:$0xf0] }
  0xa2   :  { %v5533_v11 = vld [vmem:[#allocation2 + $0x108] sm:$0xf]  ;;  %v8118_v12 = vld [vmem:[#allocation2 + $0x114] sm:$0xf0]  ;;  %v5406_v22 = vor.u32 %v8086_v6, %v5405_v5  ;;  %v9058_v6 = vld [vmem:[%s9297_s2] sm:$0xf] }
  0xa3   :  { %1896 = vmatpush.bf16.msra.mxu0 %v5486_v14  ;;  %1909 = vmatpush.bf16.msra.mxu1 %v5614_v16  ;;  %v5661_v13 = vld [vmem:[#allocation2 + $0x208] sm:$0xf]  ;;  %v5806_v14 = vor.u32 %v8186_v3, %v5805_v2  ;;  %v8150_v16 = vld [vmem:[#allocation2 + $0x214] sm:$0xf0]  ;;  %v5534_v27 = vor.u32 %v8118_v12, %v5533_v11 }
  0xa4   :  { %1922 = vmatpush.bf16.msra.mxu2 %v5742_v17  ;;  %v5789_v17 = vld [vmem:[#allocation2 + $0x308] sm:$0xf]  ;;  %v8182_v18 = vld [vmem:[#allocation2 + $0x314] sm:$0xf0] }
  0xa5   :  { %1935 = vmatpush.bf16.msra.mxu3 %v5870_v21  ;;  %v6029_v19 = vld [vmem:[#allocation2 + $0x4e8] sm:$0xf]  ;;  %v8242_v20 = vld [vmem:[#allocation2 + $0x4f4] sm:$0xf0]  ;;  %v5790_v31 = vor.u32 %v8182_v18, %v5789_v17  ;;  %v398_v18 = vperm.slane %v9058_v6, 0 }
  0xa6   :  { %v6157_v21 = vld [vmem:[#allocation2 + $0x5e8] sm:$0xf]  ;;  %v8274_v23 = vld [vmem:[#allocation2 + $0x5f4] sm:$0xf0]  ;;  %v6030_v32 = vor.u32 %v8242_v20, %v6029_v19 }
  0xa7   :  { %1897 = vmatpush.bf16.msra.mxu0 %v5470_v28  ;;  %1910 = vmatpush.bf16.msra.mxu1 %v5598_v29  ;;  %v6285_v24 = vld [vmem:[#allocation2 + $0x6e8] sm:$0xf]  ;;  %v8306_v26 = vld [vmem:[#allocation2 + $0x6f4] sm:$0xf0]  ;;  %v5662_v28 = vor.u32 %v8150_v16, %v5661_v13  ;;  %v6158_v33 = vor.u32 %v8274_v23, %v6157_v21 }
  0xa8   :  { %1923 = vmatpush.bf16.msra.mxu2 %v5726_v30  ;;  %v6413_v29 = vld [vmem:[#allocation2 + $0x7e8] sm:$0xf]  ;;  %v8338_v30 = vld [vmem:[#allocation2 + $0x7f4] sm:$0xf0] }
  0xa9   :  { %1936 = vmatpush.bf16.msra.mxu3 %v5854_v35  ;;  %v6286_v35 = vor.u32 %v8306_v26, %v6285_v24  ;;  %v6013_v36 = vld [vmem:[#allocation2 + $0x4c8] sm:$0xf]  ;;  %v8238_v39 = vld [vmem:[#allocation2 + $0x4d4] sm:$0xf0]  ;;  %v6414_v42 = vor.u32 %v8338_v30, %v6413_v29 }
  0xaa   :  { %v6141_v41 = vld [vmem:[#allocation2 + $0x5c8] sm:$0xf]  ;;  %v8270_v43 = vld [vmem:[#allocation2 + $0x5d4] sm:$0xf0]  ;;  %v6014_v48 = vor.u32 %v8238_v39, %v6013_v36 }
  0xab   :  { %1898 = vmatpush.bf16.msra.mxu0 %v5454_v44  ;;  %1911 = vmatpush.bf16.msra.mxu1 %v5582_v45  ;;  %v6269_v44 = vld [vmem:[#allocation2 + $0x6c8] sm:$0xf]  ;;  %v8302_v45 = vld [vmem:[#allocation2 + $0x6d4] sm:$0xf0]  ;;  %v6142_v49 = vor.u32 %v8270_v43, %v6141_v41 }
  0xac   :  { %1924 = vmatpush.bf16.msra.mxu2 %v5710_v46  ;;  %v6397_v46 = vld [vmem:[#allocation2 + $0x7c8] sm:$0xf]  ;;  %v8334_v47 = vld [vmem:[#allocation2 + $0x7d4] sm:$0xf0] }
  0xad   :  { %1937 = vmatpush.bf16.msra.mxu3 %v5838_v50  ;;  %v6270_v50 = vor.u32 %v8302_v45, %v6269_v44  ;;  %v5997_v51 = vld [vmem:[#allocation2 + $0x4a8] sm:$0xf]  ;;  %v8234_v52 = vld [vmem:[#allocation2 + $0x4b4] sm:$0xf0]  ;;  %v6398_v54 = vor.u32 %v8334_v47, %v6397_v46 }
  0xae   :  { %v6125_v53 = vld [vmem:[#allocation2 + $0x5a8] sm:$0xf]  ;;  %v8266_v55 = vld [vmem:[#allocation2 + $0x5b4] sm:$0xf0]  ;;  %v5998_v60 = vor.u32 %v8234_v52, %v5997_v51 }
  0xaf   :  { %1899 = vmatpush.bf16.msra.mxu0 %v5438_v56  ;;  %1912 = vmatpush.bf16.msra.mxu1 %v5566_v57  ;;  %v6253_v56 = vld [vmem:[#allocation2 + $0x6a8] sm:$0xf]  ;;  %v8298_v57 = vld [vmem:[#allocation2 + $0x6b4] sm:$0xf0] }
  0xb0   :  { %1925 = vmatpush.bf16.msra.mxu2 %v5694_v58  ;;  %v6381_v58 = vld [vmem:[#allocation2 + $0x7a8] sm:$0xf]  ;;  %v8330_v59 = vld [vmem:[#allocation2 + $0x7b4] sm:$0xf0]  ;;  %v6254_v63 = vor.u32 %v8298_v57, %v6253_v56 }
  0xb1   :  { %1938 = vmatpush.bf16.msra.mxu3 %v5822_v62  ;;  %v5981_v61 = vld [vmem:[#allocation2 + $0x488] sm:$0xf]  ;;  %v6126_v62 = vor.u32 %v8266_v55, %v6125_v53  ;;  %v8230_v0 = vld [vmem:[#allocation2 + $0x494] sm:$0xf0]  ;;  %v6382_v3 = vor.u32 %v8330_v59, %v6381_v58 }
  0xb2   :  { %v6109_v1 = vld [vmem:[#allocation2 + $0x588] sm:$0xf]  ;;  %v8262_v2 = vld [vmem:[#allocation2 + $0x594] sm:$0xf0]  ;;  %v5982_v11 = vor.u32 %v8230_v0, %v5981_v61 }
  0xb3   :  { %1900 = vmatpush.bf16.msra.mxu0 %v5422_v4  ;;  %1913 = vmatpush.bf16.msra.mxu1 %v5550_v7  ;;  %v6237_v4 = vld [vmem:[#allocation2 + $0x688] sm:$0xf]  ;;  %v8294_v5 = vld [vmem:[#allocation2 + $0x694] sm:$0xf0]  ;;  %v6110_v13 = vor.u32 %v8262_v2, %v6109_v1 }
  0xb4   :  { %1926 = vmatpush.bf16.msra.mxu2 %v5678_v10  ;;  %v6365_v7 = vld [vmem:[#allocation2 + $0x788] sm:$0xf]  ;;  %v8326_v10 = vld [vmem:[#allocation2 + $0x794] sm:$0xf0] }
  0xb5   :  { %1939 = vmatpush.bf16.msra.mxu3 %v5806_v14  ;;  %v5965_v12 = vld [vmem:[#allocation2 + $0x468] sm:$0xf]  ;;  %v6238_v14 = vor.u32 %v8294_v5, %v6237_v4  ;;  %v8226_v16 = vld [vmem:[#allocation2 + $0x474] sm:$0xf0]  ;;  %v6366_v19 = vor.u32 %v8326_v10, %v6365_v7 }
  0xb6   :  { %v6093_v17 = vld [vmem:[#allocation2 + $0x568] sm:$0xf]  ;;  %v8258_v20 = vld [vmem:[#allocation2 + $0x574] sm:$0xf0]  ;;  %v5966_v26 = vor.u32 %v8226_v16, %v5965_v12  ;;  %v1708_v45 = vpop.f32.mrf.mxu1  ;;  %v5519_v16 = vld [vmem:[#allocation2 + $0xf8] sm:$0xf0] }
  0xb7   :  { %1901 = vmatpush.bf16.msra.mxu0 %v5406_v22  ;;  %1914 = vmatpush.bf16.msra.mxu1 %v5534_v27  ;;  %v6221_v21 = vld [vmem:[#allocation2 + $0x668] sm:$0xf]  ;;  %v8290_v22 = vld [vmem:[#allocation2 + $0x674] sm:$0xf0] }
  0xb8   :  { %1927 = vmatpush.bf16.msra.mxu2 %v5662_v28  ;;  %v6349_v23 = vld [vmem:[#allocation2 + $0x768] sm:$0xf]  ;;  %v8322_v24 = vld [vmem:[#allocation2 + $0x774] sm:$0xf0]  ;;  %v6094_v28 = vor.u32 %v8258_v20, %v6093_v17  ;;  %v6222_v29 = vor.u32 %v8290_v22, %v6221_v21  ;;  %v8144_v17 = vld [vmem:[#allocation2 + $0x1ec] sm:$0xf] }
  0xb9   :  { %1940 = vmatpush.bf16.msra.mxu3 %v5790_v31  ;;  %v5949_v30 = vld [vmem:[#allocation2 + $0x448] sm:$0xf]  ;;  %v8222_v31 = vld [vmem:[#allocation2 + $0x454] sm:$0xf0]  ;;  %v8176_v20 = vld [vmem:[#allocation2 + $0x2ec] sm:$0xf] }
  0xba   :  { %1902 = vmatmul.bf16.vlgmr.msra.gmra.mxu0 %v9003_v9  ;;  %1915 = vmatmul.bf16.vlgmr.msra.gmra.mxu1 %v9016_v25  ;;  %v8254_v36 = vld [vmem:[#allocation2 + $0x554] sm:$0xf0]  ;;  %v6205_v39 = vld [vmem:[#allocation2 + $0x648] sm:$0xf]  ;;  %v5950_v44 = vor.u32 %v8222_v31, %v5949_v30  ;;  %v5775_v21 = vld [vmem:[#allocation2 + $0x2f8] sm:$0xf0] }
  0xbb   :  { %1946 = vmatpush.bf16.msrb.mxu0 %v6030_v32  ;;  %1959 = vmatpush.bf16.msrb.mxu1 %v6158_v33  ;;  %v6077_v32 = vld [vmem:[#allocation2 + $0x548] sm:$0xf]  ;;  %v8286_v41 = vld [vmem:[#allocation2 + $0x654] sm:$0xf0] }
  0xbc   :  { %1972 = vmatpush.bf16.msrb.mxu2 %v6286_v35  ;;  %1941 = vmatmul.bf16.vlgmr.msra.gmra.mxu3 %v9008_v15  ;;  %v6350_v35 = vor.u32 %v8322_v24, %v6349_v23  ;;  %v8318_v43 = vld [vmem:[#allocation2 + $0x754] sm:$0xf0]  ;;  %v6078_v46 = vor.u32 %v8254_v36, %v6077_v32  ;;  %v6206_v47 = vor.u32 %v8286_v41, %v6205_v39  ;;  %v6317_v57 = vld [vmem:[#allocation2 + $0x728] sm:$0xf]  ;;  %v8140_v36 = vld [vmem:[#allocation2 + $0x1cc] sm:$0xf] }
  0xbd   :  { %1985 = vmatpush.bf16.msrb.mxu3 %v6414_v42  ;;  %1928 = vmatmul.bf16.vlgmr.msra.gmra.mxu2 %v9001_v8  ;;  %v6333_v42 = vld [vmem:[#allocation2 + $0x748] sm:$0xf]  ;;  %v8250_v53 = vld [vmem:[#allocation2 + $0x534] sm:$0xf0]  ;;  %v5778_v32 = vor.u32 %v8176_v20, %v5775_v21 }
  0xbe   :  { %v6334_v52 = vor.u32 %v8318_v43, %v6333_v42  ;;  %v8282_v55 = vld [vmem:[#allocation2 + $0x634] sm:$0xf0]  ;;  %v6173_v5 = vld [vmem:[#allocation2 + $0x608] sm:$0xf]  ;;  %v1710_v22 = vpop.f32.mrf.mxu1  ;;  %v5631_v42 = vld [vmem:[#allocation2 + $0x1d8] sm:$0xf0] }
  0xbf   :  { %1947 = vmatpush.bf16.msrb.mxu0 %v6014_v48  ;;  %1960 = vmatpush.bf16.msrb.mxu1 %v6142_v49  ;;  %v5933_v48 = vld [vmem:[#allocation2 + $0x428] sm:$0xf]  ;;  %v8218_v49 = vld [vmem:[#allocation2 + $0x434] sm:$0xf0]  ;;  %v8172_v43 = vld [vmem:[#allocation2 + $0x2cc] sm:$0xf] }
  0xc0   :  { %1973 = vmatpush.bf16.msrb.mxu2 %v6270_v50  ;;  %v6061_v50 = vld [vmem:[#allocation2 + $0x528] sm:$0xf]  ;;  %v8314_v58 = vld [vmem:[#allocation2 + $0x734] sm:$0xf0]  ;;  %v5934_v61 = vor.u32 %v8218_v49, %v5933_v48  ;;  %v5634_v48 = vor.u32 %v8140_v36, %v5631_v42  ;;  %v5583_v22 = vld [vmem:[#allocation2 + $0x178] sm:$0xf0] }
  0xc1   :  { %1986 = vmatpush.bf16.msrb.mxu3 %v6398_v54  ;;  %v6189_v54 = vld [vmem:[#allocation2 + $0x628] sm:$0xf]  ;;  %v6062_v1 = vor.u32 %v8250_v53, %v6061_v50  ;;  %v8246_v4 = vld [vmem:[#allocation2 + $0x514] sm:$0xf0]  ;;  %v6318_v10 = vor.u32 %v8314_v58, %v6317_v57  ;;  %v8104_v50 = vld [vmem:[#allocation2 + $0xac] sm:$0xf] }
  0xc2   :  { %v6190_v2 = vor.u32 %v8282_v55, %v6189_v54  ;;  %v6301_v12 = vld [vmem:[#allocation2 + $0x708] sm:$0xf]  ;;  %v5615_v54 = vld [vmem:[#allocation2 + $0x1b8] sm:$0xf0]  ;;  %v8168_v55 = vld [vmem:[#allocation2 + $0x2ac] sm:$0xf] }
  0xc3   :  { %1948 = vmatpush.bf16.msrb.mxu0 %v5998_v60  ;;  %1961 = vmatpush.bf16.msrb.mxu1 %v6126_v62  ;;  %v1695_v27 = vpop.f32.mrf.mxu0  ;;  %v1734_v60 = vpop.f32.mrf.mxu3  ;;  %v5917_v62 = vld [vmem:[#allocation2 + $0x408] sm:$0xf]  ;;  %v8200_v57 = vld [vmem:[#allocation2 + $0x3ac] sm:$0xf]  ;;  %v5871_v58 = vld [vmem:[#allocation2 + $0x3b8] sm:$0xf0] }
  0xc4   :  { %1974 = vmatpush.bf16.msrb.mxu2 %v6254_v63  ;;  %v1696_v33 = vadd.f32 %v1695_v27, %v398_v18  ;;  %v8214_v63 = vld [vmem:[#allocation2 + $0x414] sm:$0xf0]  ;;  %v5903_v27 = vld [vmem:[#allocation2 + $0x3f8] sm:$0xf0] }
  0xc5   :  { %1987 = vmatpush.bf16.msrb.mxu3 %v6382_v3  ;;  %v6045_v3 = vld [vmem:[#allocation2 + $0x508] sm:$0xf]  ;;  %v5918_v18 = vor.u32 %v8214_v63, %v5917_v62  ;;  %v8100_v62 = vld [vmem:[#allocation2 + $0x8c] sm:$0xf]  ;;  %v5471_v63 = vld [vmem:[#allocation2 + $0x98] sm:$0xf0] }
  0xc6   :  { %v1709_v51 = vadd.f32 %v1708_v45, %v1696_v33  ;;  %v6046_v23 = vor.u32 %v8246_v4, %v6045_v3  ;;  %v8108_v33 = vld [vmem:[#allocation2 + $0xcc] sm:$0xf]  ;;  %v5727_v4 = vld [vmem:[#allocation2 + $0x298] sm:$0xf0] }
  0xc7   :  { %1949 = vmatpush.bf16.msrb.mxu0 %v5982_v11  ;;  %1962 = vmatpush.bf16.msrb.mxu1 %v6110_v13  ;;  %v8278_v11 = vld [vmem:[#allocation2 + $0x614] sm:$0xf0]  ;;  %v8204_v45 = vld [vmem:[#allocation2 + $0x3cc] sm:$0xf]  ;;  %v5695_v42 = vld [vmem:[#allocation2 + $0x258] sm:$0xf0] }
  0xc8   :  { %1975 = vmatpush.bf16.msrb.mxu2 %v6238_v14  ;;  %v1721_v56 = vpop.f32.mrf.mxu2  ;;  %v8310_v13 = vld [vmem:[#allocation2 + $0x714] sm:$0xf0]  ;;  %v8112_v14 = vld [vmem:[#allocation2 + $0xec] sm:$0xf]  ;;  %v6174_v24 = vor.u32 %v8278_v11, %v6173_v5  ;;  %v5474_v11 = vor.u32 %v8100_v62, %v5471_v63 }
  0xc9   :  { %1988 = vmatpush.bf16.msrb.mxu3 %v6366_v19  ;;  %v1722_v59 = vadd.f32 %v1721_v56, %v1709_v51  ;;  %v5647_v19 = vld [vmem:[#allocation2 + $0x1f8] sm:$0xf0]  ;;  %v8164_v3 = vld [vmem:[#allocation2 + $0x28c] sm:$0xf] }
  0xca   :  { %v5650_v31 = vor.u32 %v8144_v17, %v5647_v19  ;;  %v5487_v51 = vld [vmem:[#allocation2 + $0xb8] sm:$0xf0]  ;;  %v8196_v5 = vld [vmem:[#allocation2 + $0x38c] sm:$0xf] }
  0xcb   :  { %1950 = vmatpush.bf16.msrb.mxu0 %v5966_v26  ;;  %1963 = vmatpush.bf16.msrb.mxu1 %v6094_v28  ;;  %v1697_v0 = vpop.f32.mrf.mxu0  ;;  %v9061_v7 = vadd.f32 %v1734_v60, %v1722_v59  ;;  %v8208_v26 = vld [vmem:[#allocation2 + $0x3ec] sm:$0xf]  ;;  %v6302_v28 = vor.u32 %v8310_v13, %v6301_v12  ;;  %v1736_v39 = vpop.f32.mrf.mxu3  ;;  %v5743_v56 = vld [vmem:[#allocation2 + $0x2b8] sm:$0xf0]  ;;  %v5490_v59 = vor.u32 %v8104_v50, %v5487_v51 }
  0xcc   :  { %1976 = vmatpush.bf16.msrb.mxu2 %v6222_v29  ;;  %v5522_v29 = vor.u32 %v8112_v14, %v5519_v16  ;;  %v5906_v41 = vor.u32 %v8208_v26, %v5903_v27  ;;  %v8132_v0 = vld [vmem:[#allocation2 + $0x18c] sm:$0xf]  ;;  %v5730_v14 = vor.u32 %v8164_v3, %v5727_v4  ;;  %v5455_v17 = vld [vmem:[#allocation2 + $0x78] sm:$0xf0] }
  0xcd   :  { %1989 = vmatpush.bf16.msrb.mxu3 %v6350_v35  ;;  %v5503_v35 = vld [vmem:[#allocation2 + $0xd8] sm:$0xf0]  ;;  %v8096_v16 = vld [vmem:[#allocation2 + $0x6c] sm:$0xf] }
  0xce   :  { %v8192_v26 = vld [vmem:[#allocation2 + $0x36c] sm:$0xf]  ;;  %v5839_v27 = vld [vmem:[#allocation2 + $0x378] sm:$0xf0] }
  0xcf   :  { %1951 = vmatpush.bf16.msrb.mxu0 %v5950_v44  ;;  %1964 = vmatpush.bf16.msrb.mxu1 %v6078_v46  ;;  %v5759_v44 = vld [vmem:[#allocation2 + $0x2d8] sm:$0xf0]  ;;  %v8084_v63 = vld [vmem:[#allocation2 + $0xc] sm:$0xf] }
  0xd0   :  { %1977 = vmatpush.bf16.msrb.mxu2 %v6206_v47  ;;  %v1723_v30 = vpop.f32.mrf.mxu2  ;;  %v5887_v46 = vld [vmem:[#allocation2 + $0x3d8] sm:$0xf0]  ;;  %v5506_v47 = vor.u32 %v8108_v33, %v5503_v35  ;;  %v5762_v49 = vor.u32 %v8172_v43, %v5759_v44  ;;  %v8124_v35 = vld [vmem:[#allocation2 + $0x14c] sm:$0xf] }
  0xd1   :  { %1990 = vmatpush.bf16.msrb.mxu3 %v6334_v52  ;;  %v8136_v52 = vld [vmem:[#allocation2 + $0x1ac] sm:$0xf]  ;;  %v5890_v53 = vor.u32 %v8204_v45, %v5887_v46  ;;  %v5439_v33 = vld [vmem:[#allocation2 + $0x58] sm:$0xf0] }
  0xd2   :  { %v5618_v60 = vor.u32 %v8136_v52, %v5615_v54  ;;  %v5567_v39 = vld [vmem:[#allocation2 + $0x158] sm:$0xf0]  ;;  %v8188_v45 = vld [vmem:[#allocation2 + $0x34c] sm:$0xf] }
  0xd3   :  { %1952 = vmatpush.bf16.msrb.mxu0 %v5934_v61  ;;  %1965 = vmatpush.bf16.msrb.mxu1 %v6062_v1  ;;  %v5746_v61 = vor.u32 %v8168_v55, %v5743_v56  ;;  %v5874_v1 = vor.u32 %v8200_v57, %v5871_v58  ;;  %v5823_v46 = vld [vmem:[#allocation2 + $0x358] sm:$0xf0]  ;;  %v5570_v50 = vor.u32 %v8124_v35, %v5567_v39  ;;  %v8088_v52 = vld [vmem:[#allocation2 + $0x2c] sm:$0xf] }
  0xd4   :  { %1978 = vmatpush.bf16.msrb.mxu2 %v6190_v2  ;;  %v5599_v2 = vld [vmem:[#allocation2 + $0x198] sm:$0xf0]  ;;  %v8120_v54 = vld [vmem:[#allocation2 + $0x12c] sm:$0xf]  ;;  %v5826_v56 = vor.u32 %v8188_v45, %v5823_v46 }
  0xd5   :  { %1991 = vmatpush.bf16.msrb.mxu3 %v6318_v10  ;;  %v5855_v10 = vld [vmem:[#allocation2 + $0x398] sm:$0xf0]  ;;  %v5602_v13 = vor.u32 %v8132_v0, %v5599_v2  ;;  %v8152_v58 = vld [vmem:[#allocation2 + $0x22c] sm:$0xf] }
  0xd6   :  { %v5858_v21 = vor.u32 %v8196_v5, %v5855_v10  ;;  %v5551_v57 = vld [vmem:[#allocation2 + $0x138] sm:$0xf0]  ;;  %v8116_v3 = vld [vmem:[#allocation2 + $0x10c] sm:$0xf] }
  0xd7   :  { %1953 = vmatpush.bf16.msrb.mxu0 %v5918_v18  ;;  %1966 = vmatpush.bf16.msrb.mxu1 %v6046_v23  ;;  %v1747_v12 = vpop.f32.mrf.mxu0  ;;  %v8128_v18 = vld [vmem:[#allocation2 + $0x16c] sm:$0xf]  ;;  %v1760_v20 = vpop.f32.mrf.mxu1  ;;  %v5407_v0 = vld [vmem:[#allocation2 + $0x18] sm:$0xf0] }
  0xd8   :  { %1979 = vmatpush.bf16.msrb.mxu2 %v6174_v24  ;;  %v1748_v19 = vadd.f32 %v1747_v12, %v9061_v7  ;;  %v8160_v23 = vld [vmem:[#allocation2 + $0x26c] sm:$0xf]  ;;  %v5711_v24 = vld [vmem:[#allocation2 + $0x278] sm:$0xf0]  ;;  %v5586_v30 = vor.u32 %v8128_v18, %v5583_v22  ;;  %v5842_v7 = vor.u32 %v8192_v26, %v5839_v27 }
  0xd9   :  { %1992 = vmatpush.bf16.msrb.mxu3 %v6302_v28  ;;  %v5535_v4 = vld [vmem:[#allocation2 + $0x118] sm:$0xf0]  ;;  %v8148_v5 = vld [vmem:[#allocation2 + $0x20c] sm:$0xf] }
  0xda   :  { %1954 = vmatmul.bf16.vlgmr.msrb.gmra.mxu0 %v9033_v37  ;;  %1967 = vmatmul.bf16.vlgmr.msrb.gmra.mxu1 %v9037_v40  ;;  %v1761_v28 = vadd.f32 %v1760_v20, %v1748_v19  ;;  %v5663_v12 = vld [vmem:[#allocation2 + $0x218] sm:$0xf0]  ;;  %v8272_v19 = vld [vmem:[#allocation2 + $0x5ec] sm:$0xf]  ;;  %v5410_v20 = vor.u32 %v8084_v63, %v5407_v0 }
  0xdb   :  { %1998 = vmatpush.bf16.msra.mxu0 %v5522_v29  ;;  %2011 = vmatpush.bf16.msra.mxu1 %v5650_v31  ;;  %v5458_v29 = vor.u32 %v8096_v16, %v5455_v17  ;;  %v5714_v31 = vor.u32 %v8160_v23, %v5711_v24  ;;  %v8240_v17 = vld [vmem:[#allocation2 + $0x4ec] sm:$0xf]  ;;  %v6031_v18 = vld [vmem:[#allocation2 + $0x4f8] sm:$0xf0]  ;;  %v5538_v24 = vor.u32 %v8116_v3, %v5535_v4 }
  0xdc   :  { %2024 = vmatpush.bf16.msra.mxu2 %v5778_v32  ;;  %1993 = vmatmul.bf16.vlgmr.msrb.gmra.mxu3 %v9035_v38  ;;  %v8092_v32 = vld [vmem:[#allocation2 + $0x4c] sm:$0xf]  ;;  %v6287_v23 = vld [vmem:[#allocation2 + $0x6f8] sm:$0xf0]  ;;  %v5666_v26 = vor.u32 %v8148_v5, %v5663_v12 }
  0xdd   :  { %2037 = vmatpush.bf16.msra.mxu3 %v5906_v41  ;;  %1980 = vmatmul.bf16.vlgmr.msrb.gmra.mxu2 %v9031_v34  ;;  %v8156_v41 = vld [vmem:[#allocation2 + $0x24c] sm:$0xf]  ;;  %v6015_v35 = vld [vmem:[#allocation2 + $0x4d8] sm:$0xf0] }
  0xde   :  { %v5698_v51 = vor.u32 %v8156_v41, %v5695_v42  ;;  %v8304_v22 = vld [vmem:[#allocation2 + $0x6ec] sm:$0xf]  ;;  %v6143_v39 = vld [vmem:[#allocation2 + $0x5d8] sm:$0xf0] }
  0xdf   :  { %1999 = vmatpush.bf16.msra.mxu0 %v5506_v47  ;;  %2012 = vmatpush.bf16.msra.mxu1 %v5634_v48  ;;  %v1786_v44 = vpop.f32.mrf.mxu3  ;;  %v5442_v47 = vor.u32 %v8092_v32, %v5439_v33  ;;  %v1762_v55 = vpop.f32.mrf.mxu1  ;;  %v8336_v27 = vld [vmem:[#allocation2 + $0x7ec] sm:$0xf]  ;;  %v6290_v32 = vor.u32 %v8304_v22, %v6287_v23  ;;  %v6271_v42 = vld [vmem:[#allocation2 + $0x6d8] sm:$0xf0] }
  0xe0   :  { %2025 = vmatpush.bf16.msra.mxu2 %v5762_v49  ;;  %v1773_v36 = vpop.f32.mrf.mxu2  ;;  %v1749_v49 = vpop.f32.mrf.mxu0  ;;  %v8236_v33 = vld [vmem:[#allocation2 + $0x4cc] sm:$0xf]  ;;  %v6255_v55 = vld [vmem:[#allocation2 + $0x6b8] sm:$0xf0] }
  0xe1   :  { %2038 = vmatpush.bf16.msra.mxu3 %v5890_v53  ;;  %v1774_v43 = vadd.f32 %v1773_v36, %v1761_v28  ;;  %v5423_v53 = vld [vmem:[#allocation2 + $0x38] sm:$0xf0]  ;;  %v8268_v36 = vld [vmem:[#allocation2 + $0x5cc] sm:$0xf]  ;;  %v6018_v45 = vor.u32 %v8236_v33, %v6015_v35 }
  0xe2   :  { %v5426_v62 = vor.u32 %v8088_v52, %v5423_v53  ;;  %v6415_v28 = vld [vmem:[#allocation2 + $0x7f8] sm:$0xf0]  ;;  %v8300_v41 = vld [vmem:[#allocation2 + $0x6cc] sm:$0xf]  ;;  %v6146_v46 = vor.u32 %v8268_v36, %v6143_v39 }
  0xe3   :  { %2000 = vmatpush.bf16.msra.mxu0 %v5490_v59  ;;  %2013 = vmatpush.bf16.msra.mxu1 %v5618_v60  ;;  %v9068_v48 = vadd.f32 %v1786_v44, %v1774_v43  ;;  %v5679_v59 = vld [vmem:[#allocation2 + $0x238] sm:$0xf0]  ;;  %v8184_v60 = vld [vmem:[#allocation2 + $0x32c] sm:$0xf] }
  0xe4   :  { %2026 = vmatpush.bf16.msra.mxu2 %v5746_v61  ;;  %v5807_v61 = vld [vmem:[#allocation2 + $0x338] sm:$0xf0]  ;;  %v5682_v2 = vor.u32 %v8152_v58, %v5679_v59  ;;  %v8332_v43 = vld [vmem:[#allocation2 + $0x7cc] sm:$0xf] }
  0xe5   :  { %2039 = vmatpush.bf16.msra.mxu3 %v5874_v1  ;;  %v5554_v1 = vor.u32 %v8120_v54, %v5551_v57  ;;  %v6399_v44 = vld [vmem:[#allocation2 + $0x7d8] sm:$0xf0]  ;;  %v8232_v49 = vld [vmem:[#allocation2 + $0x4ac] sm:$0xf] }
  0xe6   :  { %v6402_v52 = vor.u32 %v8332_v43, %v6399_v44  ;;  %v6127_v53 = vld [vmem:[#allocation2 + $0x5b8] sm:$0xf0]  ;;  %v8296_v54 = vld [vmem:[#allocation2 + $0x6ac] sm:$0xf] }
  0xe7   :  { %2001 = vmatpush.bf16.msra.mxu0 %v5474_v11  ;;  %2014 = vmatpush.bf16.msra.mxu1 %v5602_v13  ;;  %v5810_v11 = vor.u32 %v8184_v60, %v5807_v61  ;;  %v8180_v13 = vld [vmem:[#allocation2 + $0x30c] sm:$0xf]  ;;  %v1788_v16 = vpop.f32.mrf.mxu3  ;;  %v6383_v57 = vld [vmem:[#allocation2 + $0x7b8] sm:$0xf0]  ;;  %v6258_v60 = vor.u32 %v8296_v54, %v6255_v55  ;;  %v399_v54 = vperm.slane %v9058_v6, 1 }
  0xe8   :  { %2027 = vmatpush.bf16.msra.mxu2 %v5730_v14  ;;  %v1775_v10 = vpop.f32.mrf.mxu2  ;;  %v5791_v14 = vld [vmem:[#allocation2 + $0x318] sm:$0xf0]  ;;  %v8228_v61 = vld [vmem:[#allocation2 + $0x48c] sm:$0xf]  ;;  %v8354_v6 = vld [vmem:[#allocation4 + $0x74] sm:$0xf0] }
  0xe9   :  { %2040 = vmatpush.bf16.msra.mxu3 %v5858_v21  ;;  %v6159_v21 = vld [vmem:[#allocation2 + $0x5f8] sm:$0xf0]  ;;  %v8324_v3 = vld [vmem:[#allocation2 + $0x78c] sm:$0xf] }
  0xea   :  { %v6111_v0 = vld [vmem:[#allocation2 + $0x598] sm:$0xf0]  ;;  %v8224_v10 = vld [vmem:[#allocation2 + $0x46c] sm:$0xf] }
  0xeb   :  { %2002 = vmatpush.bf16.msra.mxu0 %v5458_v29  ;;  %2015 = vmatpush.bf16.msra.mxu1 %v5586_v30  ;;  %v5794_v29 = vor.u32 %v8180_v13, %v5791_v14  ;;  %v6034_v30 = vor.u32 %v8240_v17, %v6031_v18  ;;  %v8256_v12 = vld [vmem:[#allocation2 + $0x56c] sm:$0xf]  ;;  %v6095_v16 = vld [vmem:[#allocation2 + $0x578] sm:$0xf0] }
  0xec   :  { %2028 = vmatpush.bf16.msra.mxu2 %v5714_v31  ;;  %v6162_v31 = vor.u32 %v8272_v19, %v6159_v21  ;;  %v8288_v17 = vld [vmem:[#allocation2 + $0x66c] sm:$0xf]  ;;  %v6223_v18 = vld [vmem:[#allocation2 + $0x678] sm:$0xf0]  ;;  %v6098_v22 = vor.u32 %v8256_v12, %v6095_v16 }
  0xed   :  { %2041 = vmatpush.bf16.msra.mxu3 %v5842_v7  ;;  %v6418_v7 = vor.u32 %v8336_v27, %v6415_v28  ;;  %v8320_v19 = vld [vmem:[#allocation2 + $0x76c] sm:$0xf]  ;;  %v6226_v23 = vor.u32 %v8288_v17, %v6223_v18  ;;  %v6335_v36 = vld [vmem:[#allocation2 + $0x758] sm:$0xf0] }
  0xee   :  { %v8252_v27 = vld [vmem:[#allocation2 + $0x54c] sm:$0xf]  ;;  %v5935_v44 = vld [vmem:[#allocation2 + $0x438] sm:$0xf0] }
  0xef   :  { %2003 = vmatpush.bf16.msra.mxu0 %v5442_v47  ;;  %2016 = vmatpush.bf16.msra.mxu1 %v5570_v50  ;;  %v6274_v47 = vor.u32 %v8300_v41, %v6271_v42  ;;  %v5999_v50 = vld [vmem:[#allocation2 + $0x4b8] sm:$0xf0]  ;;  %v8316_v35 = vld [vmem:[#allocation2 + $0x74c] sm:$0xf] }
  0xf0   :  { %2029 = vmatpush.bf16.msra.mxu2 %v5698_v51  ;;  %v8264_v51 = vld [vmem:[#allocation2 + $0x5ac] sm:$0xf]  ;;  %v6002_v58 = vor.u32 %v8232_v49, %v5999_v50  ;;  %v6063_v49 = vld [vmem:[#allocation2 + $0x538] sm:$0xf0] }
  0xf1   :  { %2042 = vmatpush.bf16.msra.mxu3 %v5826_v56  ;;  %v8328_v56 = vld [vmem:[#allocation2 + $0x7ac] sm:$0xf]  ;;  %v6130_v59 = vor.u32 %v8264_v51, %v6127_v53  ;;  %v6191_v51 = vld [vmem:[#allocation2 + $0x638] sm:$0xf0] }
  0xf2   :  { %v6386_v63 = vor.u32 %v8328_v56, %v6383_v57  ;;  %v8216_v43 = vld [vmem:[#allocation2 + $0x42c] sm:$0xf]  ;;  %v6319_v53 = vld [vmem:[#allocation2 + $0x738] sm:$0xf0] }
  0xf3   :  { %2004 = vmatpush.bf16.msra.mxu0 %v5426_v62  ;;  %2017 = vmatpush.bf16.msra.mxu1 %v5554_v1  ;;  %v5983_v62 = vld [vmem:[#allocation2 + $0x498] sm:$0xf0]  ;;  %v8292_v1 = vld [vmem:[#allocation2 + $0x68c] sm:$0xf]  ;;  %v5938_v55 = vor.u32 %v8216_v43, %v5935_v44  ;;  %v6445_v43 = vld [vmem:[#allocation4 + $0x30] sm:$0xf] }
  0xf4   :  { %2030 = vmatpush.bf16.msra.mxu2 %v5682_v2  ;;  %v6239_v2 = vld [vmem:[#allocation2 + $0x698] sm:$0xf0]  ;;  %v8280_v50 = vld [vmem:[#allocation2 + $0x62c] sm:$0xf]  ;;  %v6509_v44 = vld [vmem:[#allocation4 + $0xb0] sm:$0xf] }
  0xf5   :  { %2043 = vmatpush.bf16.msra.mxu3 %v5810_v11  ;;  %v6242_v5 = vor.u32 %v8292_v1, %v6239_v2  ;;  %v5967_v11 = vld [vmem:[#allocation2 + $0x478] sm:$0xf0]  ;;  %v8212_v56 = vld [vmem:[#allocation2 + $0x40c] sm:$0xf] }
  0xf6   :  { %v5970_v21 = vor.u32 %v8224_v10, %v5967_v11  ;;  %v8308_v1 = vld [vmem:[#allocation2 + $0x70c] sm:$0xf]  ;;  %v8370_v10 = vld [vmem:[#allocation4 + $0xf4] sm:$0xf0] }
  0xf7   :  { %2005 = vmatpush.bf16.msra.mxu0 %v5410_v20  ;;  %2018 = vmatpush.bf16.msra.mxu1 %v5538_v24  ;;  %v9074_v4 = vpop.f32.mrf.mxu0  ;;  %v9076_v13 = vpop.f32.mrf.mxu1  ;;  %v6351_v20 = vld [vmem:[#allocation2 + $0x778] sm:$0xf0]  ;;  %v8220_v24 = vld [vmem:[#allocation2 + $0x44c] sm:$0xf] }
  0xf8   :  { %2031 = vmatpush.bf16.msra.mxu2 %v5666_v26  ;;  %v5951_v26 = vld [vmem:[#allocation2 + $0x458] sm:$0xf0] }
  0xf9   :  { %2044 = vmatpush.bf16.msra.mxu3 %v5794_v29  ;;  %v6354_v29 = vor.u32 %v8320_v19, %v6351_v20  ;;  %v6469_v19 = vld [vmem:[#allocation4 + $0x60] sm:$0xf]  ;;  %v8352_v20 = vld [vmem:[#allocation4 + $0x64] sm:$0xf0] }
  0xfa   :  { %2006 = vmatmul.bf16.vlgmr.msra.gmra.mxu0 %v9003_v9  ;;  %2019 = vmatmul.bf16.vlgmr.msra.gmra.mxu1 %v9016_v25  ;;  %v6367_v9 = vld [vmem:[#allocation2 + $0x798] sm:$0xf0] }
  0xfb   :  { %2050 = vmatpush.bf16.msrb.mxu0 %v6034_v30  ;;  %2063 = vmatpush.bf16.msrb.mxu1 %v6162_v31  ;;  %v6370_v14 = vor.u32 %v8324_v3, %v6367_v9  ;;  %v6079_v30 = vld [vmem:[#allocation2 + $0x558] sm:$0xf0]  ;;  %v8284_v31 = vld [vmem:[#allocation2 + $0x64c] sm:$0xf]  ;;  %v6477_v9 = vld [vmem:[#allocation4 + $0x70] sm:$0xf] }
  0xfc   :  { %2076 = vmatpush.bf16.msrb.mxu2 %v6290_v32  ;;  %2045 = vmatmul.bf16.vlgmr.msra.gmra.mxu3 %v9008_v15  ;;  %v5986_v15 = vor.u32 %v8228_v61, %v5983_v62  ;;  %v6207_v32 = vld [vmem:[#allocation2 + $0x658] sm:$0xf0]  ;;  %v6082_v41 = vor.u32 %v8252_v27, %v6079_v30  ;;  %v6478_v16 = vor.u32 %v8354_v6, %v6477_v9  ;;  %v8350_v27 = vld [vmem:[#allocation4 + $0x54] sm:$0xf0]  ;;  %v6493_v9 = vld [vmem:[#allocation4 + $0x90] sm:$0xf] }
  0xfd   :  { %2089 = vmatpush.bf16.msrb.mxu3 %v6418_v7  ;;  %2032 = vmatmul.bf16.vlgmr.msra.gmra.mxu2 %v9001_v8  ;;  %v8260_v8 = vld [vmem:[#allocation2 + $0x58c] sm:$0xf]  ;;  %v5954_v7 = vor.u32 %v8220_v24, %v5951_v26  ;;  %v6210_v42 = vor.u32 %v8284_v31, %v6207_v32  ;;  %v6047_v61 = vld [vmem:[#allocation2 + $0x518] sm:$0xf0]  ;;  %v6461_v26 = vld [vmem:[#allocation4 + $0x50] sm:$0xf] }
  0xfe   :  { %v6114_v25 = vor.u32 %v8260_v8, %v6111_v0  ;;  %v6175_v0 = vld [vmem:[#allocation2 + $0x618] sm:$0xf0]  ;;  %v6462_v30 = vor.u32 %v8350_v27, %v6461_v26  ;;  %v8369_v26 = vld [vmem:[#allocation4 + $0xf4] sm:$0xf] }
  0xff   :  { %2051 = vmatpush.bf16.msrb.mxu0 %v6018_v45  ;;  %2064 = vmatpush.bf16.msrb.mxu1 %v6146_v46  ;;  %v9080_v33 = vpop.f32.mrf.mxu3  ;;  %v1801_v39 = vpop.f32.mrf.mxu0  ;;  %v8248_v45 = vld [vmem:[#allocation2 + $0x52c] sm:$0xf]  ;;  %v6303_v3 = vld [vmem:[#allocation2 + $0x718] sm:$0xf0] }
 0x100   :  { %2077 = vmatpush.bf16.msrb.mxu2 %v6274_v47  ;;  %v9078_v28 = vpop.f32.mrf.mxu2  ;;  %v1814_v46 = vpop.f32.mrf.mxu1  ;;  %v6338_v47 = vor.u32 %v8316_v35, %v6335_v36  ;;  %v6066_v57 = vor.u32 %v8248_v45, %v6063_v49  ;;  %v8348_v35 = vld [vmem:[#allocation4 + $0x44] sm:$0xf0]  ;;  %v6517_v36 = vld [vmem:[#allocation4 + $0xc0] sm:$0xf]  ;;  %v8386_v39 = vld [vmem:[#allocation4 + $0x174] sm:$0xf0] }
 0x101   :  { %2090 = vmatpush.bf16.msrb.mxu3 %v6402_v52  ;;  %v8312_v52 = vld [vmem:[#allocation2 + $0x72c] sm:$0xf]  ;;  %v8384_v49 = vld [vmem:[#allocation4 + $0x164] sm:$0xf0]  ;;  %v6543_v27 = vld [vmem:[#allocation4 + $0xf8] sm:$0xf0] }
 0x102   :  { %v6322_v8 = vor.u32 %v8312_v52, %v6319_v53 }
 0x103   :  { %2052 = vmatpush.bf16.msrb.mxu0 %v6002_v58  ;;  %2065 = vmatpush.bf16.msrb.mxu1 %v6130_v59  ;;  %v6194_v58 = vor.u32 %v8280_v50, %v6191_v51  ;;  %v5919_v59 = vld [vmem:[#allocation2 + $0x418] sm:$0xf0] }
 0x104   :  { %2078 = vmatpush.bf16.msrb.mxu2 %v6258_v60  ;;  %v8244_v60 = vld [vmem:[#allocation2 + $0x50c] sm:$0xf] }
 0x105   :  { %2091 = vmatpush.bf16.msrb.mxu3 %v6386_v63  ;;  %v8276_v63 = vld [vmem:[#allocation2 + $0x60c] sm:$0xf]  ;;  %v6050_v11 = vor.u32 %v8244_v60, %v6047_v61  ;;  %v6589_v60 = vld [vmem:[#allocation4 + $0x150] sm:$0xf]  ;;  %v8382_v61 = vld [vmem:[#allocation4 + $0x154] sm:$0xf0] }
 0x106   :  { %v6178_v12 = vor.u32 %v8276_v63, %v6175_v0 }
 0x107   :  { %2053 = vmatpush.bf16.msrb.mxu0 %v5986_v15  ;;  %2066 = vmatpush.bf16.msrb.mxu1 %v6114_v25  ;;  %v1840_v2 = vpop.f32.mrf.mxu3  ;;  %v1800_v15 = vadd.f32 %v9074_v4, %v399_v54  ;;  %v5922_v25 = vor.u32 %v8212_v56, %v5919_v59  ;;  %v6470_v4 = vor.u32 %v8352_v20, %v6469_v19  ;;  %v6437_v54 = vld [vmem:[#allocation4 + $0x20] sm:$0xf]  ;;  %v8356_v19 = vld [vmem:[#allocation4 + $0x84] sm:$0xf0]  ;;  %v8353_v20 = vld [vmem:[#allocation4 + $0x74] sm:$0xf] }
 0x108   :  { %2079 = vmatpush.bf16.msrb.mxu2 %v6242_v5  ;;  %v1827_v62 = vpop.f32.mrf.mxu2  ;;  %v6541_v5 = vld [vmem:[#allocation4 + $0xf0] sm:$0xf]  ;;  %v6501_v56 = vld [vmem:[#allocation4 + $0xa0] sm:$0xf] }
 0x109   :  { %2092 = vmatpush.bf16.msrb.mxu3 %v6370_v14  ;;  %v6306_v14 = vor.u32 %v8308_v1, %v6303_v3  ;;  %v6542_v17 = vor.u32 %v8370_v10, %v6541_v5  ;;  %v1813_v18 = vadd.f32 %v9076_v13, %v1800_v15  ;;  %v6525_v13 = vld [vmem:[#allocation4 + $0xd0] sm:$0xf]  ;;  %v6590_v62 = vor.u32 %v8382_v61, %v6589_v60  ;;  %v8342_v3 = vld [vmem:[#allocation4 + $0x14] sm:$0xf0]  ;;  %v8380_v5 = vld [vmem:[#allocation4 + $0x144] sm:$0xf0] }
 0x10a   :  { %v6429_v2 = vld [vmem:[#allocation4 + $0x10] sm:$0xf]  ;;  %v8358_v15 = vld [vmem:[#allocation4 + $0x94] sm:$0xf0]  ;;  %v8363_v60 = vld [vmem:[#allocation4 + $0xc4] sm:$0xf] }
 0x10b   :  { %2054 = vmatpush.bf16.msrb.mxu0 %v5970_v21  ;;  %2067 = vmatpush.bf16.msrb.mxu1 %v6098_v22  ;;  %v6533_v21 = vld [vmem:[#allocation4 + $0xe0] sm:$0xf]  ;;  %v8368_v22 = vld [vmem:[#allocation4 + $0xe4] sm:$0xf0]  ;;  %v1826_v24 = vadd.f32 %v9078_v28, %v1813_v18  ;;  %v6519_v61 = vld [vmem:[#allocation4 + $0xc8] sm:$0xf0] }
 0x10c   :  { %2080 = vmatpush.bf16.msrb.mxu2 %v6226_v23  ;;  %v6534_v23 = vor.u32 %v8368_v22, %v6533_v21  ;;  %v8364_v28 = vld [vmem:[#allocation4 + $0xc4] sm:$0xf0]  ;;  %v6485_v18 = vld [vmem:[#allocation4 + $0x80] sm:$0xf]  ;;  %v6479_v22 = vld [vmem:[#allocation4 + $0x78] sm:$0xf0] }
 0x10d   :  { %2093 = vmatpush.bf16.msrb.mxu3 %v6354_v29  ;;  %v8366_v29 = vld [vmem:[#allocation4 + $0xd4] sm:$0xf0]  ;;  %v1839_v31 = vadd.f32 %v9080_v33, %v1826_v24 }
 0x10e   :  { %v6526_v32 = vor.u32 %v8366_v29, %v6525_v13  ;;  %v8362_v33 = vld [vmem:[#allocation4 + $0xb4] sm:$0xf0] }
 0x10f   :  { %2055 = vmatpush.bf16.msrb.mxu0 %v5954_v7  ;;  %2068 = vmatpush.bf16.msrb.mxu1 %v6082_v41  ;;  %v6605_v7 = vld [vmem:[#allocation4 + $0x170] sm:$0xf]  ;;  %v6510_v53 = vor.u32 %v8362_v33, %v6509_v44  ;;  %v8378_v24 = vld [vmem:[#allocation4 + $0x134] sm:$0xf0]  ;;  %v6463_v33 = vld [vmem:[#allocation4 + $0x58] sm:$0xf0] }
 0x110   :  { %2081 = vmatpush.bf16.msrb.mxu2 %v6210_v42  ;;  %v6606_v41 = vor.u32 %v8386_v39, %v6605_v7  ;;  %v6518_v42 = vor.u32 %v8364_v28, %v6517_v36  ;;  %v6546_v36 = vor.u32 %v8369_v26, %v6543_v27  ;;  %v6471_v28 = vld [vmem:[#allocation4 + $0x68] sm:$0xf0]  ;;  %v6565_v7 = vld [vmem:[#allocation4 + $0x120] sm:$0xf]  ;;  %v8376_v39 = vld [vmem:[#allocation4 + $0x124] sm:$0xf0] }
 0x111   :  { %2094 = vmatpush.bf16.msrb.mxu3 %v6338_v47  ;;  %v6597_v47 = vld [vmem:[#allocation4 + $0x160] sm:$0xf]  ;;  %v8374_v44 = vld [vmem:[#allocation4 + $0x114] sm:$0xf0]  ;;  %v6431_v26 = vld [vmem:[#allocation4 + $0x18] sm:$0xf0] }
 0x112   :  { %v6598_v50 = vor.u32 %v8384_v49, %v6597_v47  ;;  %v8365_v47 = vld [vmem:[#allocation4 + $0xd4] sm:$0xf] }
 0x113   :  { %2056 = vmatpush.bf16.msrb.mxu0 %v5938_v55  ;;  %2069 = vmatpush.bf16.msrb.mxu1 %v6066_v57  ;;  %v8344_v55 = vld [vmem:[#allocation4 + $0x24] sm:$0xf0]  ;;  %v8357_v27 = vld [vmem:[#allocation4 + $0x94] sm:$0xf] }
 0x114   :  { %2082 = vmatpush.bf16.msrb.mxu2 %v6194_v58  ;;  %v8360_v58 = vld [vmem:[#allocation4 + $0xa4] sm:$0xf0] }
 0x115   :  { %2095 = vmatpush.bf16.msrb.mxu3 %v6322_v8  ;;  %v6438_v8 = vor.u32 %v8344_v55, %v6437_v54  ;;  %v6502_v1 = vor.u32 %v8360_v58, %v6501_v56  ;;  %v6607_v54 = vld [vmem:[#allocation4 + $0x178] sm:$0xf0]  ;;  %v6455_v58 = vld [vmem:[#allocation4 + $0x48] sm:$0xf0] }
 0x117   :  { %2057 = vmatpush.bf16.msrb.mxu0 %v5922_v25  ;;  %2070 = vmatpush.bf16.msrb.mxu1 %v6050_v11  ;;  %v1864_v46 = vpop.f32.mrf.mxu1  ;;  %v6581_v25 = vld [vmem:[#allocation4 + $0x140] sm:$0xf] }
 0x118   :  { %2083 = vmatpush.bf16.msrb.mxu2 %v6178_v12  ;;  %v6582_v10 = vor.u32 %v8380_v5, %v6581_v25  ;;  %v6430_v12 = vor.u32 %v8342_v3, %v6429_v2  ;;  %v8361_v2 = vld [vmem:[#allocation4 + $0xb4] sm:$0xf]  ;;  %v6599_v25 = vld [vmem:[#allocation4 + $0x168] sm:$0xf0] }
 0x119   :  { %2096 = vmatpush.bf16.msrb.mxu3 %v6306_v14  ;;  %v6421_v14 = vld [vmem:[#allocation4] sm:$0xf] }
 0x11a   :  { %2058 = vmatmul.bf16.vlgmr.msrb.gmra.mxu0 %v9033_v37  ;;  %2071 = vmatmul.bf16.vlgmr.msrb.gmra.mxu1 %v9037_v40  ;;  %v6453_v37 = vld [vmem:[#allocation4 + $0x40] sm:$0xf] }
 0x11b   :  { %2500 = vmatpush.bf16.msra.mxu0 %v6478_v16  ;;  %2513 = vmatpush.bf16.msra.mxu1 %v6542_v17  ;;  %v6454_v40 = vor.u32 %v8348_v35, %v6453_v37  ;;  %v8340_v16 = vld [vmem:[#allocation4 + $0x4] sm:$0xf0]  ;;  %v6494_v17 = vor.u32 %v8358_v15, %v6493_v9  ;;  %v6482_v37 = vor.u32 %v8353_v20, %v6479_v22  ;;  %v8351_v35 = vld [vmem:[#allocation4 + $0x64] sm:$0xf]  ;;  %v6511_v9 = vld [vmem:[#allocation4 + $0xb8] sm:$0xf0] }
 0x11c   :  { %2084 = vmatmul.bf16.vlgmr.msrb.gmra.mxu2 %v9031_v34  ;;  %2097 = vmatmul.bf16.vlgmr.msrb.gmra.mxu3 %v9035_v38  ;;  %v1851_v34 = vpop.f32.mrf.mxu0  ;;  %v8346_v38 = vld [vmem:[#allocation4 + $0x34] sm:$0xf0]  ;;  %v8383_v15 = vld [vmem:[#allocation4 + $0x164] sm:$0xf]  ;;  %v6591_v20 = vld [vmem:[#allocation4 + $0x158] sm:$0xf0] }
 0x11d   :  { %v1852_v45 = vadd.f32 %v1851_v34, %v1839_v31  ;;  %2526 = vmatpush.bf16.msra.mxu2 %v6606_v41  ;;  %v6446_v51 = vor.u32 %v8346_v38, %v6445_v43  ;;  %v2102_v31 = vmax.f32 %v9068_v48, 0.0  ;;  %v8367_v41 = vld [vmem:[#allocation4 + $0xe4] sm:$0xf]  ;;  %v6566_v34 = vor.u32 %v8376_v39, %v6565_v7  ;;  %v6557_v38 = vld [vmem:[#allocation4 + $0x110] sm:$0xf] }
 0x11e   :  { %v6474_v48 = vor.u32 %v8351_v35, %v6471_v28  ;;  %v6558_v49 = vor.u32 %v8374_v44, %v6557_v38  ;;  %v6602_v5 = vor.u32 %v8383_v15, %v6599_v25  ;;  %v8339_v7 = vld [vmem:[#allocation4 + $0x4] sm:$0xf]  ;;  %v6487_v38 = vld [vmem:[#allocation4 + $0x88] sm:$0xf0] }
 0x11f   :  { %2501 = vmatpush.bf16.msra.mxu0 %v6470_v4  ;;  %2514 = vmatpush.bf16.msra.mxu1 %v6534_v23  ;;  %v1865_v52 = vadd.f32 %v1864_v46, %v1852_v45  ;;  %v1890_v59 = vpop.f32.mrf.mxu3  ;;  %v1866_v6 = vpop.f32.mrf.mxu1  ;;  %v6573_v23 = vld [vmem:[#allocation4 + $0x130] sm:$0xf]  ;;  %v9094_v43 = vpack.c.bf16 %v2102_v31, %v2102_v31  ;;  %v8349_v46 = vld [vmem:[#allocation4 + $0x54] sm:$0xf]  ;;  %v8379_v31 = vld [vmem:[#allocation4 + $0x144] sm:$0xf] }
 0x120   :  { %v1877_v57 = vpop.f32.mrf.mxu2  ;;  %v6574_v13 = vor.u32 %v8378_v24, %v6573_v23  ;;  %v6466_v55 = vor.u32 %v8349_v46, %v6463_v33  ;;  %v8341_v24 = vld [vmem:[#allocation4 + $0x14] sm:$0xf]  ;;  %v8375_v33 = vld [vmem:[#allocation4 + $0x124] sm:$0xf] }
 0x121   :  { %2527 = vmatpush.bf16.msra.mxu2 %v6598_v50  ;;  %v1878_v63 = vadd.f32 %v1877_v57, %v1865_v52  ;;  %v6527_v50 = vld [vmem:[#allocation4 + $0xd8] sm:$0xf0]  ;;  %v8372_v52 = vld [vmem:[#allocation4 + $0x104] sm:$0xf0]  ;;  %v8347_v57 = vld [vmem:[#allocation4 + $0x44] sm:$0xf]  ;;  %v6434_v35 = vor.u32 %v8341_v24, %v6431_v26 }
 0x122   :  { %v6530_v56 = vor.u32 %v8365_v47, %v6527_v50  ;;  %v6567_v47 = vld [vmem:[#allocation4 + $0x128] sm:$0xf0]  ;;  %v8392_v24 = vld [vmem:[#allocation4 + $0x1a4] sm:$0xf0] }
 0x123   :  { %2502 = vmatpush.bf16.msra.mxu0 %v6462_v30  ;;  %2515 = vmatpush.bf16.msra.mxu1 %v6526_v32  ;;  %v1891_v11 = vadd.f32 %v1890_v59, %v1878_v63  ;;  %v6422_v30 = vor.u32 %v8340_v16, %v6421_v14  ;;  %v6486_v32 = vor.u32 %v8356_v19, %v6485_v18  ;;  %v6439_v14 = vld [vmem:[#allocation4 + $0x28] sm:$0xf0]  ;;  %v8359_v16 = vld [vmem:[#allocation4 + $0xa4] sm:$0xf]  ;;  %v8381_v19 = vld [vmem:[#allocation4 + $0x154] sm:$0xf] }
 0x124   :  { %v1853_v0 = vpop.f32.mrf.mxu0  ;;  %v6522_v63 = vor.u32 %v8363_v60, %v6519_v61  ;;  %v6594_v22 = vor.u32 %v8381_v19, %v6591_v20  ;;  %v8371_v60 = vld [vmem:[#allocation4 + $0x104] sm:$0xf]  ;;  %v6551_v61 = vld [vmem:[#allocation4 + $0x108] sm:$0xf0] }
 0x125   :  { %2528 = vmatpush.bf16.msra.mxu2 %v6590_v62  ;;  %v2103_v29 = vmax.f32 %v1891_v11, 0.0  ;;  %v8345_v0 = vld [vmem:[#allocation4 + $0x34] sm:$0xf]  ;;  %v6514_v11 = vor.u32 %v8361_v2, %v6511_v9  ;;  %v8398_v9 = vld [vmem:[#allocation4 + $0x1d4] sm:$0xf0] }
 0x127   :  { %2503 = vmatpush.bf16.msra.mxu0 %v6454_v40  ;;  %2516 = vmatpush.bf16.msra.mxu1 %v6518_v42  ;;  %v1892_v4 = vpop.f32.mrf.mxu3  ;;  %v6535_v40 = vld [vmem:[#allocation4 + $0xe8] sm:$0xf0]  ;;  %v9092_v42 = vpack.c.bf16 %v2103_v29, %v2103_v29  ;;  %v6495_v29 = vld [vmem:[#allocation4 + $0x98] sm:$0xf0] }
 0x128   :  { %v1879_v21 = vpop.f32.mrf.mxu2  ;;  %v6538_v45 = vor.u32 %v8367_v41, %v6535_v40  ;;  %v6498_v39 = vor.u32 %v8357_v27, %v6495_v29  ;;  %v6423_v41 = vld [vmem:[#allocation4 + $0x8] sm:$0xf0]  ;;  %v8377_v40 = vld [vmem:[#allocation4 + $0x134] sm:$0xf] }
 0x129   :  { %2529 = vmatpush.bf16.msra.mxu2 %v6582_v10 }
 0x12b   :  { %2504 = vmatpush.bf16.msra.mxu0 %v6446_v51  ;;  %2517 = vmatpush.bf16.msra.mxu1 %v6510_v53  ;;  %v6549_v51 = vld [vmem:[#allocation4 + $0x100] sm:$0xf]  ;;  %v8385_v53 = vld [vmem:[#allocation4 + $0x174] sm:$0xf] }
 0x12c   :  { %v6550_v59 = vor.u32 %v8372_v52, %v6549_v51  ;;  %v6610_v62 = vor.u32 %v8385_v53, %v6607_v54  ;;  %v6426_v51 = vor.u32 %v8339_v7, %v6423_v41  ;;  %v8402_v52 = vld [vmem:[#allocation4 + $0x1f4] sm:$0xf0]  ;;  %v8401_v7 = vld [vmem:[#allocation4 + $0x1f4] sm:$0xf] }
 0x12d   :  { %2530 = vmatpush.bf16.msra.mxu2 %v6574_v13 }
 0x12f   :  { %2505 = vmatpush.bf16.msra.mxu0 %v6438_v8  ;;  %2518 = vmatpush.bf16.msra.mxu1 %v6502_v1  ;;  %v6458_v8 = vor.u32 %v8347_v57, %v6455_v58  ;;  %v6447_v1 = vld [vmem:[#allocation4 + $0x38] sm:$0xf0] }
 0x130   :  { %v6450_v10 = vor.u32 %v8345_v0, %v6447_v1  ;;  %v6559_v57 = vld [vmem:[#allocation4 + $0x118] sm:$0xf0]  ;;  %v6661_v0 = vld [vmem:[#allocation4 + $0x1e0] sm:$0xf]  ;;  %v8400_v1 = vld [vmem:[#allocation4 + $0x1e4] sm:$0xf0] }
 0x131   :  { %2531 = vmatpush.bf16.msra.mxu2 %v6566_v34  ;;  %v6575_v34 = vld [vmem:[#allocation4 + $0x138] sm:$0xf0]  ;;  %v6662_v2 = vor.u32 %v8400_v1, %v6661_v0 }
 0x132   :  { %v6623_v0 = vld [vmem:[#allocation4 + $0x198] sm:$0xf0] }
 0x133   :  { %2506 = vmatpush.bf16.msra.mxu0 %v6430_v12  ;;  %2519 = vmatpush.bf16.msra.mxu1 %v6494_v17  ;;  %v8343_v12 = vld [vmem:[#allocation4 + $0x24] sm:$0xf]  ;;  %v6503_v17 = vld [vmem:[#allocation4 + $0xa8] sm:$0xf0] }
 0x134   :  { %v6442_v4 = vor.u32 %v8343_v12, %v6439_v14  ;;  %v6506_v23 = vor.u32 %v8359_v16, %v6503_v17  ;;  %v6637_v17 = vld [vmem:[#allocation4 + $0x1b0] sm:$0xf] }
 0x135   :  { %2532 = vmatpush.bf16.msra.mxu2 %v6558_v49  ;;  %v6669_v49 = vld [vmem:[#allocation4 + $0x1f0] sm:$0xf] }
 0x136   :  { %v6670_v54 = vor.u32 %v8402_v52, %v6669_v49 }
 0x137   :  { %2507 = vmatpush.bf16.msra.mxu0 %v6422_v30  ;;  %2520 = vmatpush.bf16.msra.mxu1 %v6486_v32  ;;  %v1903_v3 = vpop.f32.mrf.mxu0  ;;  %v9098_v6 = vpop.f32.mrf.mxu1  ;;  %v6583_v32 = vld [vmem:[#allocation4 + $0x148] sm:$0xf0] }
 0x138   :  { %2539 = vmatpush.bf16.msra.mxu3 %v6670_v54 }
 0x139   :  { %2533 = vmatpush.bf16.msra.mxu2 %v6550_v59 }
 0x13a   :  { %2508 = vmatmul.bf16.vlgmr.msra.gmra.mxu0 %v9094_v43  ;;  %2521 = vmatmul.bf16.vlgmr.msra.gmra.mxu1 %v9092_v42 }
 0x13b   :  { %2552 = vmatpush.bf16.msrb.mxu0 %v6482_v37  ;;  %2565 = vmatpush.bf16.msrb.mxu1 %v6546_v36  ;;  %v6586_v37 = vor.u32 %v8379_v31, %v6583_v32  ;;  %v9103_v36 = vld [vmem:[%s9297_s2] sm:$0xf]  ;;  %v8390_v31 = vld [vmem:[#allocation4 + $0x194] sm:$0xf0] }
 0x13c   :  { %v400_v28 = vperm.slane %v9103_v36, 2  ;;  %2540 = vmatpush.bf16.msra.mxu3 %v6662_v2 }
 0x13d   :  { %2578 = vmatpush.bf16.msrb.mxu2 %v6610_v62 }
 0x13e   :  { %v1904_v50 = vadd.f32 %v1903_v3, %v400_v28  ;;  %v6653_v3 = vld [vmem:[#allocation4 + $0x1d0] sm:$0xf] }
 0x13f   :  { %2553 = vmatpush.bf16.msrb.mxu0 %v6474_v48  ;;  %2566 = vmatpush.bf16.msrb.mxu1 %v6538_v45  ;;  %v1942_v21 = vpop.f32.mrf.mxu3  ;;  %v1905_v13 = vpop.f32.mrf.mxu0  ;;  %v8355_v48 = vld [vmem:[#allocation4 + $0x84] sm:$0xf]  ;;  %v6578_v45 = vor.u32 %v8377_v40, %v6575_v34  ;;  %v6663_v34 = vld [vmem:[#allocation4 + $0x1e8] sm:$0xf0] }
 0x140   :  { %v1929_v18 = vpop.f32.mrf.mxu2  ;;  %v1918_v30 = vpop.f32.mrf.mxu1  ;;  %v6490_v53 = vor.u32 %v8355_v48, %v6487_v38  ;;  %v1917_v58 = vadd.f32 %v9098_v6, %v1904_v50  ;;  %v8399_v40 = vld [vmem:[#allocation4 + $0x1e4] sm:$0xf] }
 0x141   :  { %2579 = vmatpush.bf16.msrb.mxu2 %v6602_v5  ;;  %v6654_v5 = vor.u32 %v8398_v9, %v6653_v3  ;;  %v6621_v30 = vld [vmem:[#allocation4 + $0x190] sm:$0xf]  ;;  %v6666_v38 = vor.u32 %v8399_v40, %v6663_v34  ;;  %v8395_v50 = vld [vmem:[#allocation4 + $0x1c4] sm:$0xf]  ;;  %v6615_v9 = vld [vmem:[#allocation4 + $0x188] sm:$0xf0] }
 0x142   :  { %v1930_v62 = vadd.f32 %v1929_v18, %v1917_v58  ;;  %v8394_v18 = vld [vmem:[#allocation4 + $0x1b4] sm:$0xf0]  ;;  %v6622_v32 = vor.u32 %v8390_v31, %v6621_v30  ;;  %v8387_v3 = vld [vmem:[#allocation4 + $0x184] sm:$0xf]  ;;  %v8409_v34 = vld [vmem:[%s9300_s5 + $0x30] sm:$0xff] }
 0x143   :  { %2554 = vmatpush.bf16.msrb.mxu0 %v6466_v55  ;;  %2567 = vmatpush.bf16.msrb.mxu1 %v6530_v56  ;;  %v6570_v55 = vor.u32 %v8375_v33, %v6567_v47  ;;  %v8373_v56 = vld [vmem:[#allocation4 + $0x114] sm:$0xf]  ;;  %v8418_v40 = vld [vmem:[%s9300_s5 + $0x78] sm:$0xff] }
 0x144   :  { %v6562_v59 = vor.u32 %v8373_v56, %v6559_v57  ;;  %2541 = vmatpush.bf16.msra.mxu3 %v6654_v5  ;;  %v6639_v56 = vld [vmem:[#allocation4 + $0x1b8] sm:$0xf0]  ;;  %v401_v57 = vperm.slane %v9103_v36, 3 }
 0x145   :  { %2580 = vmatpush.bf16.msrb.mxu2 %v6594_v22  ;;  %v6638_v22 = vor.u32 %v8394_v18, %v6637_v17 }
 0x147   :  { %2555 = vmatpush.bf16.msrb.mxu0 %v6458_v8  ;;  %2568 = vmatpush.bf16.msrb.mxu1 %v6522_v63  ;;  %v1944_v46 = vpop.f32.mrf.mxu3  ;;  %v6554_v8 = vor.u32 %v8371_v60, %v6551_v61  ;;  %v1943_v63 = vadd.f32 %v1942_v21, %v1930_v62  ;;  %v6631_v60 = vld [vmem:[#allocation4 + $0x1a8] sm:$0xf0] }
 0x148   :  { %v1931_v44 = vpop.f32.mrf.mxu2  ;;  %v6655_v46 = vld [vmem:[#allocation4 + $0x1d8] sm:$0xf0] }
 0x149   :  { %2581 = vmatpush.bf16.msrb.mxu2 %v6586_v37  ;;  %v6613_v37 = vld [vmem:[#allocation4 + $0x180] sm:$0xf] }
 0x14b   :  { %2556 = vmatpush.bf16.msrb.mxu0 %v6450_v10  ;;  %2569 = vmatpush.bf16.msrb.mxu1 %v6514_v11  ;;  %v6645_v10 = vld [vmem:[#allocation4 + $0x1c0] sm:$0xf]  ;;  %v8396_v11 = vld [vmem:[#allocation4 + $0x1c4] sm:$0xf0] }
 0x14d   :  { %2582 = vmatpush.bf16.msrb.mxu2 %v6578_v45  ;;  %v8397_v45 = vld [vmem:[#allocation4 + $0x1d4] sm:$0xf] }
 0x14e   :  { %v6658_v33 = vor.u32 %v8397_v45, %v6655_v46  ;;  %v8407_v45 = vld [vmem:[%s9300_s5 + $0x20] sm:$0xff]  ;;  %v8406_v46 = vld [vmem:[%s9300_s5 + $0x18] sm:$0xff] }
 0x14f   :  { %2557 = vmatpush.bf16.msrb.mxu0 %v6442_v4  ;;  %2570 = vmatpush.bf16.msrb.mxu1 %v6506_v23  ;;  %v6629_v23 = vld [vmem:[#allocation4 + $0x1a0] sm:$0xf] }
 0x150   :  { %v6630_v13 = vor.u32 %v8392_v24, %v6629_v23 }
 0x151   :  { %2583 = vmatpush.bf16.msrb.mxu2 %v6570_v55  ;;  %v8393_v55 = vld [vmem:[#allocation4 + $0x1b4] sm:$0xf] }
 0x152   :  { %v6642_v58 = vor.u32 %v8393_v55, %v6639_v56  ;;  %v8414_v55 = vld [vmem:[%s9300_s5 + $0x58] sm:$0xff]  ;;  %v8413_v56 = vld [vmem:[%s9300_s5 + $0x50] sm:$0xff] }
 0x153   :  { %2558 = vmatpush.bf16.msrb.mxu0 %v6434_v35  ;;  %2571 = vmatpush.bf16.msrb.mxu1 %v6498_v39  ;;  %v8388_v35 = vld [vmem:[#allocation4 + $0x184] sm:$0xf0]  ;;  %v6671_v39 = vld [vmem:[#allocation4 + $0x1f8] sm:$0xf0] }
 0x154   :  { %v6614_v28 = vor.u32 %v8388_v35, %v6613_v37  ;;  %v6674_v41 = vor.u32 %v8401_v7, %v6671_v39 }
 0x155   :  { %2584 = vmatpush.bf16.msrb.mxu2 %v6562_v59  ;;  %v8391_v59 = vld [vmem:[#allocation4 + $0x1a4] sm:$0xf] }
 0x157   :  { %2559 = vmatpush.bf16.msrb.mxu0 %v6426_v51  ;;  %2572 = vmatpush.bf16.msrb.mxu1 %v6490_v53  ;;  %v1955_v6 = vpop.f32.mrf.mxu0  ;;  %v1968_v25 = vpop.f32.mrf.mxu1  ;;  %v6647_v51 = vld [vmem:[#allocation4 + $0x1c8] sm:$0xf0] }
 0x158   :  { %v1956_v15 = vadd.f32 %v1955_v6, %v1943_v63  ;;  %v6650_v53 = vor.u32 %v8395_v50, %v6647_v51  ;;  %v8389_v63 = vld [vmem:[#allocation4 + $0x194] sm:$0xf]  ;;  %v8404_v51 = vld [vmem:[%s9300_s5 + $0x8] sm:$0xff] }
 0x159   :  { %2585 = vmatpush.bf16.msrb.mxu2 %v6554_v8  ;;  %v6634_v8 = vor.u32 %v8391_v59, %v6631_v60  ;;  %v6626_v2 = vor.u32 %v8389_v63, %v6623_v0  ;;  %v6797_v59 = vld [vmem:[#allocation6 + $0x70] sm:$0xf]  ;;  %v8434_v60 = vld [vmem:[#allocation6 + $0x74] sm:$0xf0]  ;;  %v6789_v63 = vld [vmem:[#allocation6 + $0x60] sm:$0xf] }
 0x15a   :  { %2560 = vmatmul.bf16.vlgmr.msrb.gmra.mxu0 %v9094_v43  ;;  %2573 = vmatmul.bf16.vlgmr.msrb.gmra.mxu1 %v9092_v42  ;;  %v1969_v43 = vadd.f32 %v1968_v25, %v1956_v15  ;;  %v6646_v42 = vor.u32 %v8396_v11, %v6645_v10  ;;  %v6618_v15 = vor.u32 %v8387_v3, %v6615_v9  ;;  %v8432_v0 = vld [vmem:[#allocation6 + $0x64] sm:$0xf0]  ;;  %v6791_v3 = vld [vmem:[#allocation6 + $0x68] sm:$0xf0] }
 0x15b   :  { %2753 = vmatpush.bf16.msra.mxu1 %v8418_v40  ;;  %v6790_v9 = vor.u32 %v8432_v0, %v6789_v63  ;;  %v8495_v63 = vld [vmem:[#allocation7 + $0x1e4] sm:$0xf]  ;;  %v7047_v0 = vld [vmem:[#allocation7 + $0x1f0] sm:$0xf0] }
 0x15c   :  { %2542 = vmatpush.bf16.msra.mxu3 %v6646_v42 }
 0x15f   :  { %v1994_v16 = vpop.f32.mrf.mxu3  ;;  %v1957_v20 = vpop.f32.mrf.mxu0 }
 0x160   :  { %v1981_v12 = vpop.f32.mrf.mxu2  ;;  %v1970_v21 = vpop.f32.mrf.mxu1  ;;  %2543 = vmatpush.bf16.msra.mxu3 %v6638_v22 }
 0x161   :  { %v1982_v14 = vadd.f32 %v1981_v12, %v1969_v43 }
 0x163   :  { %v1995_v19 = vadd.f32 %v1994_v16, %v1982_v14 }
 0x164   :  { %2544 = vmatpush.bf16.msra.mxu3 %v6630_v13 }
 0x165   :  { %v2104_v4 = vmax.f32 %v1995_v19, 0.0 }
 0x167   :  { %v2108_v26 = vpack.c.bf16 %v2104_v4, %v2104_v4  ;;  %v1996_v29 = vpop.f32.mrf.mxu3  ;;  %v2174_v4 = vld [vmem:[%s9299_s4] sm:$0x3] }
 0x168   :  { %v1983_v27 = vpop.f32.mrf.mxu2  ;;  %2545 = vmatpush.bf16.msra.mxu3 %v6622_v32  ;;  %v2176_v23 = vperm.slane %v2174_v4, 0  ;;  %v2177_v31 = vperm.slane %v2174_v4, 1 }
 0x169   :  { %2534 = vmatmul.bf16.vlgmr.msra.gmra.mxu2 %v2108_v26 }
 0x16c   :  { %2546 = vmatpush.bf16.msra.mxu3 %v6614_v28 }
 0x170   :  { %2591 = vmatpush.bf16.msrb.mxu3 %v6674_v41  ;;  %v8410_v41 = vld [vmem:[%s9300_s5 + $0x38] sm:$0xff] }
 0x171   :  { %2740 = vmatpush.bf16.msra.mxu0 %v8410_v41  ;;  %v8423_v41 = vld [vmem:[#allocation6 + $0x24] sm:$0xf] }
 0x174   :  { %2592 = vmatpush.bf16.msrb.mxu3 %v6666_v38  ;;  %v8408_v38 = vld [vmem:[%s9300_s5 + $0x28] sm:$0xff] }
 0x175   :  { %2741 = vmatpush.bf16.msra.mxu0 %v8409_v34  ;;  %v6759_v34 = vld [vmem:[#allocation6 + $0x28] sm:$0xf0] }
 0x177   :  { %v2007_v48 = vpop.f32.mrf.mxu0  ;;  %v2020_v44 = vpop.f32.mrf.mxu1 }
 0x178   :  { %2593 = vmatpush.bf16.msrb.mxu3 %v6658_v33  ;;  %v2008_v1 = vadd.f32 %v2007_v48, %v401_v57  ;;  %v8417_v48 = vld [vmem:[%s9300_s5 + $0x70] sm:$0xff]  ;;  %v8412_v57 = vld [vmem:[%s9300_s5 + $0x48] sm:$0xff] }
 0x179   :  { %2586 = vmatmul.bf16.vlgmr.msrb.gmra.mxu2 %v2108_v26  ;;  %2754 = vmatpush.bf16.msra.mxu1 %v8417_v48  ;;  %v6749_v48 = vld [vmem:[#allocation6 + $0x10] sm:$0xf] }
 0x17a   :  { %v2021_v6 = vadd.f32 %v2020_v44, %v2008_v1  ;;  %2742 = vmatpush.bf16.msra.mxu0 %v8408_v38  ;;  %v8422_v38 = vld [vmem:[#allocation6 + $0x14] sm:$0xf0] }
 0x17c   :  { %2594 = vmatpush.bf16.msrb.mxu3 %v6650_v53  ;;  %v8403_v53 = vld [vmem:[%s9300_s5] sm:$0xff] }
 0x17e   :  { %2743 = vmatpush.bf16.msra.mxu0 %v8407_v45  ;;  %v8421_v45 = vld [vmem:[#allocation6 + $0x14] sm:$0xf] }
 0x17f   :  { %v2046_v49 = vpop.f32.mrf.mxu3  ;;  %v2009_v52 = vpop.f32.mrf.mxu0 }
 0x180   :  { %v2033_v47 = vpop.f32.mrf.mxu2  ;;  %v2022_v54 = vpop.f32.mrf.mxu1  ;;  %2595 = vmatpush.bf16.msrb.mxu3 %v6642_v58  ;;  %v8416_v52 = vld [vmem:[%s9300_s5 + $0x68] sm:$0xff]  ;;  %v8411_v58 = vld [vmem:[%s9300_s5 + $0x40] sm:$0xff] }
 0x181   :  { %v2034_v25 = vadd.f32 %v2033_v47, %v2021_v6  ;;  %v8405_v47 = vld [vmem:[%s9300_s5 + $0x10] sm:$0xff]  ;;  %2755 = vmatpush.bf16.msra.mxu1 %v8416_v52  ;;  %v8415_v54 = vld [vmem:[%s9300_s5 + $0x60] sm:$0xff] }
 0x182   :  { %2744 = vmatpush.bf16.msra.mxu0 %v8406_v46  ;;  %v6751_v46 = vld [vmem:[#allocation6 + $0x18] sm:$0xf0] }
 0x183   :  { %v2047_v36 = vadd.f32 %v2046_v49, %v2034_v25  ;;  %v8430_v25 = vld [vmem:[#allocation6 + $0x54] sm:$0xf0] }
 0x184   :  { %2596 = vmatpush.bf16.msrb.mxu3 %v6634_v8  ;;  %v6799_v8 = vld [vmem:[#allocation6 + $0x78] sm:$0xf0] }
 0x185   :  { %2756 = vmatpush.bf16.msra.mxu1 %v8415_v54 }
 0x186   :  { %2745 = vmatpush.bf16.msra.mxu0 %v8405_v47  ;;  %v6754_v47 = vor.u32 %v8421_v45, %v6751_v46  ;;  %v6855_v45 = vld [vmem:[#allocation7 + $0x70] sm:$0xf0]  ;;  %v8479_v46 = vld [vmem:[#allocation7 + $0x164] sm:$0xf] }
 0x187   :  { %v2048_v62 = vpop.f32.mrf.mxu3 }
 0x188   :  { %v2035_v61 = vpop.f32.mrf.mxu2  ;;  %2597 = vmatpush.bf16.msrb.mxu3 %v6626_v2  ;;  %v6798_v62 = vor.u32 %v8434_v60, %v6797_v59  ;;  %v8431_v2 = vld [vmem:[#allocation6 + $0x64] sm:$0xf]  ;;  %v8497_v59 = vld [vmem:[#allocation7 + $0x1ec] sm:$0xf0] }
 0x189   :  { %2757 = vmatpush.bf16.msra.mxu1 %v8414_v55  ;;  %v8433_v61 = vld [vmem:[#allocation6 + $0x74] sm:$0xf]  ;;  %v6794_v6 = vor.u32 %v8431_v2, %v6791_v3  ;;  %v6917_v55 = vld [vmem:[#allocation7 + $0xe0] sm:$0xf]  ;;  %v8463_v60 = vld [vmem:[#allocation7 + $0xe4] sm:$0xf]  ;;  %v7050_v2 = vor.u32 %v8495_v63, %v7047_v0 }
 0x18a   :  { %2746 = vmatpush.bf16.msra.mxu0 %v8404_v51  ;;  %v6802_v1 = vor.u32 %v8433_v61, %v6799_v8  ;;  %2870 = vmatpush.bf16.msra.mxu2 %v6798_v62  ;;  %v8419_v51 = vld [vmem:[#allocation6 + $0x4] sm:$0xf]  ;;  %v6919_v61 = vld [vmem:[#allocation7 + $0xf0] sm:$0xf0]  ;;  %v8461_v3 = vld [vmem:[#allocation7 + $0xcc] sm:$0xf0] }
 0x18b   :  { %v6922_v8 = vor.u32 %v8463_v60, %v6919_v61  ;;  %v6967_v60 = vld [vmem:[#allocation7 + $0x150] sm:$0xf0]  ;;  %v8766_v61 = vld [vmem:[%s9301_s6] ss:$0 sm:$0xff] }
 0x18c   :  { %2598 = vmatpush.bf16.msrb.mxu3 %v6618_v15  ;;  %v6781_v15 = vld [vmem:[#allocation6 + $0x50] sm:$0xf]  ;;  %v6821_v0 = vld [vmem:[#allocation7 + $0x20] sm:$0xf] }
 0x18d   :  { %2758 = vmatpush.bf16.msra.mxu1 %v8413_v56  ;;  %v8465_v56 = vld [vmem:[#allocation7 + $0xec] sm:$0xf0] }
 0x18e   :  { %2747 = vmatpush.bf16.msra.mxu0 %v8403_v53  ;;  %2871 = vmatpush.bf16.msra.mxu2 %v6790_v9  ;;  %v6743_v53 = vld [vmem:[#allocation6 + $0x8] sm:$0xf0]  ;;  %v7029_v9 = vld [vmem:[#allocation7 + $0x1c0] sm:$0xf] }
 0x18f   :  { %v6746_v54 = vor.u32 %v8419_v51, %v6743_v53  ;;  %v8445_v53 = vld [vmem:[#allocation7 + $0x4c] sm:$0xf0] }
 0x191   :  { %2759 = vmatpush.bf16.msra.mxu1 %v8412_v57  ;;  %v7045_v57 = vld [vmem:[#allocation7 + $0x1e0] sm:$0xf] }
 0x192   :  { %v7046_v62 = vor.u32 %v8497_v59, %v7045_v57  ;;  %v8443_v57 = vld [vmem:[#allocation7 + $0x44] sm:$0xf] }
 0x193   :  { %v8475_v59 = vld [vmem:[#allocation7 + $0x144] sm:$0xf] }
 0x195   :  { %2760 = vmatpush.bf16.msra.mxu1 %v8411_v58  ;;  %v6918_v58 = vor.u32 %v8465_v56, %v6917_v55  ;;  %v8477_v56 = vld [vmem:[#allocation7 + $0x14c] sm:$0xf0] }
 0x197   :  { %v2059_v5 = vpop.f32.mrf.mxu0  ;;  %v2072_v43 = vpop.f32.mrf.mxu1  ;;  %3294 = vmatpush.bf16.msrb.mxu0 %v6918_v58  ;;  %v6839_v58 = vld [vmem:[#allocation7 + $0x50] sm:$0xf0] }
 0x198   :  { %v2060_v10 = vadd.f32 %v2059_v5, %v2047_v36  ;;  %v8429_v36 = vld [vmem:[#allocation6 + $0x54] sm:$0xf]  ;;  %v6783_v5 = vld [vmem:[#allocation6 + $0x58] sm:$0xf0]  ;;  %v6842_v63 = vor.u32 %v8443_v57, %v6839_v58  ;;  %v7021_v57 = vld [vmem:[#allocation7 + $0x1a8] sm:$0xf] }
 0x199   :  { %3307 = vmatpush.bf16.msrb.mxu1 %v7046_v62 }
 0x19a   :  { %v2073_v11 = vadd.f32 %v2072_v43, %v2060_v10  ;;  %v6782_v10 = vor.u32 %v8430_v25, %v6781_v15 }
 0x19c   :  { %2872 = vmatpush.bf16.msra.mxu2 %v6782_v10 }
 0x19f   :  { %v2085_v12 = vpop.f32.mrf.mxu2  ;;  %v2098_v14 = vpop.f32.mrf.mxu3 }
 0x1a0   :  { %v2086_v42 = vadd.f32 %v2085_v12, %v2073_v11  ;;  %v2061_v16 = vpop.f32.mrf.mxu0  ;;  %v2074_v17 = vpop.f32.mrf.mxu1  ;;  %v6786_v12 = vor.u32 %v8429_v36, %v6783_v5  ;;  %v8459_v36 = vld [vmem:[#allocation7 + $0xc4] sm:$0xf]  ;;  %v6903_v5 = vld [vmem:[#allocation7 + $0xd0] sm:$0xf0] }
 0x1a1   :  { %v6906_v10 = vor.u32 %v8459_v36, %v6903_v5 }
 0x1a2   :  { %v2099_v18 = vadd.f32 %v2098_v14, %v2086_v42 }
 0x1a4   :  { %v2105_v19 = vmax.f32 %v2099_v18, 0.0 }
 0x1a6   :  { %v2109_v20 = vpack.c.bf16 %v2105_v19, %v2105_v19 }
 0x1a7   :  { %v2087_v21 = vpop.f32.mrf.mxu2  ;;  %v2100_v22 = vpop.f32.mrf.mxu3 }
 0x1a8   :  { %2547 = vmatmul.bf16.vlgmr.msra.gmra.mxu3 %v2109_v20 }
 0x1a9   :  { %2883 = vmatpush.bf16.msra.mxu3 %v6802_v1  ;;  %v6901_v1 = vld [vmem:[#allocation7 + $0xc0] sm:$0xf] }
 0x1aa   :  { %v6902_v15 = vor.u32 %v8461_v3, %v6901_v1  ;;  %v8441_v1 = vld [vmem:[#allocation7 + $0x2c] sm:$0xf0]  ;;  %v6970_v3 = vor.u32 %v8475_v59, %v6967_v60  ;;  %v8490_v59 = vld [vmem:[#allocation7 + $0x1b4] sm:$0xf0]  ;;  %v8456_v60 = vld [vmem:[#allocation7 + $0xac] sm:$0xf] }
 0x1ab   :  { %v6822_v5 = vor.u32 %v8441_v1, %v6821_v0  ;;  %v7023_v0 = vld [vmem:[#allocation7 + $0x1b8] sm:$0xf0] }
 0x1ac   :  { %3295 = vmatpush.bf16.msrb.mxu0 %v6902_v15  ;;  %v6823_v15 = vld [vmem:[#allocation7 + $0x30] sm:$0xf0] }
 0x1ad   :  { %2884 = vmatpush.bf16.msra.mxu3 %v6794_v6  ;;  %v8493_v6 = vld [vmem:[#allocation7 + $0x1cc] sm:$0xf0] }
 0x1ae   :  { %v7030_v25 = vor.u32 %v8493_v6, %v7029_v9  ;;  %v8473_v9 = vld [vmem:[#allocation7 + $0x12c] sm:$0xf0]  ;;  %v8439_v6 = vld [vmem:[#allocation7 + $0x24] sm:$0xf] }
 0x1b0   :  { %3308 = vmatpush.bf16.msrb.mxu1 %v7030_v25  ;;  %v8471_v25 = vld [vmem:[#allocation7 + $0x124] sm:$0xf] }
 0x1b1   :  { %2885 = vmatpush.bf16.msra.mxu3 %v6786_v12  ;;  %v6885_v12 = vld [vmem:[#allocation7 + $0xa0] sm:$0xf] }
 0x1b7   :  { %v2509_v24 = vpop.f32.mrf.mxu0  ;;  %v2522_v27 = vpop.f32.mrf.mxu1 }
 0x1b8   :  { %v2510_v26 = vadd.f32 %v2509_v24, %v2176_v23  ;;  %2599 = vmatmul.bf16.vlgmr.msrb.gmra.mxu3 %v2109_v20  ;;  %v6773_v23 = vld [vmem:[#allocation6 + $0x40] sm:$0xf]  ;;  %v8428_v24 = vld [vmem:[#allocation6 + $0x44] sm:$0xf0] }
 0x1ba   :  { %v9113_v13 = vadd.f32 %v2522_v27, %v2510_v26  ;;  %v8427_v26 = vld [vmem:[#allocation6 + $0x44] sm:$0xf]  ;;  %v6774_v27 = vor.u32 %v8428_v24, %v6773_v23 }
 0x1bc   :  { %2873 = vmatpush.bf16.msra.mxu2 %v6774_v27  ;;  %v8453_v27 = vld [vmem:[#allocation7 + $0x8c] sm:$0xf0] }
 0x1bf   :  { %v2511_v29 = vpop.f32.mrf.mxu0  ;;  %v2524_v30 = vpop.f32.mrf.mxu1 }
 0x1c0   :  { %v6765_v29 = vld [vmem:[#allocation6 + $0x30] sm:$0xf]  ;;  %v8426_v30 = vld [vmem:[#allocation6 + $0x34] sm:$0xf0] }
 0x1d7   :  { %v2561_v32 = vpop.f32.mrf.mxu0  ;;  %v2574_v35 = vpop.f32.mrf.mxu1 }
 0x1d8   :  { %v2562_v37 = vadd.f32 %v2561_v32, %v2177_v31  ;;  %v8425_v32 = vld [vmem:[#allocation6 + $0x34] sm:$0xf] }
 0x1da   :  { %v9115_v28 = vadd.f32 %v2574_v35, %v2562_v37  ;;  %v6767_v37 = vld [vmem:[#allocation6 + $0x38] sm:$0xf0]  ;;  %v6766_v35 = vor.u32 %v8426_v30, %v6765_v29  ;;  %v8485_v30 = vld [vmem:[#allocation7 + $0x18c] sm:$0xf0] }
 0x1dc   :  { %2874 = vmatpush.bf16.msra.mxu2 %v6766_v35  ;;  %v6999_v35 = vld [vmem:[#allocation7 + $0x190] sm:$0xf0] }
 0x1df   :  { %v2563_v7 = vpop.f32.mrf.mxu0  ;;  %v2576_v39 = vpop.f32.mrf.mxu1 }
 0x1e0   :  { %v6757_v7 = vld [vmem:[#allocation6 + $0x20] sm:$0xf]  ;;  %v8424_v39 = vld [vmem:[#allocation6 + $0x24] sm:$0xf0] }
 0x1e1   :  { %v6758_v40 = vor.u32 %v8424_v39, %v6757_v7 }
 0x1e3   :  { %2875 = vmatpush.bf16.msra.mxu2 %v6758_v40  ;;  %v8449_v40 = vld [vmem:[#allocation7 + $0x6c] sm:$0xf0] }
 0x1ec   :  { %v2535_v44 = vpop.f32.mrf.mxu2 }
 0x1ed   :  { %v2536_v43 = vadd.f32 %v2535_v44, %v9113_v13  ;;  %v6775_v13 = vld [vmem:[#allocation6 + $0x48] sm:$0xf0]  ;;  %v6762_v44 = vor.u32 %v8423_v41, %v6759_v34  ;;  %v6853_v41 = vld [vmem:[#allocation7 + $0x60] sm:$0xf] }
 0x1ee   :  { %v6778_v31 = vor.u32 %v8427_v26, %v6775_v13  ;;  %v6869_v26 = vld [vmem:[#allocation7 + $0x80] sm:$0xf] }
 0x1ef   :  { %v6997_v13 = vld [vmem:[#allocation7 + $0x180] sm:$0xf] }
 0x1f0   :  { %2886 = vmatpush.bf16.msra.mxu3 %v6778_v31  ;;  %v8451_v31 = vld [vmem:[#allocation7 + $0x84] sm:$0xf]  ;;  %v6998_v7 = vor.u32 %v8485_v30, %v6997_v13  ;;  %v6981_v34 = vld [vmem:[#allocation7 + $0x160] sm:$0xf]  ;;  %v8464_v30 = vld [vmem:[#allocation7 + $0xec] sm:$0xf] }
 0x1f4   :  { %v2537_v33 = vpop.f32.mrf.mxu2 }
 0x1f5   :  { %v6750_v33 = vor.u32 %v8422_v38, %v6749_v48  ;;  %v8481_v38 = vld [vmem:[#allocation7 + $0x16c] sm:$0xf0] }
 0x1f7   :  { %2876 = vmatpush.bf16.msra.mxu2 %v6750_v33  ;;  %v6983_v33 = vld [vmem:[#allocation7 + $0x170] sm:$0xf0] }
 0x1f8   :  { %v6986_v55 = vor.u32 %v8479_v46, %v6983_v33  ;;  %v8460_v46 = vld [vmem:[#allocation7 + $0xcc] sm:$0xf]  ;;  %v6911_v33 = vld [vmem:[#allocation7 + $0xd8] sm:$0xf0] }
 0x1fc   :  { %v2587_v49 = vpop.f32.mrf.mxu2 }
 0x1fd   :  { %v2588_v18 = vadd.f32 %v2587_v49, %v9115_v28  ;;  %v6770_v28 = vor.u32 %v8425_v32, %v6767_v37  ;;  %v6741_v49 = vld [vmem:[#allocation6] sm:$0xf]  ;;  %v6871_v32 = vld [vmem:[#allocation7 + $0x90] sm:$0xf0]  ;;  %v8483_v37 = vld [vmem:[#allocation7 + $0x184] sm:$0xf] }
 0x1fe   :  { %v6874_v39 = vor.u32 %v8451_v31, %v6871_v32  ;;  %v7002_v48 = vor.u32 %v8483_v37, %v6999_v35  ;;  %v6927_v31 = vld [vmem:[#allocation7 + $0xf8] sm:$0xf0]  ;;  %v8496_v35 = vld [vmem:[#allocation7 + $0x1ec] sm:$0xf] }
 0x1ff   :  { %2887 = vmatpush.bf16.msra.mxu3 %v6770_v28  ;;  %v6870_v28 = vor.u32 %v8453_v27, %v6869_v26  ;;  %v8498_v26 = vld [vmem:[#allocation7 + $0x1f4] sm:$0xf0] }
 0x203   :  { %2888 = vmatpush.bf16.msra.mxu3 %v6762_v44  ;;  %v8447_v44 = vld [vmem:[#allocation7 + $0x64] sm:$0xf] }
 0x204   :  { %v2589_v50 = vpop.f32.mrf.mxu2  ;;  %v6858_v51 = vor.u32 %v8447_v44, %v6855_v45  ;;  %v8494_v44 = vld [vmem:[#allocation7 + $0x1d4] sm:$0xf0] }
 0x205   :  { %v8420_v50 = vld [vmem:[#allocation6 + $0x4] sm:$0xf0] }
 0x206   :  { %v6742_v52 = vor.u32 %v8420_v50, %v6741_v49  ;;  %v6982_v50 = vor.u32 %v8481_v38, %v6981_v34  ;;  %v6930_v34 = vor.u32 %v8464_v30, %v6927_v31  ;;  %v7037_v38 = vld [vmem:[#allocation7 + $0x1c8] sm:$0xf] }
 0x207   :  { %2889 = vmatpush.bf16.msra.mxu3 %v6754_v47  ;;  %v6854_v47 = vor.u32 %v8449_v40, %v6853_v41  ;;  %v6909_v41 = vld [vmem:[#allocation7 + $0xc8] sm:$0xf] }
 0x208   :  { %2877 = vmatpush.bf16.msra.mxu2 %v6742_v52  ;;  %v6837_v52 = vld [vmem:[#allocation7 + $0x40] sm:$0xf] }
 0x209   :  { %v6838_v62 = vor.u32 %v8445_v53, %v6837_v52  ;;  %v7038_v52 = vor.u32 %v8494_v44, %v7037_v38  ;;  %v6914_v53 = vor.u32 %v8460_v46, %v6911_v33  ;;  %v8440_v38 = vld [vmem:[#allocation7 + $0x2c] sm:$0xf]  ;;  %v6959_v33 = vld [vmem:[#allocation7 + $0x138] sm:$0xf0] }
 0x20a   :  { %v8472_v46 = vld [vmem:[#allocation7 + $0x12c] sm:$0xf] }
 0x20b   :  { %2890 = vmatpush.bf16.msra.mxu3 %v6746_v54  ;;  %v6965_v54 = vld [vmem:[#allocation7 + $0x140] sm:$0xf] }
 0x20c   :  { %3320 = vmatpush.bf16.msrb.mxu2 %v6922_v8  ;;  %v6966_v8 = vor.u32 %v8477_v56, %v6965_v54  ;;  %v8458_v56 = vld [vmem:[#allocation7 + $0xb4] sm:$0xf0] }
 0x20f   :  { %3333 = vmatpush.bf16.msrb.mxu3 %v7050_v2  ;;  %v6949_v2 = vld [vmem:[#allocation7 + $0x120] sm:$0xf] }
 0x210   :  { %3321 = vmatpush.bf16.msrb.mxu2 %v6906_v10  ;;  %v6805_v10 = vld [vmem:[#allocation7] sm:$0xf] }
 0x22b   :  { %v2548_v11 = vpop.f32.mrf.mxu3 }
 0x22c   :  { %v2549_v42 = vadd.f32 %v2548_v11, %v2536_v43  ;;  %v8491_v43 = vld [vmem:[#allocation7 + $0x1c4] sm:$0xf]  ;;  %v7031_v11 = vld [vmem:[#allocation7 + $0x1d0] sm:$0xf0] }
 0x22e   :  { %v2604_v14 = vmax.f32 %v2549_v42, 0.0  ;;  %v8457_v42 = vld [vmem:[#allocation7 + $0xac] sm:$0xf0] }
 0x230   :  { %v2606_v16 = vpack.c.bf16 %v2604_v14, %v2604_v14  ;;  %v7034_v14 = vor.u32 %v8491_v43, %v7031_v11  ;;  %v6951_v43 = vld [vmem:[#allocation7 + $0x130] sm:$0xf0]  ;;  %v8437_v11 = vld [vmem:[#allocation7 + $0xc] sm:$0xf0] }
 0x231   :  { %v6806_v13 = vor.u32 %v8437_v11, %v6805_v10  ;;  %v8484_v10 = vld [vmem:[#allocation7 + $0x18c] sm:$0xf]  ;;  %v7007_v11 = vld [vmem:[#allocation7 + $0x198] sm:$0xf0] }
 0x232   :  { %2748 = vmatmul.bf16.vlgmr.msra.gmra.mxu0 %v2606_v16  ;;  %v7013_v16 = vld [vmem:[#allocation7 + $0x1a0] sm:$0xf]  ;;  %3334 = vmatpush.bf16.msrb.mxu3 %v7034_v14  ;;  %v6826_v14 = vor.u32 %v8439_v6, %v6823_v15  ;;  %v8486_v15 = vld [vmem:[#allocation7 + $0x194] sm:$0xf0] }
 0x233   :  { %v2550_v17 = vpop.f32.mrf.mxu3 }
 0x234   :  { %v8489_v17 = vld [vmem:[#allocation7 + $0x1ac] sm:$0xf0] }
 0x235   :  { %v7014_v23 = vor.u32 %v8489_v17, %v7013_v16  ;;  %v6933_v16 = vld [vmem:[#allocation7 + $0x100] sm:$0xf]  ;;  %v8469_v17 = vld [vmem:[#allocation7 + $0x10c] sm:$0xf0] }
 0x236   :  { %v6934_v32 = vor.u32 %v8469_v17, %v6933_v16  ;;  %v6989_v16 = vld [vmem:[#allocation7 + $0x168] sm:$0xf] }
 0x237   :  { %3309 = vmatpush.bf16.msrb.mxu1 %v7014_v23  ;;  %v6954_v23 = vor.u32 %v8471_v25, %v6951_v43  ;;  %v8452_v25 = vld [vmem:[#allocation7 + $0x8c] sm:$0xf] }
 0x23b   :  { %v2600_v19 = vpop.f32.mrf.mxu3  ;;  %3310 = vmatpush.bf16.msrb.mxu1 %v6998_v7 }
 0x23c   :  { %v2601_v20 = vadd.f32 %v2600_v19, %v2588_v18  ;;  %v8455_v18 = vld [vmem:[#allocation7 + $0xa4] sm:$0xf]  ;;  %v6886_v19 = vor.u32 %v8457_v42, %v6885_v12  ;;  %v6950_v42 = vor.u32 %v8473_v9, %v6949_v2  ;;  %v6877_v2 = vld [vmem:[#allocation7 + $0x88] sm:$0xf] }
 0x23d   :  { %v7005_v9 = vld [vmem:[#allocation7 + $0x188] sm:$0xf] }
 0x23e   :  { %v2605_v21 = vmax.f32 %v2601_v20, 0.0  ;;  %v6887_v20 = vld [vmem:[#allocation7 + $0xb0] sm:$0xf0]  ;;  %3296 = vmatpush.bf16.msrb.mxu0 %v6886_v19 }
 0x23f   :  { %v6890_v24 = vor.u32 %v8455_v18, %v6887_v20  ;;  %3311 = vmatpush.bf16.msrb.mxu1 %v6982_v50  ;;  %v8435_v18 = vld [vmem:[#allocation7 + $0x4] sm:$0xf]  ;;  %v6807_v20 = vld [vmem:[#allocation7 + $0x10] sm:$0xf0]  ;;  %v7039_v50 = vld [vmem:[#allocation7 + $0x1d8] sm:$0xf0] }
 0x240   :  { %v2607_v22 = vpack.c.bf16 %v2605_v21, %v2605_v21  ;;  %v8487_v21 = vld [vmem:[#allocation7 + $0x1a4] sm:$0xf]  ;;  %v6810_v37 = vor.u32 %v8435_v18, %v6807_v20  ;;  %v8482_v18 = vld [vmem:[#allocation7 + $0x174] sm:$0xf0]  ;;  %v6863_v20 = vld [vmem:[#allocation7 + $0x78] sm:$0xf0] }
 0x241   :  { %3322 = vmatpush.bf16.msrb.mxu2 %v6890_v24  ;;  %v7053_v24 = vld [vmem:[#allocation7 + $0x1e8] sm:$0xf] }
 0x242   :  { %2761 = vmatmul.bf16.vlgmr.msra.gmra.mxu1 %v2607_v22  ;;  %v7015_v22 = vld [vmem:[#allocation7 + $0x1b0] sm:$0xf0]  ;;  %3297 = vmatpush.bf16.msrb.mxu0 %v6870_v28  ;;  %v7055_v28 = vld [vmem:[#allocation7 + $0x1f8] sm:$0xf0] }
 0x243   :  { %v2602_v4 = vpop.f32.mrf.mxu3  ;;  %v7018_v29 = vor.u32 %v8487_v21, %v7015_v22  ;;  %3312 = vmatpush.bf16.msrb.mxu1 %v6966_v8  ;;  %v8467_v21 = vld [vmem:[#allocation7 + $0x104] sm:$0xf]  ;;  %v6925_v22 = vld [vmem:[#allocation7 + $0xe8] sm:$0xf]  ;;  %v7058_v45 = vor.u32 %v8496_v35, %v7055_v28  ;;  %v8476_v35 = vld [vmem:[#allocation7 + $0x14c] sm:$0xf] }
 0x245   :  { %3335 = vmatpush.bf16.msrb.mxu3 %v7018_v29  ;;  %3323 = vmatpush.bf16.msrb.mxu2 %v6874_v39  ;;  %v6935_v29 = vld [vmem:[#allocation7 + $0x110] sm:$0xf0]  ;;  %v7054_v39 = vor.u32 %v8498_v26, %v7053_v24  ;;  %v6845_v24 = vld [vmem:[#allocation7 + $0x48] sm:$0xf] }
 0x246   :  { %3298 = vmatpush.bf16.msrb.mxu0 %v6854_v47  ;;  %v6938_v40 = vor.u32 %v8467_v21, %v6935_v29  ;;  %v6990_v21 = vor.u32 %v8482_v18, %v6989_v16  ;;  %v8478_v29 = vld [vmem:[#allocation7 + $0x154] sm:$0xf0]  ;;  %v7253_v18 = vld [vmem:[#allocation9 + $0x180] sm:$0xf] }
 0x247   :  { %3313 = vmatpush.bf16.msrb.mxu1 %v6950_v42  ;;  %v6861_v42 = vld [vmem:[#allocation7 + $0x68] sm:$0xf] }
 0x249   :  { %3336 = vmatpush.bf16.msrb.mxu3 %v7002_v48  ;;  %3324 = vmatpush.bf16.msrb.mxu2 %v6858_v51  ;;  %v8462_v48 = vld [vmem:[#allocation7 + $0xd4] sm:$0xf0] }
 0x24a   :  { %3299 = vmatpush.bf16.msrb.mxu0 %v6838_v62  ;;  %v6910_v51 = vor.u32 %v8462_v48, %v6909_v41  ;;  %v7022_v62 = vor.u32 %v8490_v59, %v7021_v57  ;;  %v8442_v41 = vld [vmem:[#allocation7 + $0x34] sm:$0xf0]  ;;  %v8468_v57 = vld [vmem:[#allocation7 + $0x10c] sm:$0xf] }
 0x24b   :  { %3314 = vmatpush.bf16.msrb.mxu1 %v6934_v32  ;;  %v8444_v32 = vld [vmem:[#allocation7 + $0x4c] sm:$0xf]  ;;  %v8474_v48 = vld [vmem:[#allocation7 + $0x134] sm:$0xf0] }
 0x24d   :  { %3337 = vmatpush.bf16.msrb.mxu3 %v6986_v55  ;;  %3325 = vmatpush.bf16.msrb.mxu2 %v6842_v63  ;;  %v6893_v55 = vld [vmem:[#allocation7 + $0xa8] sm:$0xf]  ;;  %v8488_v63 = vld [vmem:[#allocation7 + $0x1ac] sm:$0xf] }
 0x24e   :  { %3300 = vmatpush.bf16.msrb.mxu0 %v6822_v5  ;;  %v6894_v58 = vor.u32 %v8458_v56, %v6893_v55  ;;  %v7026_v1 = vor.u32 %v8488_v63, %v7023_v0  ;;  %v7006_v5 = vor.u32 %v8486_v15, %v7005_v9  ;;  %v8436_v55 = vld [vmem:[#allocation7 + $0xc] sm:$0xf]  ;;  %v6815_v56 = vld [vmem:[#allocation7 + $0x18] sm:$0xf0]  ;;  %v8559_v15 = vld [vmem:[#allocation9 + $0x1dc] sm:$0xf0] }
 0x24f   :  { %3359 = vmatpush.bf16.msra.mxu1 %v7054_v39  ;;  %v6829_v39 = vld [vmem:[#allocation7 + $0x28] sm:$0xf] }
 0x250   :  { %v6830_v44 = vor.u32 %v8442_v41, %v6829_v39  ;;  %v7733_v41 = vld [vmem:[#allocation9 + $0x540] sm:$0xf] }
 0x251   :  { %3338 = vmatpush.bf16.msrb.mxu3 %v6970_v3  ;;  %3326 = vmatpush.bf16.msrb.mxu2 %v6826_v14  ;;  %v8454_v3 = vld [vmem:[#allocation7 + $0x94] sm:$0xf0] }
 0x252   :  { %3301 = vmatpush.bf16.msrb.mxu0 %v6806_v13  ;;  %v6878_v6 = vor.u32 %v8454_v3, %v6877_v2  ;;  %v8450_v14 = vld [vmem:[#allocation7 + $0x74] sm:$0xf0]  ;;  %v6973_v13 = vld [vmem:[#allocation7 + $0x148] sm:$0xf] }
 0x253   :  { %3360 = vmatpush.bf16.msra.mxu1 %v7038_v52  ;;  %v6862_v17 = vor.u32 %v8450_v14, %v6861_v42  ;;  %v6974_v31 = vor.u32 %v8478_v29, %v6973_v13  ;;  %v6941_v52 = vld [vmem:[#allocation7 + $0x108] sm:$0xf]  ;;  %v8751_v42 = vld [vmem:[#allocation9 + $0x7dc] sm:$0xf0] }
 0x254   :  { %v8743_v13 = vld [vmem:[#allocation9 + $0x79c] sm:$0xf0] }
 0x255   :  { %3339 = vmatpush.bf16.msrb.mxu3 %v6954_v23  ;;  %3327 = vmatpush.bf16.msrb.mxu2 %v6810_v37  ;;  %v8480_v23 = vld [vmem:[#allocation7 + $0x16c] sm:$0xf]  ;;  %v6847_v37 = vld [vmem:[#allocation7 + $0x58] sm:$0xf0] }
 0x256   :  { %v6850_v28 = vor.u32 %v8444_v32, %v6847_v37  ;;  %v7221_v32 = vld [vmem:[#allocation9 + $0x140] sm:$0xf] }
 0x257   :  { %3361 = vmatpush.bf16.msra.mxu1 %v7022_v62  ;;  %v8543_v37 = vld [vmem:[#allocation9 + $0x15c] sm:$0xf0] }
 0x259   :  { %3340 = vmatpush.bf16.msrb.mxu3 %v6938_v40 }
 0x25b   :  { %3362 = vmatpush.bf16.msra.mxu1 %v7006_v5  ;;  %v7797_v5 = vld [vmem:[#allocation9 + $0x5c0] sm:$0xf] }
 0x25f   :  { %3363 = vmatpush.bf16.msra.mxu1 %v6990_v21  ;;  %v7509_v21 = vld [vmem:[#allocation9 + $0x380] sm:$0xf] }
 0x263   :  { %3364 = vmatpush.bf16.msra.mxu1 %v6974_v31 }
 0x2af   :  { %v9167_v4 = vpop.f32.mrf.mxu0 }
 0x2b0   :  { %v2750_v36 = vadd.f32 %v8766_v61, %v9167_v4  ;;  %v8466_v4 = vld [vmem:[#allocation7 + $0xf4] sm:$0xf0]  ;;  %v6895_v61 = vld [vmem:[#allocation7 + $0xb8] sm:$0xf0] }
 0x2b1   :  { %v6926_v7 = vor.u32 %v8466_v4, %v6925_v22  ;;  %v6898_v8 = vor.u32 %v8456_v60, %v6895_v61  ;;  %v6991_v4 = vld [vmem:[#allocation7 + $0x178] sm:$0xf0]  ;;  %v6818_v61 = vor.u32 %v8436_v55, %v6815_v56  ;;  %v8727_v55 = vld [vmem:[#allocation9 + $0x71c] sm:$0xf0] }
 0x2b2   :  { %v6994_v26 = vor.u32 %v8480_v23, %v6991_v4  ;;  %v7765_v4 = vld [vmem:[#allocation9 + $0x580] sm:$0xf] }
 0x2b3   :  { %3346 = vmatpush.bf16.msra.mxu0 %v6926_v7  ;;  %v6975_v7 = vld [vmem:[#allocation7 + $0x158] sm:$0xf0] }
 0x2b4   :  { %v6978_v40 = vor.u32 %v8476_v35, %v6975_v7  ;;  %v8607_v7 = vld [vmem:[#allocation9 + $0x35c] sm:$0xf0] }
 0x2b7   :  { %v2751_v49 = vpop.f32.mrf.mxu0  ;;  %3347 = vmatpush.bf16.msra.mxu0 %v6910_v51  ;;  %v8438_v51 = vld [vmem:[#allocation7 + $0x14] sm:$0xf0] }
 0x2b8   :  { %v8492_v49 = vld [vmem:[#allocation7 + $0x1cc] sm:$0xf] }
 0x2b9   :  { %v7042_v54 = vor.u32 %v8492_v49, %v7039_v50  ;;  %v6813_v50 = vld [vmem:[#allocation7 + $0x8] sm:$0xf] }
 0x2ba   :  { %v6814_v59 = vor.u32 %v8438_v51, %v6813_v50  ;;  %v7701_v51 = vld [vmem:[#allocation9 + $0x500] sm:$0xf] }
 0x2bb   :  { %3348 = vmatpush.bf16.msra.mxu0 %v6894_v58  ;;  %v6943_v58 = vld [vmem:[#allocation7 + $0x118] sm:$0xf0] }
 0x2bc   :  { %v6946_v62 = vor.u32 %v8468_v57, %v6943_v58  ;;  %v7157_v57 = vld [vmem:[#allocation9 + $0xc0] sm:$0xf] }
 0x2bd   :  { %v8527_v58 = vld [vmem:[#allocation9 + $0xdc] sm:$0xf0] }
 0x2bf   :  { %v2762_v12 = vpop.f32.mrf.mxu1  ;;  %3349 = vmatpush.bf16.msra.mxu0 %v6878_v6  ;;  %v7285_v6 = vld [vmem:[#allocation9 + $0x1c0] sm:$0xf] }
 0x2c0   :  { %v2763_v19 = vadd.f32 %v2762_v12, %v2750_v36  ;;  %v6879_v36 = vld [vmem:[#allocation7 + $0x98] sm:$0xf0]  ;;  %v7010_v12 = vor.u32 %v8484_v10, %v7007_v11 }
 0x2c1   :  { %v6882_v43 = vor.u32 %v8452_v25, %v6879_v36  ;;  %v7541_v25 = vld [vmem:[#allocation9 + $0x3c0] sm:$0xf] }
 0x2c2   :  { %2766 = vst [vmem:[%s9309_s14] sm:$0xff] %v2763_v19  ;;  %v2767_v27 = vpack.c.bf16 %v2763_v19, %v2763_v19  ;;  %v8448_v19 = vld [vmem:[#allocation7 + $0x6c] sm:$0xf]  ;;  %v8623_v36 = vld [vmem:[#allocation9 + $0x3dc] sm:$0xf0] }
 0x2c3   :  { %v6866_v22 = vor.u32 %v8448_v19, %v6863_v20  ;;  %3350 = vmatpush.bf16.msra.mxu0 %v6862_v17  ;;  %v7286_v17 = vor.u32 %v8559_v15, %v7285_v6  ;;  %v8551_v19 = vld [vmem:[#allocation9 + $0x19c] sm:$0xf0]  ;;  %v7542_v20 = vor.u32 %v8623_v36, %v7541_v25 }
 0x2c4   :  { %2878 = vmatmul.bf16.vlgmr.msra.gmra.mxu2 %v2767_v27  ;;  %2891 = vmatmul.bf16.vlgmr.msra.gmra.mxu3 %v2767_v27  ;;  %v8446_v27 = vld [vmem:[#allocation7 + $0x54] sm:$0xf0]  ;;  %v7254_v31 = vor.u32 %v8551_v19, %v7253_v18  ;;  %v8519_v6 = vld [vmem:[#allocation9 + $0x9c] sm:$0xf0] }
 0x2c5   :  { %3372 = vmatpush.bf16.msra.mxu2 %v6930_v34  ;;  %3385 = vmatpush.bf16.msra.mxu3 %v7058_v45  ;;  %v6846_v30 = vor.u32 %v8446_v27, %v6845_v24  ;;  %v6957_v34 = vld [vmem:[#allocation7 + $0x128] sm:$0xf]  ;;  %v6831_v45 = vld [vmem:[#allocation7 + $0x38] sm:$0xf0]  ;;  %v8021_v27 = vld [vmem:[#allocation9 + $0x780] sm:$0xf] }
 0x2c6   :  { %v6834_v49 = vor.u32 %v8440_v38, %v6831_v45  ;;  %v8735_v38 = vld [vmem:[#allocation9 + $0x75c] sm:$0xf0] }
 0x2c7   :  { %v2764_v47 = vpop.f32.mrf.mxu1  ;;  %3351 = vmatpush.bf16.msra.mxu0 %v6846_v30  ;;  %v7189_v45 = vld [vmem:[#allocation9 + $0x100] sm:$0xf] }
 0x2c8   :  { %v6958_v47 = vor.u32 %v8474_v48, %v6957_v34  ;;  %v8671_v34 = vld [vmem:[#allocation9 + $0x55c] sm:$0xf0] }
 0x2c9   :  { %3373 = vmatpush.bf16.msra.mxu2 %v6914_v53  ;;  %3386 = vmatpush.bf16.msra.mxu3 %v7042_v54  ;;  %v6962_v53 = vor.u32 %v8472_v46, %v6959_v33  ;;  %v8470_v54 = vld [vmem:[#allocation7 + $0x114] sm:$0xf0]  ;;  %v7989_v48 = vld [vmem:[#allocation9 + $0x740] sm:$0xf]  ;;  %v7734_v50 = vor.u32 %v8671_v34, %v7733_v41  ;;  %v7543_v41 = vld [vmem:[#allocation9 + $0x3e0] sm:$0xf0] }
 0x2ca   :  { %3365 = vmatpush.bf16.msra.mxu1 %v6958_v47  ;;  %v6942_v60 = vor.u32 %v8470_v54, %v6941_v52  ;;  %v8535_v46 = vld [vmem:[#allocation9 + $0x11c] sm:$0xf0]  ;;  %v7990_v52 = vor.u32 %v8735_v38, %v7989_v48 }
 0x2cb   :  { %3352 = vmatpush.bf16.msra.mxu0 %v6830_v44  ;;  %v7222_v44 = vor.u32 %v8543_v37, %v7221_v32  ;;  %v7445_v47 = vld [vmem:[#allocation9 + $0x300] sm:$0xf]  ;;  %v7190_v56 = vor.u32 %v8535_v46, %v7189_v45  ;;  %v7799_v45 = vld [vmem:[#allocation9 + $0x5e0] sm:$0xf0] }
 0x2cc   :  { %v7957_v54 = vld [vmem:[#allocation9 + $0x700] sm:$0xf] }
 0x2cd   :  { %3374 = vmatpush.bf16.msra.mxu2 %v6898_v8  ;;  %3387 = vmatpush.bf16.msra.mxu3 %v7026_v1  ;;  %v2784_v8 = vld [vmem:[%s9303_s8] sm:$0x3] }
 0x2ce   :  { %3366 = vmatpush.bf16.msra.mxu1 %v6942_v60  ;;  %v2786_v63 = vperm.slane %v2784_v8, 0  ;;  %v2787_v0 = vperm.slane %v2784_v8, 1  ;;  %v7413_v60 = vld [vmem:[#allocation9 + $0x2c0] sm:$0xf] }
 0x2cf   :  { %3353 = vmatpush.bf16.msra.mxu0 %v6814_v59  ;;  %v7669_v8 = vld [vmem:[#allocation9 + $0x4c0] sm:$0xf] }
 0x2d0   :  { %v7381_v25 = vld [vmem:[#allocation9 + $0x280] sm:$0xf] }
 0x2d1   :  { %3375 = vmatpush.bf16.msra.mxu2 %v6882_v43  ;;  %3388 = vmatpush.bf16.msra.mxu3 %v7010_v12  ;;  %v8687_v43 = vld [vmem:[#allocation9 + $0x5dc] sm:$0xf0] }
 0x2d2   :  { %v8053_v12 = vld [vmem:[#allocation9 + $0x7c0] sm:$0xf]  ;;  %v7798_v23 = vor.u32 %v8687_v43, %v7797_v5 }
 0x2d3   :  { %v8054_v24 = vor.u32 %v8751_v42, %v8053_v12  ;;  %v8583_v36 = vld [vmem:[#allocation9 + $0x29c] sm:$0xf0] }
 0x2d4   :  { %v7637_v43 = vld [vmem:[#allocation9 + $0x480] sm:$0xf] }
 0x2d5   :  { %3376 = vmatpush.bf16.msra.mxu2 %v6866_v22  ;;  %3389 = vmatpush.bf16.msra.mxu3 %v6994_v26  ;;  %v8615_v22 = vld [vmem:[#allocation9 + $0x39c] sm:$0xf0] }
 0x2d6   :  { %v8679_v26 = vld [vmem:[#allocation9 + $0x59c] sm:$0xf0]  ;;  %v7510_v35 = vor.u32 %v8615_v22, %v7509_v21 }
 0x2d7   :  { %v7766_v39 = vor.u32 %v8679_v26, %v7765_v4  ;;  %v7893_v12 = vld [vmem:[#allocation9 + $0x680] sm:$0xf] }
 0x2d8   :  { %v8711_v42 = vld [vmem:[#allocation9 + $0x69c] sm:$0xf0] }
 0x2d9   :  { %3377 = vmatpush.bf16.msra.mxu2 %v6850_v28  ;;  %3390 = vmatpush.bf16.msra.mxu3 %v6978_v40  ;;  %v7477_v28 = vld [vmem:[#allocation9 + $0x340] sm:$0xf]  ;;  %v8022_v40 = vor.u32 %v8743_v13, %v8021_v27 }
 0x2da   :  { %v7478_v33 = vor.u32 %v8607_v7, %v7477_v28  ;;  %v7093_v18 = vld [vmem:[#allocation9 + $0x40] sm:$0xf]  ;;  %v7287_v7 = vld [vmem:[#allocation9 + $0x1e0] sm:$0xf0] }
 0x2db   :  { %v8511_v19 = vld [vmem:[#allocation9 + $0x5c] sm:$0xf0] }
 0x2dc   :  { %v7349_v21 = vld [vmem:[#allocation9 + $0x240] sm:$0xf] }
 0x2dd   :  { %3378 = vmatpush.bf16.msra.mxu2 %v6834_v49  ;;  %3391 = vmatpush.bf16.msra.mxu3 %v6962_v53  ;;  %v8599_v49 = vld [vmem:[#allocation9 + $0x31c] sm:$0xf0] }
 0x2de   :  { %v8663_v53 = vld [vmem:[#allocation9 + $0x51c] sm:$0xf0]  ;;  %v7446_v59 = vor.u32 %v8599_v49, %v7445_v47  ;;  %v7255_v49 = vld [vmem:[#allocation9 + $0x1a0] sm:$0xf0] }
 0x2df   :  { %v8575_v22 = vld [vmem:[#allocation9 + $0x25c] sm:$0xf0] }
 0x2e0   :  { %v7605_v4 = vld [vmem:[#allocation9 + $0x440] sm:$0xf] }
 0x2e1   :  { %3379 = vmatpush.bf16.msra.mxu2 %v6818_v61  ;;  %3392 = vmatpush.bf16.msra.mxu3 %v6946_v62  ;;  %v8591_v61 = vld [vmem:[#allocation9 + $0x2dc] sm:$0xf0]  ;;  %v7702_v62 = vor.u32 %v8663_v53, %v7701_v51  ;;  %v7511_v51 = vld [vmem:[#allocation9 + $0x3a0] sm:$0xf0] }
 0x2e2   :  { %v7414_v15 = vor.u32 %v8591_v61, %v7413_v60  ;;  %v8639_v26 = vld [vmem:[#allocation9 + $0x45c] sm:$0xf0]  ;;  %v8531_v61 = vld [vmem:[#allocation9 + $0x104] sm:$0xf] }
 0x2e3   :  { %v7861_v27 = vld [vmem:[#allocation9 + $0x640] sm:$0xf] }
 0x2e4   :  { %v8703_v13 = vld [vmem:[#allocation9 + $0x65c] sm:$0xf0] }
 0x2e5   :  { %v7317_v32 = vld [vmem:[#allocation9 + $0x200] sm:$0xf]  ;;  %v7862_v28 = vor.u32 %v8703_v13, %v7861_v27  ;;  %v7735_v27 = vld [vmem:[#allocation9 + $0x560] sm:$0xf0] }
 0x2e6   :  { %v8567_v37 = vld [vmem:[#allocation9 + $0x21c] sm:$0xf0] }
 0x2e7   :  { %v8631_v34 = vld [vmem:[#allocation9 + $0x41c] sm:$0xf0]  ;;  %v7318_v38 = vor.u32 %v8567_v37, %v7317_v32  ;;  %v8499_v37 = vld [vmem:[#allocation9 + $0x4] sm:$0xf] }
 0x347   :  { %v2879_v1 = vpop.f32.mrf.mxu2  ;;  %v2892_v2 = vpop.f32.mrf.mxu3 }
 0x348   :  { %v2880_v3 = vadd.f32 %v2879_v1, %v2786_v63  ;;  %v2893_v9 = vadd.f32 %v2892_v2, %v2787_v0  ;;  %v7958_v63 = vor.u32 %v8727_v55, %v7957_v54  ;;  %v8655_v0 = vld [vmem:[#allocation9 + $0x4dc] sm:$0xf0]  ;;  %v8539_v55 = vld [vmem:[#allocation9 + $0x144] sm:$0xf] }
 0x349   :  { %v7925_v1 = vld [vmem:[#allocation9 + $0x6c0] sm:$0xf]  ;;  %v7670_v5 = vor.u32 %v8655_v0, %v7669_v8  ;;  %v7191_v8 = vld [vmem:[#allocation9 + $0x120] sm:$0xf0] }
 0x34a   :  { %v2896_v10 = vmax.f32 %v2880_v3, 0.0  ;;  %v2897_v11 = vmax.f32 %v2893_v9, 0.0  ;;  %v8719_v2 = vld [vmem:[#allocation9 + $0x6dc] sm:$0xf0]  ;;  %v7158_v3 = vor.u32 %v8527_v58, %v7157_v57  ;;  %v7223_v57 = vld [vmem:[#allocation9 + $0x160] sm:$0xf0] }
 0x34b   :  { %v7125_v9 = vld [vmem:[#allocation9 + $0x80] sm:$0xf]  ;;  %v8603_v58 = vld [vmem:[#allocation9 + $0x344] sm:$0xf]  ;;  %v7226_v60 = vor.u32 %v8539_v55, %v7223_v57 }
 0x34c   :  { %v9179_v14 = vpack.c.bf16 %v2896_v10, %v2896_v10  ;;  %v9181_v16 = vpack.c.bf16 %v2897_v11, %v2897_v11  ;;  %v7926_v10 = vor.u32 %v8719_v2, %v7925_v1  ;;  %v8647_v11 = vld [vmem:[#allocation9 + $0x49c] sm:$0xf0]  ;;  %v7447_v0 = vld [vmem:[#allocation9 + $0x320] sm:$0xf0]  ;;  %v7194_v1 = vor.u32 %v8531_v61, %v7191_v8 }
 0x34d   :  { %v8643_v55 = vld [vmem:[#allocation9 + $0x484] sm:$0xf] }
 0x34e   :  { %3302 = vmatmul.bf16.vlgmr.msrb.gmra.mxu0 %v9179_v14  ;;  %3315 = vmatmul.bf16.vlgmr.msrb.gmra.mxu1 %v9181_v16  ;;  %v8635_v61 = vld [vmem:[#allocation9 + $0x444] sm:$0xf] }
 0x34f   :  { %3328 = vmatmul.bf16.vlgmr.msrb.gmra.mxu2 %v9179_v14  ;;  %3341 = vmatmul.bf16.vlgmr.msrb.gmra.mxu3 %v9181_v16  ;;  %v2881_v29 = vpop.f32.mrf.mxu2  ;;  %v2894_v30 = vpop.f32.mrf.mxu3 }
 0x350   :  { %4960 = vmatpush.bf16.msrb.mxu0 %v7286_v17  ;;  %4973 = vmatpush.bf16.msrb.mxu1 %v7542_v20  ;;  %v7126_v17 = vor.u32 %v8519_v6, %v7125_v9  ;;  %v7382_v20 = vor.u32 %v8583_v36, %v7381_v25  ;;  %v8503_v29 = vld [vmem:[#allocation9 + $0x1c] sm:$0xf0]  ;;  %v7350_v30 = vor.u32 %v8575_v22, %v7349_v21  ;;  %v7159_v9 = vld [vmem:[#allocation9 + $0xe0] sm:$0xf0] }
 0x351   :  { %4986 = vmatpush.bf16.msrb.mxu2 %v7798_v23  ;;  %4999 = vmatpush.bf16.msrb.mxu3 %v8054_v24  ;;  %v7638_v23 = vor.u32 %v8647_v11, %v7637_v43  ;;  %v7894_v24 = vor.u32 %v8711_v42, %v7893_v12  ;;  %v7127_v25 = vld [vmem:[#allocation9 + $0xa0] sm:$0xf0]  ;;  %v8695_v11 = vld [vmem:[#allocation9 + $0x61c] sm:$0xf0] }
 0x352   :  { %v8675_v36 = vld [vmem:[#allocation9 + $0x584] sm:$0xf] }
 0x353   :  { %v7767_v43 = vld [vmem:[#allocation9 + $0x5a0] sm:$0xf0] }
 0x354   :  { %4961 = vmatpush.bf16.msrb.mxu0 %v7254_v31  ;;  %4974 = vmatpush.bf16.msrb.mxu1 %v7510_v35  ;;  %v8555_v31 = vld [vmem:[#allocation9 + $0x1c4] sm:$0xf]  ;;  %v7606_v35 = vor.u32 %v8639_v26, %v7605_v4  ;;  %v7770_v12 = vor.u32 %v8675_v36, %v7767_v43 }
 0x355   :  { %4987 = vmatpush.bf16.msrb.mxu2 %v7766_v39  ;;  %5000 = vmatpush.bf16.msrb.mxu3 %v8022_v40  ;;  %v8619_v39 = vld [vmem:[#allocation9 + $0x3c4] sm:$0xf]  ;;  %v7573_v40 = vld [vmem:[#allocation9 + $0x400] sm:$0xf]  ;;  %v7290_v46 = vor.u32 %v8555_v31, %v7287_v7 }
 0x356   :  { %v7546_v47 = vor.u32 %v8619_v39, %v7543_v41  ;;  %v8055_v21 = vld [vmem:[#allocation9 + $0x7e0] sm:$0xf0] }
 0x357   :  { %v7095_v4 = vld [vmem:[#allocation9 + $0x60] sm:$0xf0] }
 0x358   :  { %4962 = vmatpush.bf16.msrb.mxu0 %v7222_v44  ;;  %4975 = vmatpush.bf16.msrb.mxu1 %v7478_v33  ;;  %v8683_v44 = vld [vmem:[#allocation9 + $0x5c4] sm:$0xf] }
 0x359   :  { %4988 = vmatpush.bf16.msrb.mxu2 %v7734_v50  ;;  %5001 = vmatpush.bf16.msrb.mxu3 %v7990_v52  ;;  %v8547_v33 = vld [vmem:[#allocation9 + $0x184] sm:$0xf]  ;;  %v7574_v52 = vor.u32 %v8631_v34, %v7573_v40  ;;  %v7802_v53 = vor.u32 %v8683_v44, %v7799_v45 }
 0x35a   :  { %v8611_v50 = vld [vmem:[#allocation9 + $0x384] sm:$0xf]  ;;  %v7258_v54 = vor.u32 %v8547_v33, %v7255_v49 }
 0x35b   :  { %v8023_v31 = vld [vmem:[#allocation9 + $0x7a0] sm:$0xf0] }
 0x35c   :  { %4963 = vmatpush.bf16.msrb.mxu0 %v7190_v56  ;;  %4976 = vmatpush.bf16.msrb.mxu1 %v7446_v59  ;;  %v7514_v56 = vor.u32 %v8611_v50, %v7511_v51  ;;  %v7479_v59 = vld [vmem:[#allocation9 + $0x360] sm:$0xf0] }
 0x35d   :  { %4989 = vmatpush.bf16.msrb.mxu2 %v7702_v62  ;;  %5002 = vmatpush.bf16.msrb.mxu3 %v7958_v63  ;;  %v7482_v62 = vor.u32 %v8603_v58, %v7479_v59  ;;  %v8595_v63 = vld [vmem:[#allocation9 + $0x304] sm:$0xf] }
 0x35e   :  { %3354 = vmatmul.bf16.vlgmr.msra.gmra.mxu0 %v9179_v14  ;;  %3367 = vmatmul.bf16.vlgmr.msra.gmra.mxu1 %v9181_v16  ;;  %v7450_v2 = vor.u32 %v8595_v63, %v7447_v0  ;;  %v8659_v7 = vld [vmem:[#allocation9 + $0x504] sm:$0xf] }
 0x35f   :  { %3380 = vmatmul.bf16.vlgmr.msra.gmra.mxu2 %v9179_v14  ;;  %3393 = vmatmul.bf16.vlgmr.msra.gmra.mxu3 %v9181_v16  ;;  %v7094_v14 = vor.u32 %v8511_v19, %v7093_v18  ;;  %v7061_v16 = vld [vmem:[#allocation9] sm:$0xf]  ;;  %v7415_v18 = vld [vmem:[#allocation9 + $0x2e0] sm:$0xf0] }
 0x360   :  { %4964 = vmatpush.bf16.msrb.mxu0 %v7158_v3  ;;  %4977 = vmatpush.bf16.msrb.mxu1 %v7414_v15  ;;  %v7062_v48 = vor.u32 %v8503_v29, %v7061_v16  ;;  %v8523_v3 = vld [vmem:[#allocation9 + $0xc4] sm:$0xf] }
 0x361   :  { %4990 = vmatpush.bf16.msrb.mxu2 %v7670_v5  ;;  %5003 = vmatpush.bf16.msrb.mxu3 %v7926_v10  ;;  %v7162_v6 = vor.u32 %v8523_v3, %v7159_v9  ;;  %v8515_v15 = vld [vmem:[#allocation9 + $0x84] sm:$0xf]  ;;  %v7829_v10 = vld [vmem:[#allocation9 + $0x600] sm:$0xf] }
 0x362   :  { %v7130_v5 = vor.u32 %v8515_v15, %v7127_v25  ;;  %v7830_v42 = vor.u32 %v8695_v11, %v7829_v10  ;;  %v8747_v19 = vld [vmem:[#allocation9 + $0x7c4] sm:$0xf]  ;;  %v9194_v25 = vld [vmem:[%s9305_s10] sm:$0xf] }
 0x363   :  { %v8058_v22 = vor.u32 %v8747_v19, %v8055_v21  ;;  %v7383_v16 = vld [vmem:[#allocation9 + $0x2a0] sm:$0xf0]  ;;  %v7293_v19 = vld [vmem:[#allocation9 + $0x1c8] sm:$0xf]  ;;  %v2967_v21 = vperm.slane %v9194_v25, 1 }
 0x364   :  { %4965 = vmatpush.bf16.msrb.mxu0 %v7126_v17  ;;  %4978 = vmatpush.bf16.msrb.mxu1 %v7382_v20  ;;  %v8587_v17 = vld [vmem:[#allocation9 + $0x2c4] sm:$0xf] }
 0x365   :  { %4991 = vmatpush.bf16.msrb.mxu2 %v7638_v23  ;;  %5004 = vmatpush.bf16.msrb.mxu3 %v7894_v24  ;;  %v7418_v20 = vor.u32 %v8587_v17, %v7415_v18  ;;  %v8507_v23 = vld [vmem:[#allocation9 + $0x44] sm:$0xf] }
 0x366   :  { %v8667_v24 = vld [vmem:[#allocation9 + $0x544] sm:$0xf]  ;;  %v7098_v26 = vor.u32 %v8507_v23, %v7095_v4 }
 0x367   :  { %v7738_v13 = vor.u32 %v8667_v24, %v7735_v27  ;;  %v8739_v29 = vld [vmem:[#allocation9 + $0x784] sm:$0xf]  ;;  %v7261_v27 = vld [vmem:[#allocation9 + $0x188] sm:$0xf] }
 0x368   :  { %4966 = vmatpush.bf16.msrb.mxu0 %v7094_v14  ;;  %4979 = vmatpush.bf16.msrb.mxu1 %v7350_v30  ;;  %v8579_v14 = vld [vmem:[#allocation9 + $0x284] sm:$0xf]  ;;  %v8026_v32 = vor.u32 %v8739_v29, %v8023_v31 }
 0x369   :  { %4992 = vmatpush.bf16.msrb.mxu2 %v7606_v35  ;;  %5005 = vmatpush.bf16.msrb.mxu3 %v7862_v28  ;;  %v7386_v30 = vor.u32 %v8579_v14, %v7383_v16  ;;  %v7063_v35 = vld [vmem:[#allocation9 + $0x20] sm:$0xf0] }
 0x36a   :  { %v7066_v28 = vor.u32 %v8499_v37, %v7063_v35  ;;  %v7703_v39 = vld [vmem:[#allocation9 + $0x520] sm:$0xf0]  ;;  %v8624_v37 = vld [vmem:[#allocation9 + $0x3e4] sm:$0xf0] }
 0x36b   :  { %v7706_v41 = vor.u32 %v8659_v7, %v7703_v39  ;;  %v8571_v40 = vld [vmem:[#allocation9 + $0x244] sm:$0xf]  ;;  %v7229_v35 = vld [vmem:[#allocation9 + $0x148] sm:$0xf] }
 0x36c   :  { %4967 = vmatpush.bf16.msrb.mxu0 %v7062_v48  ;;  %4980 = vmatpush.bf16.msrb.mxu1 %v7318_v38  ;;  %v7351_v34 = vld [vmem:[#allocation9 + $0x260] sm:$0xf0] }
 0x36d   :  { %4993 = vmatpush.bf16.msrb.mxu2 %v7574_v52  ;;  %5006 = vmatpush.bf16.msrb.mxu3 %v7830_v42  ;;  %v7354_v48 = vor.u32 %v8571_v40, %v7351_v34  ;;  %v8731_v38 = vld [vmem:[#allocation9 + $0x744] sm:$0xf] }
 0x36e   :  { %v7991_v44 = vld [vmem:[#allocation9 + $0x760] sm:$0xf0] }
 0x36f   :  { %v7994_v45 = vor.u32 %v8731_v38, %v7991_v44  ;;  %v7671_v33 = vld [vmem:[#allocation9 + $0x4e0] sm:$0xf0]  ;;  %v8616_v38 = vld [vmem:[#allocation9 + $0x3a4] sm:$0xf0] }
 0x370   :  { %5012 = vmatpush.bf16.msra.mxu0 %v7290_v46  ;;  %5025 = vmatpush.bf16.msra.mxu1 %v7546_v47  ;;  %v8651_v46 = vld [vmem:[#allocation9 + $0x4c4] sm:$0xf] }
 0x371   :  { %5038 = vmatpush.bf16.msra.mxu2 %v7802_v53  ;;  %5051 = vmatpush.bf16.msra.mxu3 %v8058_v22  ;;  %v7674_v47 = vor.u32 %v8651_v46, %v7671_v33  ;;  %v8563_v49 = vld [vmem:[#allocation9 + $0x204] sm:$0xf]  ;;  %v7197_v46 = vld [vmem:[#allocation9 + $0x108] sm:$0xf] }
 0x372   :  { %v7319_v50 = vld [vmem:[#allocation9 + $0x220] sm:$0xf0]  ;;  %v8536_v33 = vld [vmem:[#allocation9 + $0x124] sm:$0xf0] }
 0x373   :  { %v8723_v51 = vld [vmem:[#allocation9 + $0x704] sm:$0xf]  ;;  %v7322_v52 = vor.u32 %v8563_v49, %v7319_v50 }
 0x374   :  { %5013 = vmatpush.bf16.msra.mxu0 %v7258_v54  ;;  %5026 = vmatpush.bf16.msra.mxu1 %v7514_v56  ;;  %v7959_v53 = vld [vmem:[#allocation9 + $0x720] sm:$0xf0] }
 0x375   :  { %5039 = vmatpush.bf16.msra.mxu2 %v7770_v12  ;;  %5052 = vmatpush.bf16.msra.mxu3 %v8026_v32  ;;  %v7962_v54 = vor.u32 %v8723_v51, %v7959_v53  ;;  %v7639_v56 = vld [vmem:[#allocation9 + $0x4a0] sm:$0xf0]  ;;  %v7549_v32 = vld [vmem:[#allocation9 + $0x3c8] sm:$0xf] }
 0x376   :  { %v7642_v57 = vor.u32 %v8643_v55, %v7639_v56  ;;  %v8715_v58 = vld [vmem:[#allocation9 + $0x6c4] sm:$0xf]  ;;  %v7550_v39 = vor.u32 %v8624_v37, %v7549_v32  ;;  %v7485_v53 = vld [vmem:[#allocation9 + $0x348] sm:$0xf] }
 0x377   :  { %v7927_v59 = vld [vmem:[#allocation9 + $0x6e0] sm:$0xf0]  ;;  %v7805_v56 = vld [vmem:[#allocation9 + $0x5c8] sm:$0xf] }
 0x378   :  { %5014 = vmatpush.bf16.msra.mxu0 %v7226_v60  ;;  %5027 = vmatpush.bf16.msra.mxu1 %v7482_v62  ;;  %v7930_v60 = vor.u32 %v8715_v58, %v7927_v59  ;;  %v7607_v62 = vld [vmem:[#allocation9 + $0x460] sm:$0xf0]  ;;  %v2969_v58 = vperm.slane %v9194_v25, 3  ;;  %v7165_v59 = vld [vmem:[#allocation9 + $0xc8] sm:$0xf] }
 0x379   :  { %5040 = vmatpush.bf16.msra.mxu2 %v7738_v13  ;;  %5053 = vmatpush.bf16.msra.mxu3 %v7994_v45  ;;  %v7610_v8 = vor.u32 %v8635_v61, %v7607_v62  ;;  %v8707_v63 = vld [vmem:[#allocation9 + $0x684] sm:$0xf]  ;;  %v8552_v13 = vld [vmem:[#allocation9 + $0x1a4] sm:$0xf0] }
 0x37a   :  { %v7895_v0 = vld [vmem:[#allocation9 + $0x6a0] sm:$0xf0]  ;;  %v7262_v31 = vor.u32 %v8552_v13, %v7261_v27  ;;  %v8512_v27 = vld [vmem:[#allocation9 + $0x64] sm:$0xf0] }
 0x37b   :  { %v7575_v3 = vld [vmem:[#allocation9 + $0x420] sm:$0xf0]  ;;  %v8029_v32 = vld [vmem:[#allocation9 + $0x788] sm:$0xf] }
 0x37c   :  { %5015 = vmatpush.bf16.msra.mxu0 %v7194_v1  ;;  %5028 = vmatpush.bf16.msra.mxu1 %v7450_v2  ;;  %v7898_v1 = vor.u32 %v8707_v63, %v7895_v0  ;;  %v8627_v2 = vld [vmem:[#allocation9 + $0x404] sm:$0xf]  ;;  %v7453_v63 = vld [vmem:[#allocation9 + $0x308] sm:$0xf] }
 0x37d   :  { %5041 = vmatpush.bf16.msra.mxu2 %v7706_v41  ;;  %5054 = vmatpush.bf16.msra.mxu3 %v7962_v54  ;;  %v7578_v9 = vor.u32 %v8627_v2, %v7575_v3  ;;  %v7863_v15 = vld [vmem:[#allocation9 + $0x660] sm:$0xf0]  ;;  %v2968_v41 = vperm.slane %v9194_v25, 2  ;;  %v8608_v54 = vld [vmem:[#allocation9 + $0x364] sm:$0xf0] }
 0x37e   :  { %v8691_v43 = vld [vmem:[#allocation9 + $0x604] sm:$0xf]  ;;  %v7486_v62 = vor.u32 %v8608_v54, %v7485_v53  ;;  %v8600_v0 = vld [vmem:[#allocation9 + $0x324] sm:$0xf0] }
 0x37f   :  { %v7831_v10 = vld [vmem:[#allocation9 + $0x620] sm:$0xf0]  ;;  %v8744_v37 = vld [vmem:[#allocation9 + $0x7a4] sm:$0xf0] }
 0x380   :  { %5016 = vmatpush.bf16.msra.mxu0 %v7162_v6  ;;  %5029 = vmatpush.bf16.msra.mxu1 %v7418_v20  ;;  %v8699_v6 = vld [vmem:[#allocation9 + $0x644] sm:$0xf]  ;;  %v7834_v11 = vor.u32 %v8691_v43, %v7831_v10  ;;  %v8560_v20 = vld [vmem:[#allocation9 + $0x1e4] sm:$0xf0] }
 0x381   :  { %5042 = vmatpush.bf16.msra.mxu2 %v7674_v47  ;;  %5055 = vmatpush.bf16.msra.mxu3 %v7930_v60  ;;  %v7866_v36 = vor.u32 %v8699_v6, %v7863_v15  ;;  %v7294_v23 = vor.u32 %v8560_v20, %v7293_v19  ;;  %v8528_v60 = vld [vmem:[#allocation9 + $0xe4] sm:$0xf0] }
 0x382   :  { %v7773_v6 = vld [vmem:[#allocation9 + $0x588] sm:$0xf] }
 0x383   :  { %v8680_v15 = vld [vmem:[#allocation9 + $0x5a4] sm:$0xf0] }
 0x384   :  { %5017 = vmatpush.bf16.msra.mxu0 %v7130_v5  ;;  %5030 = vmatpush.bf16.msra.mxu1 %v7386_v30  ;;  %v2966_v5 = vperm.slane %v9194_v25, 0  ;;  %v7133_v25 = vld [vmem:[#allocation9 + $0x88] sm:$0xf] }
 0x385   :  { %5043 = vmatpush.bf16.msra.mxu2 %v7642_v57  ;;  %5056 = vmatpush.bf16.msra.mxu3 %v7898_v1  ;;  %v8688_v57 = vld [vmem:[#allocation9 + $0x5e4] sm:$0xf0] }
 0x386   :  { %v8520_v10 = vld [vmem:[#allocation9 + $0xa4] sm:$0xf0] }
 0x387   :  { %v8061_v19 = vld [vmem:[#allocation9 + $0x7c8] sm:$0xf] }
 0x388   :  { %5018 = vmatpush.bf16.msra.mxu0 %v7098_v26  ;;  %5031 = vmatpush.bf16.msra.mxu1 %v7354_v48  ;;  %v7517_v48 = vld [vmem:[#allocation9 + $0x388] sm:$0xf] }
 0x389   :  { %5044 = vmatpush.bf16.msra.mxu2 %v7610_v8  ;;  %5057 = vmatpush.bf16.msra.mxu3 %v7866_v36  ;;  %v7518_v51 = vor.u32 %v8616_v38, %v7517_v48  ;;  %v7806_v8 = vor.u32 %v8688_v57, %v7805_v56  ;;  %v8752_v20 = vld [vmem:[#allocation9 + $0x7e4] sm:$0xf0] }
 0x38a   :  { %v8504_v48 = vld [vmem:[#allocation9 + $0x24] sm:$0xf0] }
 0x38b   :  { %v7677_v54 = vld [vmem:[#allocation9 + $0x4c8] sm:$0xf] }
 0x38c   :  { %5019 = vmatpush.bf16.msra.mxu0 %v7066_v28  ;;  %5032 = vmatpush.bf16.msra.mxu1 %v7322_v52  ;;  %v8544_v28 = vld [vmem:[#allocation9 + $0x164] sm:$0xf0]  ;;  %v7198_v52 = vor.u32 %v8536_v33, %v7197_v46  ;;  %v7295_v46 = vld [vmem:[#allocation9 + $0x1e8] sm:$0xf0] }
 0x38d   :  { %5045 = vmatpush.bf16.msra.mxu2 %v7578_v9  ;;  %5058 = vmatpush.bf16.msra.mxu3 %v7834_v11  ;;  %v7230_v34 = vor.u32 %v8544_v28, %v7229_v35  ;;  %v7166_v9 = vor.u32 %v8528_v60, %v7165_v59  ;;  %v7454_v11 = vor.u32 %v8600_v0, %v7453_v63  ;;  %v7357_v33 = vld [vmem:[#allocation9 + $0x248] sm:$0xf]  ;;  %v7263_v59 = vld [vmem:[#allocation9 + $0x1a8] sm:$0xf0] }
 0x38e   :  { %v7325_v60 = vld [vmem:[#allocation9 + $0x208] sm:$0xf]  ;;  %v8620_v0 = vld [vmem:[#allocation9 + $0x3cc] sm:$0xf] }
 0x3cb   :  { %v3303_v12 = vpop.f32.mrf.mxu0  ;;  %v3316_v42 = vpop.f32.mrf.mxu1 }
 0x3cc   :  { %v3304_v17 = vadd.f32 %v3303_v12, %v2966_v5  ;;  %v7421_v12 = vld [vmem:[#allocation9 + $0x2c8] sm:$0xf] }
 0x3ce   :  { %v3317_v18 = vadd.f32 %v3316_v42, %v3304_v17  ;;  %v7774_v17 = vor.u32 %v8680_v15, %v7773_v6  ;;  %v8648_v6 = vld [vmem:[#allocation9 + $0x4a4] sm:$0xf0] }
 0x3d0   :  { %v3398_v22 = vmax.f32 %v3317_v18, 0.0  ;;  %v8592_v18 = vld [vmem:[#allocation9 + $0x2e4] sm:$0xf0] }
 0x3d1   :  { %v7422_v13 = vor.u32 %v8592_v18, %v7421_v12 }
 0x3d2   :  { %v9198_v4 = vpack.c.bf16 %v3398_v22, %v3398_v22  ;;  %v3329_v24 = vpop.f32.mrf.mxu2  ;;  %v3342_v26 = vpop.f32.mrf.mxu3  ;;  %v7741_v22 = vld [vmem:[#allocation9 + $0x548] sm:$0xf] }
 0x3d3   :  { %v3330_v14 = vadd.f32 %v3329_v24, %v2967_v21  ;;  %v3305_v16 = vpop.f32.mrf.mxu0  ;;  %v3318_v29 = vpop.f32.mrf.mxu1  ;;  %v7134_v21 = vor.u32 %v8520_v10, %v7133_v25  ;;  %v7933_v10 = vld [vmem:[#allocation9 + $0x6c8] sm:$0xf] }
 0x3d4   :  { %4968 = vmatmul.bf16.vlgmr.msrb.gmra.mxu0 %v9198_v4  ;;  %v7389_v16 = vld [vmem:[#allocation9 + $0x288] sm:$0xf] }
 0x3d5   :  { %v3343_v30 = vadd.f32 %v3342_v26, %v3330_v14  ;;  %5064 = vmatpush.bf16.msrb.mxu0 %v7294_v23  ;;  %v8672_v23 = vld [vmem:[#allocation9 + $0x564] sm:$0xf0]  ;;  %v8062_v14 = vor.u32 %v8752_v20, %v8061_v19 }
 0x3d6   :  { %v7101_v26 = vld [vmem:[#allocation9 + $0x48] sm:$0xf] }
 0x3d7   :  { %v3399_v7 = vmax.f32 %v3343_v30, 0.0  ;;  %v7742_v30 = vor.u32 %v8672_v23, %v7741_v22  ;;  %v7613_v19 = vld [vmem:[#allocation9 + $0x448] sm:$0xf]  ;;  %v8532_v22 = vld [vmem:[#allocation9 + $0x10c] sm:$0xf] }
 0x3d8   :  { %v8640_v20 = vld [vmem:[#allocation9 + $0x464] sm:$0xf0]  ;;  %v7199_v23 = vld [vmem:[#allocation9 + $0x128] sm:$0xf0] }
 0x3d9   :  { %v9202_v40 = vpack.c.bf16 %v3399_v7, %v3399_v7  ;;  %5065 = vmatpush.bf16.msrb.mxu0 %v7262_v31  ;;  %v8584_v31 = vld [vmem:[#allocation9 + $0x2a4] sm:$0xf0]  ;;  %v7102_v7 = vor.u32 %v8512_v27, %v7101_v26 }
 0x3da   :  { %v3331_v44 = vpop.f32.mrf.mxu2  ;;  %v3344_v45 = vpop.f32.mrf.mxu3  ;;  %v7390_v38 = vor.u32 %v8584_v31, %v7389_v16  ;;  %v7901_v26 = vld [vmem:[#allocation9 + $0x688] sm:$0xf]  ;;  %v7487_v16 = vld [vmem:[#allocation9 + $0x368] sm:$0xf0] }
 0x3db   :  { %4981 = vmatmul.bf16.vlgmr.msrb.gmra.mxu1 %v9202_v40  ;;  %v3355_v47 = vpop.f32.mrf.mxu0  ;;  %v3368_v49 = vpop.f32.mrf.mxu1  ;;  %v8030_v44 = vor.u32 %v8744_v37, %v8029_v32  ;;  %v8556_v45 = vld [vmem:[#allocation9 + $0x1cc] sm:$0xf]  ;;  %v8712_v27 = vld [vmem:[#allocation9 + $0x6a4] sm:$0xf0] }
 0x3dc   :  { %5077 = vmatpush.bf16.msrb.mxu1 %v7550_v39  ;;  %v3356_v50 = vadd.f32 %v3355_v47, %v2968_v41  ;;  %v7709_v39 = vld [vmem:[#allocation9 + $0x508] sm:$0xf]  ;;  %v7298_v53 = vor.u32 %v8556_v45, %v7295_v46  ;;  %v8524_v37 = vld [vmem:[#allocation9 + $0xcc] sm:$0xf] }
 0x3dd   :  { %5066 = vmatpush.bf16.msrb.mxu0 %v7230_v34  ;;  %v8664_v41 = vld [vmem:[#allocation9 + $0x524] sm:$0xf0]  ;;  %v7455_v45 = vld [vmem:[#allocation9 + $0x328] sm:$0xf0] }
 0x3de   :  { %v3369_v55 = vadd.f32 %v3368_v49, %v3356_v50  ;;  %v7069_v34 = vld [vmem:[#allocation9 + $0x8] sm:$0xf]  ;;  %v7710_v47 = vor.u32 %v8664_v41, %v7709_v39  ;;  %v7807_v39 = vld [vmem:[#allocation9 + $0x5e8] sm:$0xf0] }
 0x3df   :  { %v8576_v49 = vld [vmem:[#allocation9 + $0x264] sm:$0xf0] }
 0x3e0   :  { %v3400_v61 = vmax.f32 %v3369_v55, 0.0  ;;  %5078 = vmatpush.bf16.msrb.mxu1 %v7518_v51  ;;  %v7997_v50 = vld [vmem:[#allocation9 + $0x748] sm:$0xf]  ;;  %v7358_v56 = vor.u32 %v8576_v49, %v7357_v33 }
 0x3e1   :  { %5067 = vmatpush.bf16.msrb.mxu0 %v7198_v52  ;;  %v8736_v51 = vld [vmem:[#allocation9 + $0x764] sm:$0xf0]  ;;  %v7070_v52 = vor.u32 %v8504_v48, %v7069_v34 }
 0x3e2   :  { %v9206_v1 = vpack.c.bf16 %v3400_v61, %v3400_v61  ;;  %v3381_v2 = vpop.f32.mrf.mxu2  ;;  %v3394_v3 = vpop.f32.mrf.mxu3  ;;  %v8656_v55 = vld [vmem:[#allocation9 + $0x4e4] sm:$0xf0]  ;;  %v7998_v57 = vor.u32 %v8736_v51, %v7997_v50  ;;  %v7135_v50 = vld [vmem:[#allocation9 + $0xa8] sm:$0xf0] }
 0x3e3   :  { %v3382_v36 = vadd.f32 %v3381_v2, %v2969_v58  ;;  %v3357_v5 = vpop.f32.mrf.mxu0  ;;  %v3370_v43 = vpop.f32.mrf.mxu1  ;;  %v8548_v58 = vld [vmem:[#allocation9 + $0x18c] sm:$0xf]  ;;  %v8568_v61 = vld [vmem:[#allocation9 + $0x224] sm:$0xf0]  ;;  %v7678_v63 = vor.u32 %v8656_v55, %v7677_v54 }
 0x3e4   :  { %5079 = vmatpush.bf16.msrb.mxu1 %v7486_v62  ;;  %4994 = vmatmul.bf16.vlgmr.msrb.gmra.mxu2 %v9206_v1  ;;  %v7965_v62 = vld [vmem:[#allocation9 + $0x708] sm:$0xf]  ;;  %v7551_v2 = vld [vmem:[#allocation9 + $0x3e8] sm:$0xf0]  ;;  %v7326_v15 = vor.u32 %v8568_v61, %v7325_v60 }
 0x3e5   :  { %v3395_v42 = vadd.f32 %v3394_v3, %v3382_v36  ;;  %5020 = vmatmul.bf16.vlgmr.msra.gmra.mxu0 %v9198_v4  ;;  %5090 = vmatpush.bf16.msrb.mxu2 %v7806_v8  ;;  %v8728_v8 = vld [vmem:[#allocation9 + $0x724] sm:$0xf0]  ;;  %v7266_v3 = vor.u32 %v8548_v58, %v7263_v59  ;;  %v8540_v5 = vld [vmem:[#allocation9 + $0x14c] sm:$0xf]  ;;  %v7554_v25 = vor.u32 %v8620_v0, %v7551_v2 }
 0x3e6   :  { %5068 = vmatpush.bf16.msrb.mxu0 %v7166_v9  ;;  %v7645_v9 = vld [vmem:[#allocation9 + $0x488] sm:$0xf]  ;;  %v7966_v36 = vor.u32 %v8728_v8, %v7965_v62  ;;  %v7231_v43 = vld [vmem:[#allocation9 + $0x168] sm:$0xf0] }
 0x3e7   :  { %v3401_v24 = vmax.f32 %v3395_v42, 0.0  ;;  %v7646_v12 = vor.u32 %v8648_v6, %v7645_v9  ;;  %v8612_v42 = vld [vmem:[#allocation9 + $0x38c] sm:$0xf]  ;;  %v7234_v18 = vor.u32 %v8540_v5, %v7231_v43  ;;  %v7581_v31 = vld [vmem:[#allocation9 + $0x408] sm:$0xf] }
 0x3e8   :  { %5080 = vmatpush.bf16.msrb.mxu1 %v7454_v11  ;;  %v8720_v11 = vld [vmem:[#allocation9 + $0x6e4] sm:$0xf0]  ;;  %v8676_v51 = vld [vmem:[#allocation9 + $0x58c] sm:$0xf] }
 0x3e9   :  { %v9210_v29 = vpack.c.bf16 %v3401_v24, %v3401_v24  ;;  %5091 = vmatpush.bf16.msrb.mxu2 %v7774_v17  ;;  %v7519_v17 = vld [vmem:[#allocation9 + $0x3a8] sm:$0xf0]  ;;  %v8632_v32 = vld [vmem:[#allocation9 + $0x424] sm:$0xf0] }
 0x3ea   :  { %5069 = vmatpush.bf16.msrb.mxu0 %v7134_v21  ;;  %v3383_v35 = vpop.f32.mrf.mxu2  ;;  %v3396_v28 = vpop.f32.mrf.mxu3  ;;  %v7934_v21 = vor.u32 %v8720_v11, %v7933_v10  ;;  %v7522_v24 = vor.u32 %v8612_v42, %v7519_v17  ;;  %v7869_v34 = vld [vmem:[#allocation9 + $0x648] sm:$0xf]  ;;  %v8748_v58 = vld [vmem:[#allocation9 + $0x7cc] sm:$0xf] }
 0x3eb   :  { %5007 = vmatmul.bf16.vlgmr.msrb.gmra.mxu3 %v9210_v29  ;;  %5033 = vmatmul.bf16.vlgmr.msra.gmra.mxu1 %v9202_v40  ;;  %v7902_v35 = vor.u32 %v8712_v27, %v7901_v26  ;;  %v7167_v28 = vld [vmem:[#allocation9 + $0xe8] sm:$0xf0]  ;;  %v8704_v48 = vld [vmem:[#allocation9 + $0x664] sm:$0xf0] }
 0x3ec   :  { %5081 = vmatpush.bf16.msrb.mxu1 %v7422_v13  ;;  %5103 = vmatpush.bf16.msrb.mxu3 %v8062_v14  ;;  %v7614_v13 = vor.u32 %v8640_v20, %v7613_v19  ;;  %v8604_v14 = vld [vmem:[#allocation9 + $0x34c] sm:$0xf]  ;;  %v7170_v46 = vor.u32 %v8524_v37, %v7167_v28  ;;  %v7870_v49 = vor.u32 %v8704_v48, %v7869_v34  ;;  %v7837_v54 = vld [vmem:[#allocation9 + $0x608] sm:$0xf]  ;;  %v7301_v19 = vld [vmem:[#allocation9 + $0x1d0] sm:$0xf] }
 0x3ed   :  { %5092 = vmatpush.bf16.msrb.mxu2 %v7742_v30  ;;  %v7202_v30 = vor.u32 %v8532_v22, %v7199_v23  ;;  %v7490_v41 = vor.u32 %v8604_v14, %v7487_v16  ;;  %v8696_v55 = vld [vmem:[#allocation9 + $0x624] sm:$0xf0]  ;;  %v8063_v59 = vld [vmem:[#allocation9 + $0x7e8] sm:$0xf0]  ;;  %v8561_v20 = vld [vmem:[#allocation9 + $0x1ec] sm:$0xf0] }
 0x3ee   :  { %5070 = vmatpush.bf16.msrb.mxu0 %v7102_v7  ;;  %v8684_v7 = vld [vmem:[#allocation9 + $0x5cc] sm:$0xf]  ;;  %v7838_v8 = vor.u32 %v8696_v55, %v7837_v54  ;;  %v8066_v9 = vor.u32 %v8748_v58, %v8063_v59  ;;  %v8553_v37 = vld [vmem:[#allocation9 + $0x1ac] sm:$0xf0] }
 0x3ef   :  { %v7810_v33 = vor.u32 %v8684_v7, %v7807_v39  ;;  %v8508_v62 = vld [vmem:[#allocation9 + $0x4c] sm:$0xf]  ;;  %v7557_v34 = vld [vmem:[#allocation9 + $0x3d0] sm:$0xf] }
 0x3f0   :  { %5082 = vmatpush.bf16.msrb.mxu1 %v7390_v38  ;;  %5104 = vmatpush.bf16.msrb.mxu3 %v8030_v44  ;;  %v7582_v38 = vor.u32 %v8632_v32, %v7581_v31  ;;  %v8596_v44 = vld [vmem:[#allocation9 + $0x30c] sm:$0xf]  ;;  %v7269_v32 = vld [vmem:[#allocation9 + $0x190] sm:$0xf] }
 0x3f1   :  { %5093 = vmatpush.bf16.msrb.mxu2 %v7710_v47  ;;  %v8516_v47 = vld [vmem:[#allocation9 + $0x8c] sm:$0xf]  ;;  %v8625_v48 = vld [vmem:[#allocation9 + $0x3ec] sm:$0xf0] }
 0x3f2   :  { %5071 = vmatpush.bf16.msrb.mxu0 %v7070_v52  ;;  %v7775_v52 = vld [vmem:[#allocation9 + $0x5a8] sm:$0xf0]  ;;  %v7138_v60 = vor.u32 %v8516_v47, %v7135_v50  ;;  %v7237_v47 = vld [vmem:[#allocation9 + $0x150] sm:$0xf]  ;;  %v7558_v50 = vor.u32 %v8625_v48, %v7557_v34 }
 0x3f3   :  { %v7778_v61 = vor.u32 %v8676_v51, %v7775_v52  ;;  %v8668_v0 = vld [vmem:[#allocation9 + $0x54c] sm:$0xf]  ;;  %v7525_v54 = vld [vmem:[#allocation9 + $0x390] sm:$0xf] }
 0x3f4   :  { %5083 = vmatpush.bf16.msrb.mxu1 %v7358_v56  ;;  %5105 = vmatpush.bf16.msrb.mxu3 %v7998_v57  ;;  %v8588_v56 = vld [vmem:[#allocation9 + $0x2cc] sm:$0xf]  ;;  %v8617_v55 = vld [vmem:[#allocation9 + $0x3ac] sm:$0xf0] }
 0x3f5   :  { %5046 = vmatmul.bf16.vlgmr.msra.gmra.mxu2 %v9206_v1  ;;  %5072 = vmatmul.bf16.vlgmr.msrb.gmra.mxu0 %v9198_v4  ;;  %v7423_v57 = vld [vmem:[#allocation9 + $0x2e8] sm:$0xf0] }
 0x3f6   :  { %5116 = vmatpush.bf16.msra.mxu0 %v7298_v53  ;;  %5094 = vmatpush.bf16.msrb.mxu2 %v7678_v63  ;;  %v7458_v53 = vor.u32 %v8596_v44, %v7455_v45  ;;  %v7103_v63 = vld [vmem:[#allocation9 + $0x68] sm:$0xf0] }
 0x3f7   :  { %v7743_v2 = vld [vmem:[#allocation9 + $0x568] sm:$0xf0]  ;;  %v7106_v43 = vor.u32 %v8508_v62, %v7103_v63  ;;  %v7526_v62 = vor.u32 %v8617_v55, %v7525_v54  ;;  %v8665_v54 = vld [vmem:[#allocation9 + $0x52c] sm:$0xf0] }
 0x3f8   :  { %5084 = vmatpush.bf16.msrb.mxu1 %v7326_v15  ;;  %5106 = vmatpush.bf16.msrb.mxu3 %v7966_v36  ;;  %v8580_v6 = vld [vmem:[#allocation9 + $0x28c] sm:$0xf] }
 0x3f9   :  { %v7391_v15 = vld [vmem:[#allocation9 + $0x2a8] sm:$0xf0] }
 0x3fa   :  { %5117 = vmatpush.bf16.msra.mxu0 %v7266_v3  ;;  %5095 = vmatpush.bf16.msrb.mxu2 %v7646_v12  ;;  %v7426_v3 = vor.u32 %v8588_v56, %v7423_v57  ;;  %v8740_v36 = vld [vmem:[#allocation9 + $0x78c] sm:$0xf]  ;;  %v7394_v17 = vor.u32 %v8580_v6, %v7391_v15 }
 0x3fb   :  { %5059 = vmatmul.bf16.vlgmr.msra.gmra.mxu3 %v9210_v29  ;;  %5085 = vmatmul.bf16.vlgmr.msrb.gmra.mxu1 %v9202_v40  ;;  %v8031_v5 = vld [vmem:[#allocation9 + $0x7a8] sm:$0xf0] }
 0x3fc   :  { %5129 = vmatpush.bf16.msra.mxu1 %v7554_v25  ;;  %5107 = vmatpush.bf16.msrb.mxu3 %v7934_v21  ;;  %v7746_v25 = vor.u32 %v8668_v0, %v7743_v2  ;;  %v8500_v10 = vld [vmem:[#allocation9 + $0xc] sm:$0xf]  ;;  %v7493_v2 = vld [vmem:[#allocation9 + $0x350] sm:$0xf] }
 0x3fd   :  { %v7071_v11 = vld [vmem:[#allocation9 + $0x28] sm:$0xf0] }
 0x3fe   :  { %5118 = vmatpush.bf16.msra.mxu0 %v7234_v18  ;;  %5096 = vmatpush.bf16.msrb.mxu2 %v7614_v13  ;;  %v8660_v12 = vld [vmem:[#allocation9 + $0x50c] sm:$0xf]  ;;  %v8034_v18 = vor.u32 %v8740_v36, %v8031_v5  ;;  %v7074_v26 = vor.u32 %v8500_v10, %v7071_v11  ;;  %v7302_v13 = vor.u32 %v8561_v20, %v7301_v19  ;;  %v7173_v36 = vld [vmem:[#allocation9 + $0xd0] sm:$0xf] }
 0x3ff   :  { %v7711_v42 = vld [vmem:[#allocation9 + $0x528] sm:$0xf0]  ;;  %v8689_v10 = vld [vmem:[#allocation9 + $0x5ec] sm:$0xf0] }
 0x400   :  { %5130 = vmatpush.bf16.msra.mxu1 %v7522_v24  ;;  %5108 = vmatpush.bf16.msrb.mxu3 %v7902_v35  ;;  %v8572_v21 = vld [vmem:[#allocation9 + $0x24c] sm:$0xf]  ;;  %v7714_v27 = vor.u32 %v8660_v12, %v7711_v42  ;;  %v8601_v19 = vld [vmem:[#allocation9 + $0x32c] sm:$0xf0] }
 0x401   :  { %v7359_v22 = vld [vmem:[#allocation9 + $0x268] sm:$0xf0] }
 0x402   :  { %5119 = vmatpush.bf16.msra.mxu0 %v7202_v30  ;;  %5097 = vmatpush.bf16.msrb.mxu2 %v7582_v38  ;;  %v8732_v23 = vld [vmem:[#allocation9 + $0x74c] sm:$0xf]  ;;  %v7362_v30 = vor.u32 %v8572_v21, %v7359_v22  ;;  %v7270_v38 = vor.u32 %v8553_v37, %v7269_v32  ;;  %v7141_v22 = vld [vmem:[#allocation9 + $0x90] sm:$0xf] }
 0x403   :  { %v7999_v24 = vld [vmem:[#allocation9 + $0x768] sm:$0xf0]  ;;  %v8069_v32 = vld [vmem:[#allocation9 + $0x7d0] sm:$0xf] }
 0x404   :  { %5131 = vmatpush.bf16.msra.mxu1 %v7490_v41  ;;  %5109 = vmatpush.bf16.msrb.mxu3 %v7870_v49  ;;  %v8652_v14 = vld [vmem:[#allocation9 + $0x4cc] sm:$0xf]  ;;  %v8002_v31 = vor.u32 %v8732_v23, %v7999_v24  ;;  %v8545_v49 = vld [vmem:[#allocation9 + $0x16c] sm:$0xf0] }
 0x405   :  { %5098 = vmatmul.bf16.vlgmr.msrb.gmra.mxu2 %v9206_v1  ;;  %v7679_v16 = vld [vmem:[#allocation9 + $0x4e8] sm:$0xf0]  ;;  %v7238_v56 = vor.u32 %v8545_v49, %v7237_v47  ;;  %v8521_v24 = vld [vmem:[#allocation9 + $0xac] sm:$0xf0] }
 0x406   :  { %5120 = vmatpush.bf16.msra.mxu0 %v7170_v46  ;;  %5142 = vmatpush.bf16.msra.mxu2 %v7810_v33  ;;  %v8564_v35 = vld [vmem:[#allocation9 + $0x20c] sm:$0xf]  ;;  %v7682_v41 = vor.u32 %v8652_v14, %v7679_v16  ;;  %v8753_v37 = vld [vmem:[#allocation9 + $0x7ec] sm:$0xf0] }
 0x407   :  { %v7327_v28 = vld [vmem:[#allocation9 + $0x228] sm:$0xf0]  ;;  %v8070_v48 = vor.u32 %v8753_v37, %v8069_v32  ;;  %v8745_v47 = vld [vmem:[#allocation9 + $0x7ac] sm:$0xf0] }
 0x408   :  { %5132 = vmatpush.bf16.msra.mxu1 %v7458_v53  ;;  %5110 = vmatpush.bf16.msrb.mxu3 %v7838_v8  ;;  %v8724_v7 = vld [vmem:[#allocation9 + $0x70c] sm:$0xf]  ;;  %v7330_v46 = vor.u32 %v8564_v35, %v7327_v28  ;;  %v7142_v35 = vor.u32 %v8521_v24, %v7141_v22  ;;  %v8541_v22 = vld [vmem:[#allocation9 + $0x154] sm:$0xf]  ;;  %v7621_v32 = vld [vmem:[#allocation9 + $0x450] sm:$0xf] }
 0x409   :  { %v7967_v39 = vld [vmem:[#allocation9 + $0x728] sm:$0xf0]  ;;  %v7239_v24 = vld [vmem:[#allocation9 + $0x170] sm:$0xf0]  ;;  %v8641_v37 = vld [vmem:[#allocation9 + $0x46c] sm:$0xf0] }
 0x40a   :  { %5121 = vmatpush.bf16.msra.mxu0 %v7138_v60  ;;  %5143 = vmatpush.bf16.msra.mxu2 %v7778_v61  ;;  %v8644_v44 = vld [vmem:[#allocation9 + $0x48c] sm:$0xf]  ;;  %v7970_v33 = vor.u32 %v8724_v7, %v7967_v39  ;;  %v7205_v60 = vld [vmem:[#allocation9 + $0x110] sm:$0xf] }
 0x40b   :  { %5111 = vmatmul.bf16.vlgmr.msrb.gmra.mxu3 %v9210_v29  ;;  %v7647_v45 = vld [vmem:[#allocation9 + $0x4a8] sm:$0xf0]  ;;  %v8537_v61 = vld [vmem:[#allocation9 + $0x12c] sm:$0xf0] }
 0x40c   :  { %5133 = vmatpush.bf16.msra.mxu1 %v7426_v3  ;;  %5155 = vmatpush.bf16.msra.mxu3 %v8066_v9  ;;  %v8716_v51 = vld [vmem:[#allocation9 + $0x6cc] sm:$0xf]  ;;  %v7650_v53 = vor.u32 %v8644_v44, %v7647_v45  ;;  %v8609_v3 = vld [vmem:[#allocation9 + $0x36c] sm:$0xf0]  ;;  %v7206_v9 = vor.u32 %v8537_v61, %v7205_v60 }
 0x40d   :  { %v7935_v52 = vld [vmem:[#allocation9 + $0x6e8] sm:$0xf0]  ;;  %v7494_v11 = vor.u32 %v8609_v3, %v7493_v2  ;;  %v7109_v39 = vld [vmem:[#allocation9 + $0x50] sm:$0xf] }
 0x40e   :  { %5122 = vmatpush.bf16.msra.mxu0 %v7106_v43  ;;  %5144 = vmatpush.bf16.msra.mxu2 %v7746_v25  ;;  %v8636_v57 = vld [vmem:[#allocation9 + $0x44c] sm:$0xf]  ;;  %v7938_v59 = vor.u32 %v8716_v51, %v7935_v52  ;;  %v8529_v43 = vld [vmem:[#allocation9 + $0xec] sm:$0xf0] }
 0x40f   :  { %v7615_v58 = vld [vmem:[#allocation9 + $0x468] sm:$0xf0]  ;;  %v7813_v25 = vld [vmem:[#allocation9 + $0x5d0] sm:$0xf]  ;;  %v7174_v20 = vor.u32 %v8529_v43, %v7173_v36  ;;  %v7271_v36 = vld [vmem:[#allocation9 + $0x1b0] sm:$0xf0] }
 0x410   :  { %5134 = vmatpush.bf16.msra.mxu1 %v7394_v17  ;;  %5156 = vmatpush.bf16.msra.mxu3 %v8034_v18  ;;  %v8708_v8 = vld [vmem:[#allocation9 + $0x68c] sm:$0xf]  ;;  %v7618_v0 = vor.u32 %v8636_v57, %v7615_v58  ;;  %v7461_v18 = vld [vmem:[#allocation9 + $0x310] sm:$0xf]  ;;  %v7814_v21 = vor.u32 %v8689_v10, %v7813_v25  ;;  %v8557_v57 = vld [vmem:[#allocation9 + $0x1d4] sm:$0xf] }
 0x411   :  { %v7903_v63 = vld [vmem:[#allocation9 + $0x6a8] sm:$0xf0]  ;;  %v8673_v44 = vld [vmem:[#allocation9 + $0x56c] sm:$0xf0]  ;;  %v7303_v58 = vld [vmem:[#allocation9 + $0x1f0] sm:$0xf0] }
 0x412   :  { %5123 = vmatpush.bf16.msra.mxu0 %v7074_v26  ;;  %5145 = vmatpush.bf16.msra.mxu2 %v7714_v27  ;;  %v8628_v6 = vld [vmem:[#allocation9 + $0x40c] sm:$0xf]  ;;  %v7906_v5 = vor.u32 %v8708_v8, %v7903_v63  ;;  %v7781_v26 = vld [vmem:[#allocation9 + $0x590] sm:$0xf] }
 0x413   :  { %v7583_v15 = vld [vmem:[#allocation9 + $0x428] sm:$0xf0]  ;;  %v8681_v27 = vld [vmem:[#allocation9 + $0x5ac] sm:$0xf0] }
 0x414   :  { %5135 = vmatpush.bf16.msra.mxu1 %v7362_v30  ;;  %5157 = vmatpush.bf16.msra.mxu3 %v8002_v31  ;;  %v8700_v12 = vld [vmem:[#allocation9 + $0x64c] sm:$0xf]  ;;  %v7586_v17 = vor.u32 %v8628_v6, %v7583_v15  ;;  %v7429_v30 = vld [vmem:[#allocation9 + $0x2d0] sm:$0xf]  ;;  %v7782_v28 = vor.u32 %v8681_v27, %v7781_v26  ;;  %v8549_v15 = vld [vmem:[#allocation9 + $0x194] sm:$0xf] }
 0x415   :  { %5124 = vmatmul.bf16.vlgmr.msra.gmra.mxu0 %v9198_v4  ;;  %v7871_v42 = vld [vmem:[#allocation9 + $0x668] sm:$0xf0]  ;;  %v8593_v31 = vld [vmem:[#allocation9 + $0x2ec] sm:$0xf0] }
 0x416   :  { %5168 = vmatpush.bf16.msrb.mxu0 %v7302_v13  ;;  %5146 = vmatpush.bf16.msra.mxu2 %v7682_v41  ;;  %v7874_v23 = vor.u32 %v8700_v12, %v7871_v42  ;;  %v7462_v13 = vor.u32 %v8601_v19, %v7461_v18  ;;  %v8692_v14 = vld [vmem:[#allocation9 + $0x60c] sm:$0xf]  ;;  %v8513_v41 = vld [vmem:[#allocation9 + $0x6c] sm:$0xf0]  ;;  %v7430_v34 = vor.u32 %v8593_v31, %v7429_v30  ;;  %v7559_v12 = vld [vmem:[#allocation9 + $0x3f0] sm:$0xf0] }
 0x417   :  { %v7839_v16 = vld [vmem:[#allocation9 + $0x628] sm:$0xf0]  ;;  %v7397_v45 = vld [vmem:[#allocation9 + $0x290] sm:$0xf]  ;;  %v7110_v49 = vor.u32 %v8513_v41, %v7109_v39  ;;  %v7242_v30 = vor.u32 %v8541_v22, %v7239_v24  ;;  %v8039_v22 = vld [vmem:[#allocation9 + $0x7b0] sm:$0xf0] }
 0x418   :  { %5136 = vmatpush.bf16.msra.mxu1 %v7330_v46  ;;  %5158 = vmatpush.bf16.msra.mxu3 %v7970_v33  ;;  %v7842_v7 = vor.u32 %v8692_v14, %v7839_v16  ;;  %v8585_v46 = vld [vmem:[#allocation9 + $0x2ac] sm:$0xf0]  ;;  %v7527_v14 = vld [vmem:[#allocation9 + $0x3b0] sm:$0xf0] }
 0x419   :  { %v8037_v33 = vld [vmem:[#allocation9 + $0x790] sm:$0xf]  ;;  %v7398_v55 = vor.u32 %v8585_v46, %v7397_v45  ;;  %v8501_v24 = vld [vmem:[#allocation9 + $0x14] sm:$0xf] }
 0x41a   :  { %5169 = vmatpush.bf16.msrb.mxu0 %v7270_v38  ;;  %5147 = vmatpush.bf16.msra.mxu2 %v7650_v53  ;;  %v7749_v38 = vld [vmem:[#allocation9 + $0x550] sm:$0xf] }
 0x41b   :  { %5137 = vmatmul.bf16.vlgmr.msra.gmra.mxu1 %v9202_v40  ;;  %v7750_v51 = vor.u32 %v8673_v44, %v7749_v38  ;;  %v8505_v52 = vld [vmem:[#allocation9 + $0x2c] sm:$0xf0]  ;;  %v7622_v38 = vor.u32 %v8641_v37, %v7621_v32  ;;  %v8562_v32 = vld [vmem:[#allocation9 + $0x1f4] sm:$0xf0]  ;;  %v8573_v37 = vld [vmem:[#allocation9 + $0x254] sm:$0xf] }
 0x41c   :  { %5181 = vmatpush.bf16.msrb.mxu1 %v7558_v50  ;;  %5159 = vmatpush.bf16.msra.mxu3 %v7938_v59  ;;  %v7077_v50 = vld [vmem:[#allocation9 + $0x10] sm:$0xf] }
 0x41d   :  { %v7717_v53 = vld [vmem:[#allocation9 + $0x510] sm:$0xf]  ;;  %v7078_v8 = vor.u32 %v8505_v52, %v7077_v50  ;;  %v7815_v52 = vld [vmem:[#allocation9 + $0x5f0] sm:$0xf0] }
 0x41e   :  { %5170 = vmatpush.bf16.msrb.mxu0 %v7238_v56  ;;  %5148 = vmatpush.bf16.msra.mxu2 %v7618_v0  ;;  %v8038_v56 = vor.u32 %v8745_v47, %v8037_v33  ;;  %v7365_v59 = vld [vmem:[#allocation9 + $0x250] sm:$0xf]  ;;  %v7718_v63 = vor.u32 %v8665_v54, %v7717_v53  ;;  %v7306_v0 = vor.u32 %v8557_v57, %v7303_v58  ;;  %v8525_v47 = vld [vmem:[#allocation9 + $0xd4] sm:$0xf] }
 0x41f   :  { %v8577_v60 = vld [vmem:[#allocation9 + $0x26c] sm:$0xf0] }
 0x420   :  { %5182 = vmatpush.bf16.msrb.mxu1 %v7526_v62  ;;  %5160 = vmatpush.bf16.msra.mxu3 %v7906_v5  ;;  %v8005_v61 = vld [vmem:[#allocation9 + $0x750] sm:$0xf] }
 0x421   :  { %v8737_v62 = vld [vmem:[#allocation9 + $0x76c] sm:$0xf0] }
 0x422   :  { %5171 = vmatpush.bf16.msrb.mxu0 %v7206_v9  ;;  %5149 = vmatpush.bf16.msra.mxu2 %v7586_v17  ;;  %v7685_v2 = vld [vmem:[#allocation9 + $0x4d0] sm:$0xf]  ;;  %v7366_v9 = vor.u32 %v8577_v60, %v7365_v59  ;;  %v8006_v6 = vor.u32 %v8737_v62, %v8005_v61  ;;  %v7274_v17 = vor.u32 %v8549_v15, %v7271_v36  ;;  %v8517_v60 = vld [vmem:[#allocation9 + $0x94] sm:$0xf] }
 0x423   :  { %v8657_v3 = vld [vmem:[#allocation9 + $0x4ec] sm:$0xf0]  ;;  %v7143_v61 = vld [vmem:[#allocation9 + $0xb0] sm:$0xf0] }
 0x424   :  { %5183 = vmatpush.bf16.msrb.mxu1 %v7494_v11  ;;  %5161 = vmatpush.bf16.msra.mxu3 %v7874_v23  ;;  %v7333_v5 = vld [vmem:[#allocation9 + $0x210] sm:$0xf]  ;;  %v8621_v11 = vld [vmem:[#allocation9 + $0x3d4] sm:$0xf]  ;;  %v7686_v42 = vor.u32 %v8657_v3, %v7685_v2 }
 0x425   :  { %5150 = vmatmul.bf16.vlgmr.msra.gmra.mxu2 %v9206_v1  ;;  %v8569_v43 = vld [vmem:[#allocation9 + $0x22c] sm:$0xf0]  ;;  %v7562_v23 = vor.u32 %v8621_v11, %v7559_v12  ;;  %v8749_v15 = vld [vmem:[#allocation9 + $0x7d4] sm:$0xf] }
 0x426   :  { %5172 = vmatpush.bf16.msrb.mxu0 %v7174_v20  ;;  %5194 = vmatpush.bf16.msrb.mxu2 %v7814_v21  ;;  %v7973_v25 = vld [vmem:[#allocation9 + $0x710] sm:$0xf]  ;;  %v7334_v18 = vor.u32 %v8569_v43, %v7333_v5  ;;  %v8071_v36 = vld [vmem:[#allocation9 + $0x7f0] sm:$0xf0]  ;;  %v7146_v5 = vor.u32 %v8517_v60, %v7143_v61  ;;  %v7245_v60 = vld [vmem:[#allocation9 + $0x158] sm:$0xf] }
 0x427   :  { %v8729_v10 = vld [vmem:[#allocation9 + $0x72c] sm:$0xf0]  ;;  %v8509_v11 = vld [vmem:[#allocation9 + $0x54] sm:$0xf] }
 0x428   :  { %5184 = vmatpush.bf16.msrb.mxu1 %v7462_v13  ;;  %5162 = vmatpush.bf16.msra.mxu3 %v7842_v7  ;;  %v7974_v19 = vor.u32 %v8729_v10, %v7973_v25  ;;  %v7653_v20 = vld [vmem:[#allocation9 + $0x490] sm:$0xf]  ;;  %v8613_v13 = vld [vmem:[#allocation9 + $0x394] sm:$0xf] }
 0x429   :  { %v8649_v21 = vld [vmem:[#allocation9 + $0x4ac] sm:$0xf0]  ;;  %v7207_v7 = vld [vmem:[#allocation9 + $0x130] sm:$0xf0] }
 0x42a   :  { %5173 = vmatpush.bf16.msrb.mxu0 %v7142_v35  ;;  %5195 = vmatpush.bf16.msrb.mxu2 %v7782_v28  ;;  %v7941_v26 = vld [vmem:[#allocation9 + $0x6d0] sm:$0xf]  ;;  %v7654_v16 = vor.u32 %v8649_v21, %v7653_v20  ;;  %v8533_v35 = vld [vmem:[#allocation9 + $0x114] sm:$0xf]  ;;  %v7530_v28 = vor.u32 %v8613_v13, %v7527_v14 }
 0x42b   :  { %5163 = vmatmul.bf16.vlgmr.msra.gmra.mxu3 %v9210_v29  ;;  %v8721_v27 = vld [vmem:[#allocation9 + $0x6ec] sm:$0xf0]  ;;  %v7210_v45 = vor.u32 %v8533_v35, %v7207_v7  ;;  %v7111_v12 = vld [vmem:[#allocation9 + $0x70] sm:$0xf0] }
 0x42c   :  { %5185 = vmatpush.bf16.msrb.mxu1 %v7430_v34  ;;  %5207 = vmatpush.bf16.msrb.mxu3 %v8070_v48  ;;  %v7942_v31 = vor.u32 %v8721_v27, %v7941_v26  ;;  %v7909_v39 = vld [vmem:[#allocation9 + $0x690] sm:$0xf]  ;;  %v8605_v34 = vld [vmem:[#allocation9 + $0x354] sm:$0xf] }
 0x42d   :  { %v8713_v41 = vld [vmem:[#allocation9 + $0x6ac] sm:$0xf0]  ;;  %v7495_v48 = vld [vmem:[#allocation9 + $0x370] sm:$0xf0] }
 0x42e   :  { %5174 = vmatpush.bf16.msrb.mxu0 %v7110_v49  ;;  %5196 = vmatpush.bf16.msrb.mxu2 %v7750_v51  ;;  %v7589_v44 = vld [vmem:[#allocation9 + $0x410] sm:$0xf]  ;;  %v7910_v46 = vor.u32 %v8713_v41, %v7909_v39  ;;  %v7175_v49 = vld [vmem:[#allocation9 + $0xf0] sm:$0xf0]  ;;  %v7498_v50 = vor.u32 %v8605_v34, %v7495_v48 }
 0x42f   :  { %v8633_v33 = vld [vmem:[#allocation9 + $0x42c] sm:$0xf0]  ;;  %v8685_v51 = vld [vmem:[#allocation9 + $0x5d4] sm:$0xf]  ;;  %v7178_v58 = vor.u32 %v8525_v47, %v7175_v49 }
 0x430   :  { %5186 = vmatpush.bf16.msrb.mxu1 %v7398_v55  ;;  %5208 = vmatpush.bf16.msrb.mxu3 %v8038_v56  ;;  %v7877_v53 = vld [vmem:[#allocation9 + $0x650] sm:$0xf]  ;;  %v8597_v55 = vld [vmem:[#allocation9 + $0x314] sm:$0xf]  ;;  %v7590_v57 = vor.u32 %v8633_v33, %v7589_v44  ;;  %v7818_v59 = vor.u32 %v8685_v51, %v7815_v52  ;;  %v8554_v33 = vld [vmem:[#allocation9 + $0x1b4] sm:$0xf0] }
 0x431   :  { %v8705_v54 = vld [vmem:[#allocation9 + $0x66c] sm:$0xf0]  ;;  %v7463_v56 = vld [vmem:[#allocation9 + $0x330] sm:$0xf0]  ;;  %v7565_v52 = vld [vmem:[#allocation9 + $0x3d8] sm:$0xf] }
 0x432   :  { %5175 = vmatpush.bf16.msrb.mxu0 %v7078_v8  ;;  %5197 = vmatpush.bf16.msrb.mxu2 %v7718_v63  ;;  %v7878_v62 = vor.u32 %v8705_v54, %v7877_v53  ;;  %v7466_v8 = vor.u32 %v8597_v55, %v7463_v56  ;;  %v8677_v63 = vld [vmem:[#allocation9 + $0x594] sm:$0xf]  ;;  %v7845_v2 = vld [vmem:[#allocation9 + $0x610] sm:$0xf]  ;;  %v8626_v53 = vld [vmem:[#allocation9 + $0x3f4] sm:$0xf0] }
 0x433   :  { %v8697_v3 = vld [vmem:[#allocation9 + $0x62c] sm:$0xf0]  ;;  %v7399_v20 = vld [vmem:[#allocation9 + $0x2b0] sm:$0xf0]  ;;  %v7566_v61 = vor.u32 %v8626_v53, %v7565_v52 }
 0x434   :  { %5187 = vmatpush.bf16.msrb.mxu1 %v7366_v9  ;;  %5209 = vmatpush.bf16.msrb.mxu3 %v8006_v6  ;;  %v8589_v9 = vld [vmem:[#allocation9 + $0x2d4] sm:$0xf]  ;;  %v7846_v25 = vor.u32 %v8697_v3, %v7845_v2  ;;  %v8618_v2 = vld [vmem:[#allocation9 + $0x3b4] sm:$0xf0] }
 0x435   :  { %5176 = vmatmul.bf16.vlgmr.msrb.gmra.mxu0 %v9198_v4  ;;  %v7431_v6 = vld [vmem:[#allocation9 + $0x2f0] sm:$0xf0] }
 0x436   :  { %5220 = vmatpush.bf16.msra.mxu0 %v7306_v0  ;;  %5198 = vmatpush.bf16.msrb.mxu2 %v7686_v42  ;;  %v7783_v0 = vld [vmem:[#allocation9 + $0x5b0] sm:$0xf0]  ;;  %v7434_v10 = vor.u32 %v8589_v9, %v7431_v6 }
 0x437   :  { %v7786_v43 = vor.u32 %v8677_v63, %v7783_v0  ;;  %v8669_v42 = vld [vmem:[#allocation9 + $0x554] sm:$0xf]  ;;  %v7533_v0 = vld [vmem:[#allocation9 + $0x398] sm:$0xf] }
 0x438   :  { %5188 = vmatpush.bf16.msrb.mxu1 %v7334_v18  ;;  %5210 = vmatpush.bf16.msrb.mxu3 %v7974_v19  ;;  %v7751_v18 = vld [vmem:[#allocation9 + $0x570] sm:$0xf0] }
 0x439   :  { %v8581_v19 = vld [vmem:[#allocation9 + $0x294] sm:$0xf]  ;;  %v7754_v26 = vor.u32 %v8669_v42, %v7751_v18  ;;  %v7501_v42 = vld [vmem:[#allocation9 + $0x358] sm:$0xf] }
 0x43a   :  { %5221 = vmatpush.bf16.msra.mxu0 %v7274_v17  ;;  %5199 = vmatpush.bf16.msrb.mxu2 %v7654_v16  ;;  %v8074_v17 = vor.u32 %v8749_v15, %v8071_v36  ;;  %v8741_v21 = vld [vmem:[#allocation9 + $0x794] sm:$0xf]  ;;  %v7402_v27 = vor.u32 %v8581_v19, %v7399_v20 }
 0x43b   :  { %5189 = vmatmul.bf16.vlgmr.msrb.gmra.mxu1 %v9202_v40  ;;  %v7079_v13 = vld [vmem:[#allocation9 + $0x30] sm:$0xf0] }
 0x43c   :  { %5233 = vmatpush.bf16.msra.mxu1 %v7562_v23  ;;  %5211 = vmatpush.bf16.msrb.mxu3 %v7942_v31  ;;  %v7114_v23 = vor.u32 %v8509_v11, %v7111_v12  ;;  %v8661_v14 = vld [vmem:[#allocation9 + $0x514] sm:$0xf]  ;;  %v7309_v31 = vld [vmem:[#allocation9 + $0x1d8] sm:$0xf]  ;;  %v7082_v39 = vor.u32 %v8501_v24, %v7079_v13 }
 0x43d   :  { %v7719_v16 = vld [vmem:[#allocation9 + $0x530] sm:$0xf0]  ;;  %v7310_v34 = vor.u32 %v8562_v32, %v7309_v31  ;;  %v8530_v24 = vld [vmem:[#allocation9 + $0xf4] sm:$0xf0] }
 0x43e   :  { %5222 = vmatpush.bf16.msra.mxu0 %v7242_v30  ;;  %5200 = vmatpush.bf16.msrb.mxu2 %v7622_v38  ;;  %v8042_v30 = vor.u32 %v8741_v21, %v8039_v22  ;;  %v7367_v35 = vld [vmem:[#allocation9 + $0x270] sm:$0xf0]  ;;  %v7722_v41 = vor.u32 %v8661_v14, %v7719_v16  ;;  %v8690_v13 = vld [vmem:[#allocation9 + $0x5f4] sm:$0xf0] }
 0x43f   :  { %v8007_v7 = vld [vmem:[#allocation9 + $0x770] sm:$0xf0]  ;;  %v7370_v44 = vor.u32 %v8573_v37, %v7367_v35  ;;  %v8602_v31 = vld [vmem:[#allocation9 + $0x334] sm:$0xf0] }
 0x440   :  { %5234 = vmatpush.bf16.msra.mxu1 %v7530_v28  ;;  %5212 = vmatpush.bf16.msrb.mxu3 %v7910_v46  ;;  %v8733_v28 = vld [vmem:[#allocation9 + $0x754] sm:$0xf]  ;;  %v7277_v46 = vld [vmem:[#allocation9 + $0x198] sm:$0xf] }
 0x441   :  { %v8653_v48 = vld [vmem:[#allocation9 + $0x4d4] sm:$0xf]  ;;  %v7278_v55 = vor.u32 %v8554_v33, %v7277_v46  ;;  %v7437_v33 = vld [vmem:[#allocation9 + $0x2d8] sm:$0xf] }
 0x442   :  { %5223 = vmatpush.bf16.msra.mxu0 %v7210_v45  ;;  %5201 = vmatpush.bf16.msrb.mxu2 %v7590_v57  ;;  %v7687_v38 = vld [vmem:[#allocation9 + $0x4f0] sm:$0xf0]  ;;  %v8010_v45 = vor.u32 %v8733_v28, %v8007_v7  ;;  %v7149_v7 = vld [vmem:[#allocation9 + $0x98] sm:$0xf] }
 0x443   :  { %v8565_v47 = vld [vmem:[#allocation9 + $0x214] sm:$0xf]  ;;  %v7690_v54 = vor.u32 %v8653_v48, %v7687_v38  ;;  %v7789_v38 = vld [vmem:[#allocation9 + $0x598] sm:$0xf] }
 0x444   :  { %5235 = vmatpush.bf16.msra.mxu1 %v7498_v50  ;;  %5213 = vmatpush.bf16.msrb.mxu3 %v7878_v62  ;;  %v7335_v49 = vld [vmem:[#allocation9 + $0x230] sm:$0xf0]  ;;  %v8546_v62 = vld [vmem:[#allocation9 + $0x174] sm:$0xf0] }
 0x445   :  { %5202 = vmatmul.bf16.vlgmr.msrb.gmra.mxu2 %v9206_v1  ;;  %v8725_v50 = vld [vmem:[#allocation9 + $0x714] sm:$0xf]  ;;  %v7338_v56 = vor.u32 %v8565_v47, %v7335_v49  ;;  %v7246_v9 = vor.u32 %v8546_v62, %v7245_v60  ;;  %v8594_v47 = vld [vmem:[#allocation9 + $0x2f4] sm:$0xf0] }
 0x446   :  { %5224 = vmatpush.bf16.msra.mxu0 %v7178_v58  ;;  %5246 = vmatpush.bf16.msra.mxu2 %v7818_v59  ;;  %v7975_v51 = vld [vmem:[#allocation9 + $0x730] sm:$0xf0]  ;;  %v8077_v49 = vld [vmem:[#allocation9 + $0x7d8] sm:$0xf] }
 0x447   :  { %v7978_v57 = vor.u32 %v8725_v50, %v7975_v51  ;;  %v8645_v58 = vld [vmem:[#allocation9 + $0x494] sm:$0xf]  ;;  %v8754_v50 = vld [vmem:[#allocation9 + $0x7f4] sm:$0xf0] }
 0x448   :  { %5236 = vmatpush.bf16.msra.mxu1 %v7466_v8  ;;  %5214 = vmatpush.bf16.msrb.mxu3 %v7846_v25  ;;  %v7655_v59 = vld [vmem:[#allocation9 + $0x4b0] sm:$0xf0]  ;;  %v7534_v25 = vor.u32 %v8618_v2, %v7533_v0  ;;  %v7405_v60 = vld [vmem:[#allocation9 + $0x298] sm:$0xf] }
 0x449   :  { %v8717_v8 = vld [vmem:[#allocation9 + $0x6d4] sm:$0xf]  ;;  %v7658_v3 = vor.u32 %v8645_v58, %v7655_v59  ;;  %v8078_v58 = vor.u32 %v8754_v50, %v8077_v49  ;;  %v8674_v59 = vld [vmem:[#allocation9 + $0x574] sm:$0xf0]  ;;  %v8542_v49 = vld [vmem:[#allocation9 + $0x15c] sm:$0xf] }
 0x44a   :  { %5225 = vmatpush.bf16.msra.mxu0 %v7146_v5  ;;  %5247 = vmatpush.bf16.msra.mxu2 %v7786_v43  ;;  %v7943_v63 = vld [vmem:[#allocation9 + $0x6f0] sm:$0xf0]  ;;  %v7213_v5 = vld [vmem:[#allocation9 + $0x118] sm:$0xf] }
 0x44b   :  { %5215 = vmatmul.bf16.vlgmr.msrb.gmra.mxu3 %v9210_v29  ;;  %v7946_v6 = vor.u32 %v8717_v8, %v7943_v63  ;;  %v8637_v15 = vld [vmem:[#allocation9 + $0x454] sm:$0xf]  ;;  %v8045_v62 = vld [vmem:[#allocation9 + $0x798] sm:$0xf]  ;;  %v9238_v63 = vld [vmem:[%s9307_s12] sm:$0xff] }
 0x44c   :  { %5237 = vmatpush.bf16.msra.mxu1 %v7434_v10  ;;  %5259 = vmatpush.bf16.msra.mxu3 %v8074_v17  ;;  %v7623_v36 = vld [vmem:[#allocation9 + $0x470] sm:$0xf0]  ;;  %v8538_v10 = vld [vmem:[#allocation9 + $0x134] sm:$0xf0] }
 0x44d   :  { %v8709_v11 = vld [vmem:[#allocation9 + $0x694] sm:$0xf]  ;;  %v8610_v17 = vld [vmem:[#allocation9 + $0x374] sm:$0xf0]  ;;  %v7626_v18 = vor.u32 %v8637_v15, %v7623_v36  ;;  %v7214_v20 = vor.u32 %v8538_v10, %v7213_v5 }
 0x44e   :  { %5226 = vmatpush.bf16.msra.mxu0 %v7114_v23  ;;  %5248 = vmatpush.bf16.msra.mxu2 %v7754_v26  ;;  %v7911_v12 = vld [vmem:[#allocation9 + $0x6b0] sm:$0xf0]  ;;  %v7181_v23 = vld [vmem:[#allocation9 + $0xd8] sm:$0xf]  ;;  %v7502_v26 = vor.u32 %v8610_v17, %v7501_v42 }
 0x44f   :  { %v8629_v19 = vld [vmem:[#allocation9 + $0x414] sm:$0xf]  ;;  %v7914_v21 = vor.u32 %v8709_v11, %v7911_v12  ;;  %v7182_v35 = vor.u32 %v8530_v24, %v7181_v23  ;;  %v8746_v8 = vld [vmem:[#allocation9 + $0x7b4] sm:$0xf0]  ;;  %v8558_v11 = vld [vmem:[#allocation9 + $0x1dc] sm:$0xf] }
 0x450   :  { %5238 = vmatpush.bf16.msra.mxu1 %v7402_v27  ;;  %5260 = vmatpush.bf16.msra.mxu3 %v8042_v30  ;;  %v7591_v22 = vld [vmem:[#allocation9 + $0x430] sm:$0xf0]  ;;  %v7821_v27 = vld [vmem:[#allocation9 + $0x5d8] sm:$0xf]  ;;  %v8046_v10 = vor.u32 %v8746_v8, %v8045_v62  ;;  %v7311_v12 = vld [vmem:[#allocation9 + $0x1f8] sm:$0xf0] }
 0x451   :  { %v9229_v43 = vpop.f32.mrf.mxu0  ;;  %v8701_v14 = vld [vmem:[#allocation9 + $0x654] sm:$0xf]  ;;  %v7469_v30 = vld [vmem:[#allocation9 + $0x318] sm:$0xf]  ;;  %v7594_v32 = vor.u32 %v8629_v19, %v7591_v22  ;;  %v7822_v28 = vor.u32 %v8690_v13, %v7821_v27  ;;  %v7314_v23 = vor.u32 %v8558_v11, %v7311_v12 }
 0x452   :  { %5227 = vmatpush.bf16.msra.mxu0 %v7082_v39  ;;  %5249 = vmatpush.bf16.msra.mxu2 %v7722_v41  ;;  %v7879_v16 = vld [vmem:[#allocation9 + $0x670] sm:$0xf0]  ;;  %v8522_v39 = vld [vmem:[#allocation9 + $0xb4] sm:$0xf0]  ;;  %v7470_v48 = vor.u32 %v8602_v31, %v7469_v30 }
 0x453   :  { %v7847_v46 = vld [vmem:[#allocation9 + $0x630] sm:$0xf0]  ;;  %v7150_v51 = vor.u32 %v8522_v39, %v7149_v7  ;;  %v8506_v15 = vld [vmem:[#allocation9 + $0x34] sm:$0xf0]  ;;  %v8622_v39 = vld [vmem:[#allocation9 + $0x3dc] sm:$0xf] }
 0x454   :  { %5239 = vmatpush.bf16.msra.mxu1 %v7370_v44  ;;  %5261 = vmatpush.bf16.msra.mxu3 %v8010_v45  ;;  %v8682_v44 = vld [vmem:[#allocation9 + $0x5b4] sm:$0xf0]  ;;  %v8693_v45 = vld [vmem:[#allocation9 + $0x614] sm:$0xf] }
 0x455   :  { %5228 = vmatmul.bf16.vlgmr.msra.gmra.mxu0 %v9198_v4  ;;  %v7790_v52 = vor.u32 %v8682_v44, %v7789_v38  ;;  %v7850_v53 = vor.u32 %v8693_v45, %v7847_v46  ;;  %v7725_v36 = vld [vmem:[#allocation9 + $0x518] sm:$0xf] }
 0x456   :  { %5272 = vmatpush.bf16.msrb.mxu0 %v7310_v34  ;;  %5250 = vmatpush.bf16.msra.mxu2 %v7690_v54  ;;  %v7882_v34 = vor.u32 %v8701_v14, %v7879_v16  ;;  %v7438_v54 = vor.u32 %v8594_v47, %v7437_v33  ;;  %v8666_v5 = vld [vmem:[#allocation9 + $0x534] sm:$0xf0]  ;;  %v8550_v14 = vld [vmem:[#allocation9 + $0x19c] sm:$0xf] }
 0x457   :  { %v7373_v42 = vld [vmem:[#allocation9 + $0x258] sm:$0xf]  ;;  %v7726_v22 = vor.u32 %v8666_v5, %v7725_v36  ;;  %v7279_v16 = vld [vmem:[#allocation9 + $0x1b8] sm:$0xf0] }
 0x458   :  { %5240 = vmatpush.bf16.msra.mxu1 %v7338_v56  ;;  %5262 = vmatpush.bf16.msra.mxu3 %v7978_v57  ;;  %v9232_v37 = vpop.f32.mrf.mxu1  ;;  %v8514_v56 = vld [vmem:[#allocation9 + $0x74] sm:$0xf0]  ;;  %v7282_v38 = vor.u32 %v8550_v14, %v7279_v16  ;;  %v8606_v36 = vld [vmem:[#allocation9 + $0x35c] sm:$0xf]  ;;  %v3665_v14 = vperm.slane %v9238_v63, 1 }
 0x459   :  { %v4971_v41 = vpop.f32.mrf.mxu0  ;;  %v7757_v57 = vld [vmem:[#allocation9 + $0x558] sm:$0xf]  ;;  %v7503_v5 = vld [vmem:[#allocation9 + $0x378] sm:$0xf0] }
 0x45a   :  { %5273 = vmatpush.bf16.msrb.mxu0 %v7278_v55  ;;  %5251 = vmatpush.bf16.msra.mxu2 %v7658_v3  ;;  %v7117_v55 = vld [vmem:[#allocation9 + $0x58] sm:$0xf]  ;;  %v7567_v41 = vld [vmem:[#allocation9 + $0x3f8] sm:$0xf0] }
 0x45b   :  { %5241 = vmatmul.bf16.vlgmr.msra.gmra.mxu1 %v9202_v40  ;;  %v7118_v2 = vor.u32 %v8514_v56, %v7117_v55  ;;  %v7085_v3 = vld [vmem:[#allocation9 + $0x18] sm:$0xf]  ;;  %v7535_v55 = vld [vmem:[#allocation9 + $0x3b8] sm:$0xf0] }
 0x45c   :  { %5285 = vmatpush.bf16.msrb.mxu1 %v7566_v61  ;;  %5263 = vmatpush.bf16.msra.mxu3 %v7946_v6  ;;  %v8586_v61 = vld [vmem:[#allocation9 + $0x2b4] sm:$0xf0] }
 0x45d   :  { %v7406_v6 = vor.u32 %v8586_v61, %v7405_v60  ;;  %v8578_v17 = vld [vmem:[#allocation9 + $0x274] sm:$0xf0] }
 0x45e   :  { %5274 = vmatpush.bf16.msrb.mxu0 %v7246_v9  ;;  %5252 = vmatpush.bf16.msra.mxu2 %v7626_v18  ;;  %v7758_v9 = vor.u32 %v8674_v59, %v7757_v57  ;;  %v8013_v18 = vld [vmem:[#allocation9 + $0x758] sm:$0xf]  ;;  %v7374_v27 = vor.u32 %v8578_v17, %v7373_v42 }
 0x45f   :  { %v8738_v19 = vld [vmem:[#allocation9 + $0x774] sm:$0xf0] }
 0x460   :  { %5286 = vmatpush.bf16.msrb.mxu1 %v7534_v25  ;;  %5264 = vmatpush.bf16.msra.mxu3 %v7914_v21  ;;  %v4984_v0 = vpop.f32.mrf.mxu1  ;;  %v3664_v21 = vperm.slane %v9238_v63, 0  ;;  %v7693_v24 = vld [vmem:[#allocation9 + $0x4d8] sm:$0xf]  ;;  %v8014_v13 = vor.u32 %v8738_v19, %v8013_v18  ;;  %v8526_v19 = vld [vmem:[#allocation9 + $0xdc] sm:$0xf] }
 0x461   :  { %v7341_v30 = vld [vmem:[#allocation9 + $0x218] sm:$0xf] }
 0x462   :  { %5275 = vmatpush.bf16.msrb.mxu0 %v7214_v20  ;;  %5253 = vmatpush.bf16.msra.mxu2 %v7594_v32  ;;  %v9240_v25 = vpop.f32.mrf.mxu0  ;;  %v7086_v20 = vor.u32 %v8506_v15, %v7085_v3  ;;  %v8570_v32 = vld [vmem:[#allocation9 + $0x234] sm:$0xf0]  ;;  %v7215_v3 = vld [vmem:[#allocation9 + $0x138] sm:$0xf0] }
 0x463   :  { %v7342_v45 = vor.u32 %v8570_v32, %v7341_v30  ;;  %v7661_v33 = vld [vmem:[#allocation9 + $0x498] sm:$0xf] }
 0x464   :  { %5287 = vmatpush.bf16.msrb.mxu1 %v7502_v26  ;;  %5265 = vmatpush.bf16.msra.mxu3 %v7882_v34  ;;  %v8658_v26 = vld [vmem:[#allocation9 + $0x4f4] sm:$0xf0]  ;;  %v4970_v34 = vadd.f32 %v9229_v43, %v3664_v21  ;;  %v7506_v21 = vor.u32 %v8606_v36, %v7503_v5  ;;  %v7087_v36 = vld [vmem:[#allocation9 + $0x38] sm:$0xf0] }
 0x465   :  { %5254 = vmatmul.bf16.vlgmr.msra.gmra.mxu2 %v9206_v1  ;;  %v8650_v47 = vld [vmem:[#allocation9 + $0x4b4] sm:$0xf0]  ;;  %v8662_v5 = vld [vmem:[#allocation9 + $0x51c] sm:$0xf] }
 0x466   :  { %5276 = vmatpush.bf16.msrb.mxu0 %v7182_v35  ;;  %5298 = vmatpush.bf16.msrb.mxu2 %v7822_v28  ;;  %v7981_v35 = vld [vmem:[#allocation9 + $0x718] sm:$0xf]  ;;  %v4983_v50 = vadd.f32 %v9232_v37, %v4970_v34  ;;  %v7662_v57 = vor.u32 %v8650_v47, %v7661_v33  ;;  %v8534_v37 = vld [vmem:[#allocation9 + $0x11c] sm:$0xf]  ;;  %v5022_v47 = vadd.f32 %v9240_v25, %v3665_v14 }
 0x467   :  { %v4995_v31 = vpop.f32.mrf.mxu2  ;;  %v8730_v28 = vld [vmem:[#allocation9 + $0x734] sm:$0xf0]  ;;  %v7218_v42 = vor.u32 %v8534_v37, %v7215_v3  ;;  %v8678_v34 = vld [vmem:[#allocation9 + $0x59c] sm:$0xf] }
 0x468   :  { %5288 = vmatpush.bf16.msrb.mxu1 %v7470_v48  ;;  %5266 = vmatpush.bf16.msra.mxu3 %v7850_v53  ;;  %v9244_v7 = vpop.f32.mrf.mxu1  ;;  %v7694_v48 = vor.u32 %v8658_v26, %v7693_v24  ;;  %v7982_v46 = vor.u32 %v8730_v28, %v7981_v35  ;;  %v7949_v53 = vld [vmem:[#allocation9 + $0x6d8] sm:$0xf]  ;;  %v4996_v56 = vadd.f32 %v4995_v31, %v4983_v50  ;;  %v8518_v35 = vld [vmem:[#allocation9 + $0x9c] sm:$0xf] }
 0x469   :  { %v8722_v43 = vld [vmem:[#allocation9 + $0x6f4] sm:$0xf0]  ;;  %v7151_v28 = vld [vmem:[#allocation9 + $0xb8] sm:$0xf0] }
 0x46a   :  { %5277 = vmatpush.bf16.msrb.mxu0 %v7150_v51  ;;  %5299 = vmatpush.bf16.msrb.mxu2 %v7790_v52  ;;  %v5023_v44 = vpop.f32.mrf.mxu0  ;;  %v7570_v51 = vor.u32 %v8622_v39, %v7567_v41  ;;  %v7247_v52 = vld [vmem:[#allocation9 + $0x178] sm:$0xf0]  ;;  %v7950_v60 = vor.u32 %v8722_v43, %v7949_v53  ;;  %v7629_v61 = vld [vmem:[#allocation9 + $0x458] sm:$0xf]  ;;  %v7154_v53 = vor.u32 %v8518_v35, %v7151_v28 }
 0x46b   :  { %5267 = vmatmul.bf16.vlgmr.msra.gmra.mxu3 %v9210_v29  ;;  %v7250_v59 = vor.u32 %v8542_v49, %v7247_v52  ;;  %v8642_v62 = vld [vmem:[#allocation9 + $0x474] sm:$0xf0]  ;;  %v7439_v33 = vld [vmem:[#allocation9 + $0x2f8] sm:$0xf0] }
 0x46c   :  { %5289 = vmatpush.bf16.msrb.mxu1 %v7438_v54  ;;  %5311 = vmatpush.bf16.msrb.mxu3 %v8078_v58  ;;  %v8614_v54 = vld [vmem:[#allocation9 + $0x39c] sm:$0xf]  ;;  %v7597_v11 = vld [vmem:[#allocation9 + $0x418] sm:$0xf] }
 0x46d   :  { %v8634_v18 = vld [vmem:[#allocation9 + $0x434] sm:$0xf0]  ;;  %v8750_v50 = vld [vmem:[#allocation9 + $0x7dc] sm:$0xf] }
 0x46e   :  { %5278 = vmatpush.bf16.msrb.mxu0 %v7118_v2  ;;  %5300 = vmatpush.bf16.msrb.mxu2 %v7758_v9  ;;  %v5008_v58 = vpop.f32.mrf.mxu3  ;;  %v7538_v2 = vor.u32 %v8614_v54, %v7535_v55  ;;  %v7917_v9 = vld [vmem:[#allocation9 + $0x698] sm:$0xf]  ;;  %v7598_v16 = vor.u32 %v8634_v18, %v7597_v11  ;;  %v5035_v54 = vadd.f32 %v9244_v7, %v5022_v47  ;;  %v7375_v18 = vld [vmem:[#allocation9 + $0x278] sm:$0xf0] }
 0x46f   :  { %v5009_v8 = vadd.f32 %v5008_v58, %v4996_v56  ;;  %v4997_v0 = vpop.f32.mrf.mxu2  ;;  %v7885_v24 = vld [vmem:[#allocation9 + $0x658] sm:$0xf]  ;;  %v7119_v58 = vld [vmem:[#allocation9 + $0x78] sm:$0xf0] }
 0x470   :  { %5290 = vmatpush.bf16.msrb.mxu1 %v7406_v6  ;;  %5312 = vmatpush.bf16.msrb.mxu3 %v8046_v10  ;;  %v8714_v6 = vld [vmem:[#allocation9 + $0x6b4] sm:$0xf0]  ;;  %v5036_v15 = vpop.f32.mrf.mxu1  ;;  %v7630_v10 = vor.u32 %v8642_v62, %v7629_v61  ;;  %v8582_v61 = vld [vmem:[#allocation9 + $0x29c] sm:$0xf] }
 0x471   :  { %5376 = vst [vmem:[%s9308_s13] sm:$0xff] %v5009_v8  ;;  %v7918_v17 = vor.u32 %v8714_v6, %v7917_v9  ;;  %v8706_v26 = vld [vmem:[#allocation9 + $0x674] sm:$0xf0]  ;;  %v7407_v62 = vld [vmem:[#allocation9 + $0x2b8] sm:$0xf0] }
 0x472   :  { %5279 = vmatpush.bf16.msrb.mxu0 %v7086_v20  ;;  %5301 = vmatpush.bf16.msrb.mxu2 %v7726_v22  ;;  %v9253_v12 = vpop.f32.mrf.mxu0  ;;  %v7183_v20 = vld [vmem:[#allocation9 + $0xf8] sm:$0xf0]  ;;  %v7886_v39 = vor.u32 %v8706_v26, %v7885_v24  ;;  %v7410_v6 = vor.u32 %v8582_v61, %v7407_v62 }
 0x473   :  { %v8686_v22 = vld [vmem:[#allocation9 + $0x5dc] sm:$0xf]  ;;  %v7186_v31 = vor.u32 %v8526_v19, %v7183_v20 }
 0x474   :  { %5291 = vmatpush.bf16.msrb.mxu1 %v7374_v27  ;;  %5313 = vmatpush.bf16.msrb.mxu3 %v8014_v13  ;;  %v8598_v27 = vld [vmem:[#allocation9 + $0x31c] sm:$0xf] }
 0x475   :  { %5280 = vmatmul.bf16.vlgmr.msrb.gmra.mxu0 %v9198_v4  ;;  %v7471_v13 = vld [vmem:[#allocation9 + $0x338] sm:$0xf0] }
 0x476   :  { %5324 = vmatpush.bf16.msra.mxu0 %v7314_v23  ;;  %5302 = vmatpush.bf16.msrb.mxu2 %v7694_v48  ;;  %v7823_v23 = vld [vmem:[#allocation9 + $0x5f8] sm:$0xf0]  ;;  %v5010_v30 = vpop.f32.mrf.mxu3  ;;  %v7474_v41 = vor.u32 %v8598_v27, %v7471_v13 }
 0x477   :  { %v7826_v32 = vor.u32 %v8686_v22, %v7823_v23  ;;  %v7791_v48 = vld [vmem:[#allocation9 + $0x5b8] sm:$0xf0] }
 0x478   :  { %5292 = vmatpush.bf16.msrb.mxu1 %v7342_v45  ;;  %5314 = vmatpush.bf16.msrb.mxu3 %v7982_v46  ;;  %v5047_v44 = vpop.f32.mrf.mxu2  ;;  %v8698_v45 = vld [vmem:[#allocation9 + $0x634] sm:$0xf0]  ;;  %v8590_v46 = vld [vmem:[#allocation9 + $0x2dc] sm:$0xf]  ;;  %v9257_v49 = vpop.f32.mrf.mxu1  ;;  %v7794_v43 = vor.u32 %v8678_v34, %v7791_v48 }
 0x479   :  { %v7442_v56 = vor.u32 %v8590_v46, %v7439_v33  ;;  %v5048_v37 = vadd.f32 %v5047_v44, %v5035_v54  ;;  %v8742_v8 = vld [vmem:[#allocation9 + $0x79c] sm:$0xf] }
 0x47a   :  { %5325 = vmatpush.bf16.msra.mxu0 %v7282_v38  ;;  %5303 = vmatpush.bf16.msrb.mxu2 %v7662_v57  ;;  %v7853_v38 = vld [vmem:[#allocation9 + $0x618] sm:$0xf]  ;;  %v5075_v52 = vpop.f32.mrf.mxu0  ;;  %v8510_v57 = vld [vmem:[#allocation9 + $0x5c] sm:$0xf] }
 0x47b   :  { %5293 = vmatmul.bf16.vlgmr.msrb.gmra.mxu1 %v9202_v40  ;;  %v7854_v55 = vor.u32 %v8698_v45, %v7853_v38  ;;  %v8047_v0 = vld [vmem:[#allocation9 + $0x7b8] sm:$0xf0]  ;;  %v7122_v7 = vor.u32 %v8510_v57, %v7119_v58 }
 0x47c   :  { %5337 = vmatpush.bf16.msra.mxu1 %v7570_v51  ;;  %5315 = vmatpush.bf16.msrb.mxu3 %v7950_v60  ;;  %v8079_v51 = vld [vmem:[#allocation9 + $0x7f8] sm:$0xf0]  ;;  %v8050_v11 = vor.u32 %v8742_v8, %v8047_v0 }
 0x47d   :  { %v8082_v25 = vor.u32 %v8750_v50, %v8079_v51  ;;  %v7759_v60 = vld [vmem:[#allocation9 + $0x578] sm:$0xf0] }
 0x47e   :  { %5326 = vmatpush.bf16.msra.mxu0 %v7250_v59  ;;  %5304 = vmatpush.bf16.msrb.mxu2 %v7630_v10  ;;  %v8670_v59 = vld [vmem:[#allocation9 + $0x55c] sm:$0xf] }
 0x47f   :  { %v7762_v9 = vor.u32 %v8670_v59, %v7759_v60  ;;  %v8502_v15 = vld [vmem:[#allocation9 + $0x1c] sm:$0xf] }
 0x480   :  { %5338 = vmatpush.bf16.msra.mxu1 %v7538_v2  ;;  %5316 = vmatpush.bf16.msrb.mxu3 %v7918_v17  ;;  %v5060_v2 = vpop.f32.mrf.mxu3  ;;  %v5049_v10 = vpop.f32.mrf.mxu2  ;;  %v8574_v17 = vld [vmem:[#allocation9 + $0x25c] sm:$0xf]  ;;  %v7090_v22 = vor.u32 %v8502_v15, %v7087_v36 }
 0x481   :  { %v5061_v3 = vadd.f32 %v5060_v2, %v5048_v37  ;;  %v5088_v19 = vpop.f32.mrf.mxu1  ;;  %v8734_v20 = vld [vmem:[#allocation9 + $0x75c] sm:$0xf]  ;;  %v7378_v24 = vor.u32 %v8574_v17, %v7375_v18 }
 0x482   :  { %5327 = vmatpush.bf16.msra.mxu0 %v7218_v42  ;;  %5305 = vmatpush.bf16.msrb.mxu2 %v7598_v16  ;;  %v7727_v42 = vld [vmem:[#allocation9 + $0x538] sm:$0xf0] }
 0x483   :  { %5377 = vst [vmem:[%s9308_s13 + $0x8] sm:$0xff] %v5061_v3  ;;  %v7730_v23 = vor.u32 %v8662_v5, %v7727_v42  ;;  %v8654_v26 = vld [vmem:[#allocation9 + $0x4dc] sm:$0xf] }
 0x484   :  { %5339 = vmatpush.bf16.msra.mxu1 %v7506_v21  ;;  %5317 = vmatpush.bf16.msrb.mxu3 %v7886_v39  ;;  %v8015_v21 = vld [vmem:[#allocation9 + $0x778] sm:$0xf0] }
 0x485   :  { %5306 = vmatmul.bf16.vlgmr.msrb.gmra.mxu2 %v9206_v1  ;;  %v8018_v27 = vor.u32 %v8734_v20, %v8015_v21  ;;  %v7695_v13 = vld [vmem:[#allocation9 + $0x4f8] sm:$0xf0] }
 0x486   :  { %5328 = vmatpush.bf16.msra.mxu0 %v7186_v31  ;;  %5350 = vmatpush.bf16.msra.mxu2 %v7826_v32  ;;  %v8566_v14 = vld [vmem:[#allocation9 + $0x21c] sm:$0xf]  ;;  %v3666_v32 = vperm.slane %v9238_v63, 2  ;;  %v7698_v28 = vor.u32 %v8654_v26, %v7695_v13 }
 0x487   :  { %v7343_v16 = vld [vmem:[#allocation9 + $0x238] sm:$0xf0] }
 0x488   :  { %5340 = vmatpush.bf16.msra.mxu1 %v7474_v41  ;;  %5318 = vmatpush.bf16.msrb.mxu3 %v7854_v55  ;;  %v8726_v30 = vld [vmem:[#allocation9 + $0x71c] sm:$0xf]  ;;  %v5062_v35 = vpop.f32.mrf.mxu3  ;;  %v7346_v39 = vor.u32 %v8566_v14, %v7343_v16  ;;  %v5099_v41 = vpop.f32.mrf.mxu2  ;;  %v5074_v46 = vadd.f32 %v9253_v12, %v3666_v32 }
 0x489   :  { %v7983_v31 = vld [vmem:[#allocation9 + $0x738] sm:$0xf0]  ;;  %v3669_v35 = vperm.slane %v9238_v63, 5 }
 0x48a   :  { %5329 = vmatpush.bf16.msra.mxu0 %v7154_v53  ;;  %5351 = vmatpush.bf16.msra.mxu2 %v7794_v43  ;;  %v7986_v34 = vor.u32 %v8726_v30, %v7983_v31  ;;  %v8646_v48 = vld [vmem:[#allocation9 + $0x49c] sm:$0xf]  ;;  %v5087_v47 = vadd.f32 %v9257_v49, %v5074_v46 }
 0x48b   :  { %5319 = vmatmul.bf16.vlgmr.msrb.gmra.mxu3 %v9210_v29  ;;  %v7663_v38 = vld [vmem:[#allocation9 + $0x4b8] sm:$0xf0] }
 0x48c   :  { %5341 = vmatpush.bf16.msra.mxu1 %v7442_v56  ;;  %5363 = vmatpush.bf16.msra.mxu3 %v8082_v25  ;;  %v8718_v44 = vld [vmem:[#allocation9 + $0x6dc] sm:$0xf]  ;;  %v7666_v33 = vor.u32 %v8646_v48, %v7663_v38  ;;  %v5100_v54 = vadd.f32 %v5099_v41, %v5087_v47 }
 0x48d   :  { %v7951_v45 = vld [vmem:[#allocation9 + $0x6f8] sm:$0xf0] }
 0x48e   :  { %5330 = vmatpush.bf16.msra.mxu0 %v7122_v7  ;;  %5352 = vmatpush.bf16.msra.mxu2 %v7762_v9  ;;  %v7954_v50 = vor.u32 %v8718_v44, %v7951_v45  ;;  %v8638_v51 = vld [vmem:[#allocation9 + $0x45c] sm:$0xf]  ;;  %v3667_v9 = vperm.slane %v9238_v63, 3 }
 0x48f   :  { %v7631_v52 = vld [vmem:[#allocation9 + $0x478] sm:$0xf0] }
 0x490   :  { %5342 = vmatpush.bf16.msra.mxu1 %v7410_v6  ;;  %5364 = vmatpush.bf16.msra.mxu3 %v8050_v11  ;;  %v8710_v53 = vld [vmem:[#allocation9 + $0x69c] sm:$0xf]  ;;  %v7634_v56 = vor.u32 %v8638_v51, %v7631_v52  ;;  %v5101_v57 = vpop.f32.mrf.mxu2  ;;  %v3670_v51 = vperm.slane %v9238_v63, 6 }
 0x491   :  { %v7919_v43 = vld [vmem:[#allocation9 + $0x6b8] sm:$0xf0] }
 0x492   :  { %5331 = vmatpush.bf16.msra.mxu0 %v7090_v22  ;;  %5353 = vmatpush.bf16.msra.mxu2 %v7730_v23  ;;  %v5125_v55 = vpop.f32.mrf.mxu0  ;;  %v7922_v58 = vor.u32 %v8710_v53, %v7919_v43  ;;  %v8630_v59 = vld [vmem:[#allocation9 + $0x41c] sm:$0xf] }
 0x493   :  { %v7599_v25 = vld [vmem:[#allocation9 + $0x438] sm:$0xf0]  ;;  %v5126_v15 = vadd.f32 %v5125_v55, %v3667_v9 }
 0x494   :  { %5343 = vmatpush.bf16.msra.mxu1 %v7378_v24  ;;  %5365 = vmatpush.bf16.msra.mxu3 %v8018_v27  ;;  %v8702_v49 = vld [vmem:[#allocation9 + $0x65c] sm:$0xf]  ;;  %v7602_v61 = vor.u32 %v8630_v59, %v7599_v25 }
 0x495   :  { %5332 = vmatmul.bf16.vlgmr.msra.gmra.mxu0 %v9198_v4  ;;  %v5112_v4 = vpop.f32.mrf.mxu3  ;;  %v7887_v60 = vld [vmem:[#allocation9 + $0x678] sm:$0xf0] }
 0x496   :  { %5354 = vmatpush.bf16.msra.mxu2 %v7698_v28  ;;  %v5113_v12 = vadd.f32 %v5112_v4, %v5100_v54  ;;  %v8694_v37 = vld [vmem:[#allocation9 + $0x61c] sm:$0xf] }
 0x497   :  { %v7855_v8 = vld [vmem:[#allocation9 + $0x638] sm:$0xf0] }
 0x498   :  { %5344 = vmatpush.bf16.msra.mxu1 %v7346_v39  ;;  %5366 = vmatpush.bf16.msra.mxu3 %v7986_v34  ;;  %5378 = vst [vmem:[%s9308_s13 + $0x10] sm:$0xff] %v5113_v12  ;;  %v5138_v62 = vpop.f32.mrf.mxu1  ;;  %v7858_v7 = vor.u32 %v8694_v37, %v7855_v8 }
 0x499   :  { %v5139_v36 = vadd.f32 %v5138_v62, %v5126_v15 }
 0x49a   :  { %5355 = vmatpush.bf16.msra.mxu2 %v7666_v33  ;;  %v5127_v2 = vpop.f32.mrf.mxu0 }
 0x49b   :  { %5345 = vmatmul.bf16.vlgmr.msra.gmra.mxu1 %v9202_v40  ;;  %v7890_v40 = vor.u32 %v8702_v49, %v7887_v60  ;;  %v3671_v49 = vperm.slane %v9238_v63, 7 }
 0x49c   :  { %5367 = vmatpush.bf16.msra.mxu3 %v7954_v50 }
 0x49d   :  { %v5114_v0 = vpop.f32.mrf.mxu3 }
 0x49e   :  { %5356 = vmatpush.bf16.msra.mxu2 %v7634_v56 }
 0x4a0   :  { %5368 = vmatpush.bf16.msra.mxu3 %v7922_v58  ;;  %v5140_v3 = vpop.f32.mrf.mxu1 }
 0x4a2   :  { %5357 = vmatpush.bf16.msra.mxu2 %v7602_v61 }
 0x4a4   :  { %5369 = vmatpush.bf16.msra.mxu3 %v7890_v40 }
 0x4a5   :  { %5358 = vmatmul.bf16.vlgmr.msra.gmra.mxu2 %v9206_v1 }
 0x4a8   :  { %5370 = vmatpush.bf16.msra.mxu3 %v7858_v7  ;;  %v5151_v6 = vpop.f32.mrf.mxu2 }
 0x4a9   :  { %v5152_v5 = vadd.f32 %v5151_v6, %v5139_v36 }
 0x4ab   :  { %5371 = vmatmul.bf16.vlgmr.msra.gmra.mxu3 %v9210_v29  ;;  %v3668_v29 = vperm.slane %v9238_v63, 4 }
 0x4ae   :  { %v5164_v10 = vpop.f32.mrf.mxu3 }
 0x4af   :  { %v5165_v11 = vadd.f32 %v5164_v10, %v5152_v5 }
 0x4b0   :  { %v5153_v17 = vpop.f32.mrf.mxu2 }
 0x4b1   :  { %5379 = vst [vmem:[%s9308_s13 + $0x18] sm:$0xff] %v5165_v11 }
 0x4b2   :  { %v5177_v42 = vpop.f32.mrf.mxu0 }
 0x4b3   :  { %v5178_v22 = vadd.f32 %v5177_v42, %v3668_v29 }
 0x4b6   :  { %v5166_v1 = vpop.f32.mrf.mxu3 }
 0x4b8   :  { %v5190_v18 = vpop.f32.mrf.mxu1 }
 0x4b9   :  { %v5191_v23 = vadd.f32 %v5190_v18, %v5178_v22 }
 0x4ba   :  { %v5179_v19 = vpop.f32.mrf.mxu0 }
 0x4c0   :  { %v5192_v20 = vpop.f32.mrf.mxu1 }
 0x4c8   :  { %v5203_v21 = vpop.f32.mrf.mxu2 }
 0x4c9   :  { %v5204_v24 = vadd.f32 %v5203_v21, %v5191_v23 }
 0x4ce   :  { %v5216_v26 = vpop.f32.mrf.mxu3 }
 0x4cf   :  { %v5217_v27 = vadd.f32 %v5216_v26, %v5204_v24 }
 0x4d0   :  { %v5205_v14 = vpop.f32.mrf.mxu2 }
 0x4d1   :  { %5380 = vst [vmem:[%s9308_s13 + $0x20] sm:$0xff] %v5217_v27 }
 0x4d2   :  { %v5229_v13 = vpop.f32.mrf.mxu0 }
 0x4d3   :  { %v5230_v39 = vadd.f32 %v5229_v13, %v3669_v35 }
 0x4d6   :  { %v5218_v30 = vpop.f32.mrf.mxu3 }
 0x4d8   :  { %v5242_v16 = vpop.f32.mrf.mxu1 }
 0x4d9   :  { %v5243_v41 = vadd.f32 %v5242_v16, %v5230_v39 }
 0x4da   :  { %v5231_v31 = vpop.f32.mrf.mxu0 }
 0x4e0   :  { %v5244_v32 = vpop.f32.mrf.mxu1 }
 0x4e8   :  { %v5255_v28 = vpop.f32.mrf.mxu2 }
 0x4e9   :  { %v5256_v34 = vadd.f32 %v5255_v28, %v5243_v41 }
 0x4ee   :  { %v5268_v48 = vpop.f32.mrf.mxu3 }
 0x4ef   :  { %v5269_v38 = vadd.f32 %v5268_v48, %v5256_v34 }
 0x4f0   :  { %v5257_v45 = vpop.f32.mrf.mxu2 }
 0x4f1   :  { %5381 = vst [vmem:[%s9308_s13 + $0x28] sm:$0xff] %v5269_v38 }
 0x4f2   :  { %v5281_v44 = vpop.f32.mrf.mxu0 }
 0x4f3   :  { %v5282_v53 = vadd.f32 %v5281_v44, %v3670_v51 }
 0x4f6   :  { %v5270_v33 = vpop.f32.mrf.mxu3 }
 0x4f8   :  { %v5294_v46 = vpop.f32.mrf.mxu1 }
 0x4f9   :  { %v5295_v43 = vadd.f32 %v5294_v46, %v5282_v53 }
 0x4fa   :  { %v5283_v47 = vpop.f32.mrf.mxu0 }
 0x500   :  { %v5296_v50 = vpop.f32.mrf.mxu1 }
 0x508   :  { %v5307_v52 = vpop.f32.mrf.mxu2 }
 0x509   :  { %v5308_v54 = vadd.f32 %v5307_v52, %v5295_v43 }
 0x50e   :  { %v5320_v4 = vpop.f32.mrf.mxu3 }
 0x50f   :  { %v5321_v55 = vadd.f32 %v5320_v4, %v5308_v54 }
 0x510   :  { %v5309_v12 = vpop.f32.mrf.mxu2 }
 0x511   :  { %5382 = vst [vmem:[%s9308_s13 + $0x30] sm:$0xff] %v5321_v55 }
 0x512   :  { %v5333_v56 = vpop.f32.mrf.mxu0 }
 0x513   :  { %v5334_v60 = vadd.f32 %v5333_v56, %v3671_v49 }
 0x516   :  { %v5322_v58 = vpop.f32.mrf.mxu3 }
 0x518   :  { %v5346_v57 = vpop.f32.mrf.mxu1 }
 0x519   :  { %v5347_v40 = vadd.f32 %v5346_v57, %v5334_v60 }
 0x51a   :  { %v5335_v59 = vpop.f32.mrf.mxu0 }
 0x520   :  { %v5348_v25 = vpop.f32.mrf.mxu1 }
 0x528   :  { %v5359_v61 = vpop.f32.mrf.mxu2 }
 0x529   :  { %v5360_v62 = vadd.f32 %v5359_v61, %v5347_v40 }
 0x52e   :  { %v5372_v37 = vpop.f32.mrf.mxu3 }
 0x52f   :  { %v5373_v8 = vadd.f32 %v5372_v37, %v5360_v62 }
 0x530   :  { %v5361_v0 = vpop.f32.mrf.mxu2 }
 0x531   :  { %5383 = vst [vmem:[%s9308_s13 + $0x38] sm:$0xff] %v5373_v8 }
 0x536   :  { %v5374_v2 = vpop.f32.mrf.mxu3 }
 0x537   :  { %5392 = vsyncpa [#allocation3], 1 }
 0x538   :  { %5393 = vsyncpa [#allocation5], 1 }
 0x539   :  { %5394 = vsyncpa [#allocation8], 1 }

</bundles_post_ra>
